<compile_context>
chip_gen: v6e
topology: v6e:2x2x1
jax: 0.10.0
libtpu: 0.0.40
codegen_flags: <defaults>
</compile_context>

<pallas_src>
import jax
import jax.numpy as jnp
import numpy as np
from jax import lax
from jax.experimental import pallas as pl
from jax.experimental.pallas import tpu as pltpu


# ------------------------------ fused kernel ----------------------------------
def fused_text_model_kernel(sent_ref, emb1_ref, emb2_ref, tproj_ref,
                            whh_ref, b_lstm_ref,
                            w1e1_ref, w1e2_ref, w1h_ref, b1_ref,
                            w2_ref, b2_ref, w3_ref, b3_ref,
                            w4_ref, b4_ref, out_ref, xw_ref):
    TB = sent_ref.shape[0]            # T * B_pad, time-major flattened token ids
    Bp = emb1_ref.shape[0]            # padded batch (multiple of 16)
    T = TB // Bp
    H = whh_ref.shape[0]
    vocab = tproj_ref.shape[0]

    # ---- Embedding folded into the LSTM input projection (exact selection):
    #      xw = onehot(ids) @ (emb_table @ W_ih^T) + (b_ih + b_hh).  Staged in VMEM scratch
    #      so it is not a 32-vreg traced value live across the whole unrolled recurrence.
    ids = sent_ref[...]                                                  # [TB, 1] int32
    iota = lax.broadcasted_iota(jnp.int32, (TB, vocab), 1)
    onehot = (iota == ids).astype(jnp.bfloat16)                          # [TB, vocab]
    xw_ref[...] = jnp.dot(onehot, tproj_ref[...],
                          preferred_element_type=jnp.float32) + b_lstm_ref[...]   # [TB,4H]

    # ---- LSTM recurrence, fully unrolled. Gate column order is (i, f, o, g). ----
    h = jnp.zeros((Bp, H), jnp.float32)
    c = jnp.zeros((Bp, H), jnp.float32)
    for t in range(T):
        gates = xw_ref[pl.ds(t * Bp, Bp), :] + jnp.dot(
            h.astype(jnp.bfloat16), whh_ref[...],
            preferred_element_type=jnp.float32)                          # [Bp, 4H] f32
        ifo = jax.nn.sigmoid(gates[:, :3 * H])                           # one wide sigmoid
        g = jnp.tanh(gates[:, 3 * H:])                                   # one tanh
        c = ifo[:, H:2 * H] * c + ifo[:, :H] * g                         # f*c + i*g
        h = ifo[:, 2 * H:3 * H] * jnp.tanh(c)                            # o*tanh(c)

    # ---- MLP head; concat(emb1, emb2, h) fused away via split fc1 weight blocks. ----
    a1 = (jnp.dot(emb1_ref[...], w1e1_ref[...], preferred_element_type=jnp.float32)
          + jnp.dot(emb2_ref[...], w1e2_ref[...], preferred_element_type=jnp.float32)
          + jnp.dot(h.astype(jnp.bfloat16), w1h_ref[...], preferred_element_type=jnp.float32)
          + b1_ref[...])
    a1 = jnp.maximum(a1, 0.0).astype(jnp.bfloat16)
    a2 = jnp.maximum(
        jnp.dot(a1, w2_ref[...], preferred_element_type=jnp.float32) + b2_ref[...],
        0.0).astype(jnp.bfloat16)
    a3 = jnp.maximum(
        jnp.dot(a2, w3_ref[...], preferred_element_type=jnp.float32) + b3_ref[...],
        0.0).astype(jnp.bfloat16)
    out_ref[...] = (jnp.dot(a3, w4_ref[...], preferred_element_type=jnp.float32)
                    + b4_ref[...])                                       # [Bp, 128] f32


# ------------------------------- wrapper ---------------------------------------
def text_model_forward(sent, emb1, emb2, kp, out_dim=2):
    """sent: [B, T] int32; emb1, emb2: [B, input_dim] f32. Returns [B, out_dim] f32."""
    B, T = sent.shape
    Bp = ((B + 15) // 16) * 16                    # pad batch: full packed bf16 [16,128] vreg
    pad = Bp - B
    sent_p = jnp.pad(sent, ((0, pad), (0, 0)))    # pad rows use id 0 (discarded on return)
    emb1_p = jnp.pad(emb1, ((0, pad), (0, 0))).astype(jnp.bfloat16)
    emb2_p = jnp.pad(emb2, ((0, pad), (0, 0))).astype(jnp.bfloat16)
    # Transpose only the tiny int index matrix (not gathered f32 embeddings): time-major ids.
    sent_tm = jnp.transpose(sent_p, (1, 0)).reshape(T * Bp, 1)

    H = kp["w_hh"].shape[0]
    out_dim_p = kp["w4"].shape[1]                 # fc_out padded to a lane-dense width
    out_pad = pl.pallas_call(
        fused_text_model_kernel,
        out_shape=jax.ShapeDtypeStruct((Bp, out_dim_p), jnp.float32),
        in_specs=[pl.BlockSpec(memory_space=pltpu.MemorySpace.VMEM)] * 16,
        out_specs=pl.BlockSpec(memory_space=pltpu.MemorySpace.VMEM),
        scratch_shapes=[pltpu.VMEM((T * Bp, 4 * H), jnp.float32)],       # staged xw
    )(sent_tm, emb1_p, emb2_p,
      kp["table_proj"], kp["w_hh"], kp["b_lstm"],
      kp["w1_e1"], kp["w1_e2"], kp["w1_h"], kp["b1"],
      kp["w2"], kp["b2"], kp["w3"], kp["b3"], kp["w4"], kp["b4"])
    return out_pad[:B, :out_dim]


# ------------------------- params (PyTorch layout) ------------------------------
def init_params_torch_layout(key, vocab, embedding_dim, lstm_dim, input_dim, scale=0.1):
    ks = jax.random.split(key, 13)
    H = lstm_dim
    fc1_in = input_dim * 2 + lstm_dim
    rnd = lambda k, shape: jax.random.normal(k, shape, jnp.float32) * scale
    return {
        "emb_table": rnd(ks[0], (vocab, embedding_dim)),
        "w_ih_l0": rnd(ks[1], (4 * H, embedding_dim)),   # PyTorch gate order (i, f, g, o)
        "w_hh_l0": rnd(ks[2], (4 * H, H)),
        "b_ih_l0": rnd(ks[3], (4 * H,)),
        "b_hh_l0": rnd(ks[4], (4 * H,)),
        "fc1_w": rnd(ks[5], (512, fc1_in)), "fc1_b": rnd(ks[6], (512,)),
        "fc2_w": rnd(ks[7], (256, 512)),    "fc2_b": rnd(ks[8], (256,)),
        "fc3_w": rnd(ks[9], (128, 256)),    "fc3_b": rnd(ks[10], (128,)),
        "fc_out_w": rnd(ks[11], (2, 128)),  "fc_out_b": rnd(ks[12], (2,)),
    }


def prepare_kernel_params(p, input_dim):
    """PyTorch-layout f32 params -> kernel layout:
       * LSTM gates reordered (i,f,g,o)->(i,f,o,g), combined bias (f32).
       * Embedding folded into the input projection: table_proj = emb_table @ W_ih^T,
         computed in f32 then cast to bf16 ([vocab, 4H]).
       * fc weights transposed to [in,out] bf16; fc1 split by input block (emb1/emb2/h).
       * fc_out zero-padded to a 128-lane output width.  Biases stay f32."""
    H = p["w_hh_l0"].shape[1]
    perm = jnp.concatenate([jnp.arange(0, 2 * H),        # i, f
                            jnp.arange(3 * H, 4 * H),    # o
                            jnp.arange(2 * H, 3 * H)])   # g
    w_ih_perm = p["w_ih_l0"][perm]                       # [4H, E], reordered gate rows
    table_proj = (p["emb_table"] @ w_ih_perm.T)          # [vocab, 4H] f32 (exact fold)
    w1t = p["fc1_w"].T                                   # [2*input_dim + H, 512]
    out_dim = p["fc_out_w"].shape[0]
    out_dim_p = ((out_dim + 127) // 128) * 128
    return {
        "table_proj": table_proj.astype(jnp.bfloat16),
        "w_hh": p["w_hh_l0"][perm].T.astype(jnp.bfloat16),              # [H, 4H]
        "b_lstm": (p["b_ih_l0"] + p["b_hh_l0"])[perm].reshape(1, -1),   # f32 [1, 4H]
        "w1_e1": w1t[:input_dim].astype(jnp.bfloat16),
        "w1_e2": w1t[input_dim:2 * input_dim].astype(jnp.bfloat16),
        "w1_h": w1t[2 * input_dim:].astype(jnp.bfloat16),
        "b1": p["fc1_b"].reshape(1, -1),
        "w2": p["fc2_w"].T.astype(jnp.bfloat16), "b2": p["fc2_b"].reshape(1, -1),
        "w3": p["fc3_w"].T.astype(jnp.bfloat16), "b3": p["fc3_b"].reshape(1, -1),
        "w4": jnp.pad(p["fc_out_w"].T,
                      ((0, 0), (0, out_dim_p - out_dim))).astype(jnp.bfloat16),
        "b4": jnp.pad(p["fc_out_b"], (0, out_dim_p - out_dim)).reshape(1, -1),
    }


# -------------------------- pure-JAX f32 reference ------------------------------
def reference_forward(sent, emb1, emb2, p):
    x = p["emb_table"][sent]                          # [B, T, E]
    B, T, _ = x.shape
    H = p["w_hh_l0"].shape[1]
    h = jnp.zeros((B, H), jnp.float32)
    c = jnp.zeros((B, H), jnp.float32)
    for t in range(T):
        gates = (x[:, t, :] @ p["w_ih_l0"].T + h @ p["w_hh_l0"].T
                 + p["b_ih_l0"] + p["b_hh_l0"])
        i = jax.nn.sigmoid(gates[:, 0 * H:1 * H])
        f = jax.nn.sigmoid(gates[:, 1 * H:2 * H])
        g = jnp.tanh(gates[:, 2 * H:3 * H])
        o = jax.nn.sigmoid(gates[:, 3 * H:4 * H])
        c = f * c + i * g
        h = o * jnp.tanh(c)
    feat = jnp.concatenate([emb1, emb2, h], axis=1)
    a = jnp.maximum(feat @ p["fc1_w"].T + p["fc1_b"], 0.0)
    a = jnp.maximum(a @ p["fc2_w"].T + p["fc2_b"], 0.0)
    a = jnp.maximum(a @ p["fc3_w"].T + p["fc3_b"], 0.0)
    return a @ p["fc_out_w"].T + p["fc_out_b"]


if __name__ == "__main__":
    # Small shapes consistent with the module (scaled-down, lane-aligned dims).
    B, T = 4, 8
    vocab = 16          # stand-in for len(word_to_ix)
    input_dim = 128     # emb1 / emb2 feature dim
    embedding_dim = 128
    lstm_dim = 128

    key = jax.random.PRNGKey(0)
    k_sent, k_e1, k_e2, k_params = jax.random.split(key, 4)

    sent = jax.random.randint(k_sent, (B, T), 0, vocab, dtype=jnp.int32)
    emb1 = jax.random.normal(k_e1, (B, input_dim), jnp.float32)
    emb2 = jax.random.normal(k_e2, (B, input_dim), jnp.float32)

    torch_params = init_params_torch_layout(k_params, vocab, embedding_dim,
                                            lstm_dim, input_dim)
    kernel_params = prepare_kernel_params(torch_params, input_dim)

    fwd = jax.jit(text_model_forward)
    out = fwd(sent, emb1, emb2, kernel_params)
    out = jax.block_until_ready(out)
    assert out.shape == (B, 2), out.shape

    # Sanity check against a pure-JAX f32 reference (bf16 matmul weights -> loose tolerance).
    ref = reference_forward(sent, emb1, emb2, torch_params)
    np.testing.assert_allclose(np.asarray(out), np.asarray(ref), rtol=0.1, atol=0.1)

    print("KERNEL_OK")
</pallas_src>

<mosaic_0001>
module attributes {stable_mosaic.version = 11 : i64} {
  func.func @fused_text_model_kernel(%arg0: memref<128x1xi32, #tpu.memory_space<vmem>>, %arg1: memref<16x128xbf16, #tpu.memory_space<vmem>>, %arg2: memref<16x128xbf16, #tpu.memory_space<vmem>>, %arg3: memref<16x512xbf16, #tpu.memory_space<vmem>>, %arg4: memref<128x512xbf16, #tpu.memory_space<vmem>>, %arg5: memref<1x512xf32, #tpu.memory_space<vmem>>, %arg6: memref<128x512xbf16, #tpu.memory_space<vmem>>, %arg7: memref<128x512xbf16, #tpu.memory_space<vmem>>, %arg8: memref<128x512xbf16, #tpu.memory_space<vmem>>, %arg9: memref<1x512xf32, #tpu.memory_space<vmem>>, %arg10: memref<512x256xbf16, #tpu.memory_space<vmem>>, %arg11: memref<1x256xf32, #tpu.memory_space<vmem>>, %arg12: memref<256x128xbf16, #tpu.memory_space<vmem>>, %arg13: memref<1x128xf32, #tpu.memory_space<vmem>>, %arg14: memref<128x128xbf16, #tpu.memory_space<vmem>>, %arg15: memref<1x128xf32, #tpu.memory_space<vmem>>, %arg16: memref<16x128xf32, #tpu.memory_space<vmem>>, %arg17: memref<128x512xf32, #tpu.memory_space<vmem>>) attributes {dimension_semantics = [], scalar_prefetch = 0 : i64, scratch_operands = 1 : i64, tpu.core_type = #tpu.core_type<tc>} {
    %c0 = arith.constant 0 : index
    %c0_0 = arith.constant 0 : index
    %0 = vector.load %arg0[%c0, %c0_0] : memref<128x1xi32, #tpu.memory_space<vmem>>, vector<128x1xi32>
    %1 = tpu.iota {dimensions = array<i32: 1>} : vector<128x16xi32>
    %2 = vector.broadcast %0 : vector<128x1xi32> to vector<128x16xi32>
    %3 = arith.cmpi eq, %1, %2 : vector<128x16xi32>
    %4 = arith.extui %3 : vector<128x16xi1> to vector<128x16xi32>
    %5 = arith.sitofp %4 : vector<128x16xi32> to vector<128x16xf32>
    %6 = arith.truncf %5 : vector<128x16xf32> to vector<128x16xbf16>
    %c0_1 = arith.constant 0 : index
    %c0_2 = arith.constant 0 : index
    %7 = vector.load %arg3[%c0_1, %c0_2] : memref<16x512xbf16, #tpu.memory_space<vmem>>, vector<16x512xbf16>
    %cst = arith.constant dense<0.000000e+00> : vector<128x512xf32>
    %8 = tpu.matmul %6, %7, %cst {dimension_numbers = #tpu.dot_dimension_numbers<[1], [0], [0], [1], [0, 0, 1, 1], [], []>} : vector<128x16xbf16>, vector<16x512xbf16>, vector<128x512xf32> -> vector<128x512xf32>
    %c0_3 = arith.constant 0 : index
    %c0_4 = arith.constant 0 : index
    %9 = vector.load %arg5[%c0_3, %c0_4] : memref<1x512xf32, #tpu.memory_space<vmem>>, vector<1x512xf32>
    %10 = vector.broadcast %9 : vector<1x512xf32> to vector<128x512xf32>
    %11 = arith.addf %8, %10 : vector<128x512xf32>
    %c0_5 = arith.constant 0 : index
    %c0_6 = arith.constant 0 : index
    %12 = vector.load %arg17[%c0_5, %c0_6] : memref<128x512xf32, #tpu.memory_space<vmem>>, vector<128x512xf32>
    tpu.vector_store %arg17[%c0_5, %c0_6], %11 {strides = array<i32>} : memref<128x512xf32, #tpu.memory_space<vmem>>, vector<128x512xf32>,
    %cst_7 = arith.constant 0.000000e+00 : f32
    %13 = vector.broadcast %cst_7 : f32 to vector<16x128xf32>
    %cst_8 = arith.constant 0.000000e+00 : f32
    %14 = vector.broadcast %cst_8 : f32 to vector<16x128xf32>
    %c0_9 = arith.constant 0 : index
    %c0_10 = arith.constant 0 : index
    %15 = vector.load %arg17[%c0_9, %c0_10] : memref<128x512xf32, #tpu.memory_space<vmem>>, vector<16x512xf32>
    %16 = arith.truncf %13 : vector<16x128xf32> to vector<16x128xbf16>
    %c0_11 = arith.constant 0 : index
    %c0_12 = arith.constant 0 : index
    %17 = vector.load %arg4[%c0_11, %c0_12] : memref<128x512xbf16, #tpu.memory_space<vmem>>, vector<128x512xbf16>
    %cst_13 = arith.constant dense<0.000000e+00> : vector<16x512xf32>
    %18 = tpu.matmul %16, %17, %cst_13 {dimension_numbers = #tpu.dot_dimension_numbers<[1], [0], [0], [1], [0, 0, 1, 1], [], []>} : vector<16x128xbf16>, vector<128x512xbf16>, vector<16x512xf32> -> vector<16x512xf32>
    %19 = arith.addf %15, %18 : vector<16x512xf32>
    %20 = vector.extract_strided_slice %19 {offsets = [0, 0], sizes = [16, 384], strides = [1, 1]} : vector<16x512xf32> to vector<16x384xf32>
    %21 = arith.negf %20 : vector<16x384xf32>
    %22 = math.exp %21 : vector<16x384xf32>
    %cst_14 = arith.constant 1.000000e+00 : f32
    %23 = vector.broadcast %cst_14 : f32 to vector<16x384xf32>
    %24 = arith.addf %23, %22 : vector<16x384xf32>
    %25 = arith.divf %23, %24 : vector<16x384xf32>
    %26 = vector.extract_strided_slice %19 {offsets = [0, 384], sizes = [16, 128], strides = [1, 1]} : vector<16x512xf32> to vector<16x128xf32>
    %27 = math.tanh %26 : vector<16x128xf32>
    %28 = vector.extract_strided_slice %25 {offsets = [0, 128], sizes = [16, 128], strides = [1, 1]} : vector<16x384xf32> to vector<16x128xf32>
    %29 = arith.mulf %28, %14 : vector<16x128xf32>
    %30 = vector.extract_strided_slice %25 {offsets = [0, 0], sizes = [16, 128], strides = [1, 1]} : vector<16x384xf32> to vector<16x128xf32>
    %31 = arith.mulf %30, %27 : vector<16x128xf32>
    %32 = arith.addf %29, %31 : vector<16x128xf32>
    %33 = vector.extract_strided_slice %25 {offsets = [0, 256], sizes = [16, 128], strides = [1, 1]} : vector<16x384xf32> to vector<16x128xf32>
    %34 = math.tanh %32 : vector<16x128xf32>
    %35 = arith.mulf %33, %34 : vector<16x128xf32>
    %c16 = arith.constant 16 : index
    %c0_15 = arith.constant 0 : index
    %36 = vector.load %arg17[%c16, %c0_15] : memref<128x512xf32, #tpu.memory_space<vmem>>, vector<16x512xf32>
    %37 = arith.truncf %35 : vector<16x128xf32> to vector<16x128xbf16>
    %c0_16 = arith.constant 0 : index
    %c0_17 = arith.constant 0 : index
    %38 = vector.load %arg4[%c0_16, %c0_17] : memref<128x512xbf16, #tpu.memory_space<vmem>>, vector<128x512xbf16>
    %cst_18 = arith.constant dense<0.000000e+00> : vector<16x512xf32>
    %39 = tpu.matmul %37, %38, %cst_18 {dimension_numbers = #tpu.dot_dimension_numbers<[1], [0], [0], [1], [0, 0, 1, 1], [], []>} : vector<16x128xbf16>, vector<128x512xbf16>, vector<16x512xf32> -> vector<16x512xf32>
    %40 = arith.addf %36, %39 : vector<16x512xf32>
    %41 = vector.extract_strided_slice %40 {offsets = [0, 0], sizes = [16, 384], strides = [1, 1]} : vector<16x512xf32> to vector<16x384xf32>
    %42 = arith.negf %41 : vector<16x384xf32>
    %43 = math.exp %42 : vector<16x384xf32>
    %cst_19 = arith.constant 1.000000e+00 : f32
    %44 = vector.broadcast %cst_19 : f32 to vector<16x384xf32>
    %45 = arith.addf %44, %43 : vector<16x384xf32>
    %46 = arith.divf %44, %45 : vector<16x384xf32>
    %47 = vector.extract_strided_slice %40 {offsets = [0, 384], sizes = [16, 128], strides = [1, 1]} : vector<16x512xf32> to vector<16x128xf32>
    %48 = math.tanh %47 : vector<16x128xf32>
    %49 = vector.extract_strided_slice %46 {offsets = [0, 128], sizes = [16, 128], strides = [1, 1]} : vector<16x384xf32> to vector<16x128xf32>
    %50 = arith.mulf %49, %32 : vector<16x128xf32>
    %51 = vector.extract_strided_slice %46 {offsets = [0, 0], sizes = [16, 128], strides = [1, 1]} : vector<16x384xf32> to vector<16x128xf32>
    %52 = arith.mulf %51, %48 : vector<16x128xf32>
    %53 = arith.addf %50, %52 : vector<16x128xf32>
    %54 = vector.extract_strided_slice %46 {offsets = [0, 256], sizes = [16, 128], strides = [1, 1]} : vector<16x384xf32> to vector<16x128xf32>
    %55 = math.tanh %53 : vector<16x128xf32>
    %56 = arith.mulf %54, %55 : vector<16x128xf32>
    %c32 = arith.constant 32 : index
    %c0_20 = arith.constant 0 : index
    %57 = vector.load %arg17[%c32, %c0_20] : memref<128x512xf32, #tpu.memory_space<vmem>>, vector<16x512xf32>
    %58 = arith.truncf %56 : vector<16x128xf32> to vector<16x128xbf16>
    %c0_21 = arith.constant 0 : index
    %c0_22 = arith.constant 0 : index
    %59 = vector.load %arg4[%c0_21, %c0_22] : memref<128x512xbf16, #tpu.memory_space<vmem>>, vector<128x512xbf16>
    %cst_23 = arith.constant dense<0.000000e+00> : vector<16x512xf32>
    %60 = tpu.matmul %58, %59, %cst_23 {dimension_numbers = #tpu.dot_dimension_numbers<[1], [0], [0], [1], [0, 0, 1, 1], [], []>} : vector<16x128xbf16>, vector<128x512xbf16>, vector<16x512xf32> -> vector<16x512xf32>
    %61 = arith.addf %57, %60 : vector<16x512xf32>
    %62 = vector.extract_strided_slice %61 {offsets = [0, 0], sizes = [16, 384], strides = [1, 1]} : vector<16x512xf32> to vector<16x384xf32>
    %63 = arith.negf %62 : vector<16x384xf32>
    %64 = math.exp %63 : vector<16x384xf32>
    %cst_24 = arith.constant 1.000000e+00 : f32
    %65 = vector.broadcast %cst_24 : f32 to vector<16x384xf32>
    %66 = arith.addf %65, %64 : vector<16x384xf32>
    %67 = arith.divf %65, %66 : vector<16x384xf32>
    %68 = vector.extract_strided_slice %61 {offsets = [0, 384], sizes = [16, 128], strides = [1, 1]} : vector<16x512xf32> to vector<16x128xf32>
    %69 = math.tanh %68 : vector<16x128xf32>
    %70 = vector.extract_strided_slice %67 {offsets = [0, 128], sizes = [16, 128], strides = [1, 1]} : vector<16x384xf32> to vector<16x128xf32>
    %71 = arith.mulf %70, %53 : vector<16x128xf32>
    %72 = vector.extract_strided_slice %67 {offsets = [0, 0], sizes = [16, 128], strides = [1, 1]} : vector<16x384xf32> to vector<16x128xf32>
    %73 = arith.mulf %72, %69 : vector<16x128xf32>
    %74 = arith.addf %71, %73 : vector<16x128xf32>
    %75 = vector.extract_strided_slice %67 {offsets = [0, 256], sizes = [16, 128], strides = [1, 1]} : vector<16x384xf32> to vector<16x128xf32>
    %76 = math.tanh %74 : vector<16x128xf32>
    %77 = arith.mulf %75, %76 : vector<16x128xf32>
    %c48 = arith.constant 48 : index
    %c0_25 = arith.constant 0 : index
    %78 = vector.load %arg17[%c48, %c0_25] : memref<128x512xf32, #tpu.memory_space<vmem>>, vector<16x512xf32>
    %79 = arith.truncf %77 : vector<16x128xf32> to vector<16x128xbf16>
    %c0_26 = arith.constant 0 : index
    %c0_27 = arith.constant 0 : index
    %80 = vector.load %arg4[%c0_26, %c0_27] : memref<128x512xbf16, #tpu.memory_space<vmem>>, vector<128x512xbf16>
    %cst_28 = arith.constant dense<0.000000e+00> : vector<16x512xf32>
    %81 = tpu.matmul %79, %80, %cst_28 {dimension_numbers = #tpu.dot_dimension_numbers<[1], [0], [0], [1], [0, 0, 1, 1], [], []>} : vector<16x128xbf16>, vector<128x512xbf16>, vector<16x512xf32> -> vector<16x512xf32>
    %82 = arith.addf %78, %81 : vector<16x512xf32>
    %83 = vector.extract_strided_slice %82 {offsets = [0, 0], sizes = [16, 384], strides = [1, 1]} : vector<16x512xf32> to vector<16x384xf32>
    %84 = arith.negf %83 : vector<16x384xf32>
    %85 = math.exp %84 : vector<16x384xf32>
    %cst_29 = arith.constant 1.000000e+00 : f32
    %86 = vector.broadcast %cst_29 : f32 to vector<16x384xf32>
    %87 = arith.addf %86, %85 : vector<16x384xf32>
    %88 = arith.divf %86, %87 : vector<16x384xf32>
    %89 = vector.extract_strided_slice %82 {offsets = [0, 384], sizes = [16, 128], strides = [1, 1]} : vector<16x512xf32> to vector<16x128xf32>
    %90 = math.tanh %89 : vector<16x128xf32>
    %91 = vector.extract_strided_slice %88 {offsets = [0, 128], sizes = [16, 128], strides = [1, 1]} : vector<16x384xf32> to vector<16x128xf32>
    %92 = arith.mulf %91, %74 : vector<16x128xf32>
    %93 = vector.extract_strided_slice %88 {offsets = [0, 0], sizes = [16, 128], strides = [1, 1]} : vector<16x384xf32> to vector<16x128xf32>
    %94 = arith.mulf %93, %90 : vector<16x128xf32>
    %95 = arith.addf %92, %94 : vector<16x128xf32>
    %96 = vector.extract_strided_slice %88 {offsets = [0, 256], sizes = [16, 128], strides = [1, 1]} : vector<16x384xf32> to vector<16x128xf32>
    %97 = math.tanh %95 : vector<16x128xf32>
    %98 = arith.mulf %96, %97 : vector<16x128xf32>
    %c64 = arith.constant 64 : index
    %c0_30 = arith.constant 0 : index
    %99 = vector.load %arg17[%c64, %c0_30] : memref<128x512xf32, #tpu.memory_space<vmem>>, vector<16x512xf32>
    %100 = arith.truncf %98 : vector<16x128xf32> to vector<16x128xbf16>
    %c0_31 = arith.constant 0 : index
    %c0_32 = arith.constant 0 : index
    %101 = vector.load %arg4[%c0_31, %c0_32] : memref<128x512xbf16, #tpu.memory_space<vmem>>, vector<128x512xbf16>
    %cst_33 = arith.constant dense<0.000000e+00> : vector<16x512xf32>
    %102 = tpu.matmul %100, %101, %cst_33 {dimension_numbers = #tpu.dot_dimension_numbers<[1], [0], [0], [1], [0, 0, 1, 1], [], []>} : vector<16x128xbf16>, vector<128x512xbf16>, vector<16x512xf32> -> vector<16x512xf32>
    %103 = arith.addf %99, %102 : vector<16x512xf32>
    %104 = vector.extract_strided_slice %103 {offsets = [0, 0], sizes = [16, 384], strides = [1, 1]} : vector<16x512xf32> to vector<16x384xf32>
    %105 = arith.negf %104 : vector<16x384xf32>
    %106 = math.exp %105 : vector<16x384xf32>
    %cst_34 = arith.constant 1.000000e+00 : f32
    %107 = vector.broadcast %cst_34 : f32 to vector<16x384xf32>
    %108 = arith.addf %107, %106 : vector<16x384xf32>
    %109 = arith.divf %107, %108 : vector<16x384xf32>
    %110 = vector.extract_strided_slice %103 {offsets = [0, 384], sizes = [16, 128], strides = [1, 1]} : vector<16x512xf32> to vector<16x128xf32>
    %111 = math.tanh %110 : vector<16x128xf32>
    %112 = vector.extract_strided_slice %109 {offsets = [0, 128], sizes = [16, 128], strides = [1, 1]} : vector<16x384xf32> to vector<16x128xf32>
    %113 = arith.mulf %112, %95 : vector<16x128xf32>
    %114 = vector.extract_strided_slice %109 {offsets = [0, 0], sizes = [16, 128], strides = [1, 1]} : vector<16x384xf32> to vector<16x128xf32>
    %115 = arith.mulf %114, %111 : vector<16x128xf32>
    %116 = arith.addf %113, %115 : vector<16x128xf32>
    %117 = vector.extract_strided_slice %109 {offsets = [0, 256], sizes = [16, 128], strides = [1, 1]} : vector<16x384xf32> to vector<16x128xf32>
    %118 = math.tanh %116 : vector<16x128xf32>
    %119 = arith.mulf %117, %118 : vector<16x128xf32>
    %c80 = arith.constant 80 : index
    %c0_35 = arith.constant 0 : index
    %120 = vector.load %arg17[%c80, %c0_35] : memref<128x512xf32, #tpu.memory_space<vmem>>, vector<16x512xf32>
    %121 = arith.truncf %119 : vector<16x128xf32> to vector<16x128xbf16>
    %c0_36 = arith.constant 0 : index
    %c0_37 = arith.constant 0 : index
    %122 = vector.load %arg4[%c0_36, %c0_37] : memref<128x512xbf16, #tpu.memory_space<vmem>>, vector<128x512xbf16>
    %cst_38 = arith.constant dense<0.000000e+00> : vector<16x512xf32>
    %123 = tpu.matmul %121, %122, %cst_38 {dimension_numbers = #tpu.dot_dimension_numbers<[1], [0], [0], [1], [0, 0, 1, 1], [], []>} : vector<16x128xbf16>, vector<128x512xbf16>, vector<16x512xf32> -> vector<16x512xf32>
    %124 = arith.addf %120, %123 : vector<16x512xf32>
    %125 = vector.extract_strided_slice %124 {offsets = [0, 0], sizes = [16, 384], strides = [1, 1]} : vector<16x512xf32> to vector<16x384xf32>
    %126 = arith.negf %125 : vector<16x384xf32>
    %127 = math.exp %126 : vector<16x384xf32>
    %cst_39 = arith.constant 1.000000e+00 : f32
    %128 = vector.broadcast %cst_39 : f32 to vector<16x384xf32>
    %129 = arith.addf %128, %127 : vector<16x384xf32>
    %130 = arith.divf %128, %129 : vector<16x384xf32>
    %131 = vector.extract_strided_slice %124 {offsets = [0, 384], sizes = [16, 128], strides = [1, 1]} : vector<16x512xf32> to vector<16x128xf32>
    %132 = math.tanh %131 : vector<16x128xf32>
    %133 = vector.extract_strided_slice %130 {offsets = [0, 128], sizes = [16, 128], strides = [1, 1]} : vector<16x384xf32> to vector<16x128xf32>
    %134 = arith.mulf %133, %116 : vector<16x128xf32>
    %135 = vector.extract_strided_slice %130 {offsets = [0, 0], sizes = [16, 128], strides = [1, 1]} : vector<16x384xf32> to vector<16x128xf32>
    %136 = arith.mulf %135, %132 : vector<16x128xf32>
    %137 = arith.addf %134, %136 : vector<16x128xf32>
    %138 = vector.extract_strided_slice %130 {offsets = [0, 256], sizes = [16, 128], strides = [1, 1]} : vector<16x384xf32> to vector<16x128xf32>
    %139 = math.tanh %137 : vector<16x128xf32>
    %140 = arith.mulf %138, %139 : vector<16x128xf32>
    %c96 = arith.constant 96 : index
    %c0_40 = arith.constant 0 : index
    %141 = vector.load %arg17[%c96, %c0_40] : memref<128x512xf32, #tpu.memory_space<vmem>>, vector<16x512xf32>
    %142 = arith.truncf %140 : vector<16x128xf32> to vector<16x128xbf16>
    %c0_41 = arith.constant 0 : index
    %c0_42 = arith.constant 0 : index
    %143 = vector.load %arg4[%c0_41, %c0_42] : memref<128x512xbf16, #tpu.memory_space<vmem>>, vector<128x512xbf16>
    %cst_43 = arith.constant dense<0.000000e+00> : vector<16x512xf32>
    %144 = tpu.matmul %142, %143, %cst_43 {dimension_numbers = #tpu.dot_dimension_numbers<[1], [0], [0], [1], [0, 0, 1, 1], [], []>} : vector<16x128xbf16>, vector<128x512xbf16>, vector<16x512xf32> -> vector<16x512xf32>
    %145 = arith.addf %141, %144 : vector<16x512xf32>
    %146 = vector.extract_strided_slice %145 {offsets = [0, 0], sizes = [16, 384], strides = [1, 1]} : vector<16x512xf32> to vector<16x384xf32>
    %147 = arith.negf %146 : vector<16x384xf32>
    %148 = math.exp %147 : vector<16x384xf32>
    %cst_44 = arith.constant 1.000000e+00 : f32
    %149 = vector.broadcast %cst_44 : f32 to vector<16x384xf32>
    %150 = arith.addf %149, %148 : vector<16x384xf32>
    %151 = arith.divf %149, %150 : vector<16x384xf32>
    %152 = vector.extract_strided_slice %145 {offsets = [0, 384], sizes = [16, 128], strides = [1, 1]} : vector<16x512xf32> to vector<16x128xf32>
    %153 = math.tanh %152 : vector<16x128xf32>
    %154 = vector.extract_strided_slice %151 {offsets = [0, 128], sizes = [16, 128], strides = [1, 1]} : vector<16x384xf32> to vector<16x128xf32>
    %155 = arith.mulf %154, %137 : vector<16x128xf32>
    %156 = vector.extract_strided_slice %151 {offsets = [0, 0], sizes = [16, 128], strides = [1, 1]} : vector<16x384xf32> to vector<16x128xf32>
    %157 = arith.mulf %156, %153 : vector<16x128xf32>
    %158 = arith.addf %155, %157 : vector<16x128xf32>
    %159 = vector.extract_strided_slice %151 {offsets = [0, 256], sizes = [16, 128], strides = [1, 1]} : vector<16x384xf32> to vector<16x128xf32>
    %160 = math.tanh %158 : vector<16x128xf32>
    %161 = arith.mulf %159, %160 : vector<16x128xf32>
    %c112 = arith.constant 112 : index
    %c0_45 = arith.constant 0 : index
    %162 = vector.load %arg17[%c112, %c0_45] : memref<128x512xf32, #tpu.memory_space<vmem>>, vector<16x512xf32>
    %163 = arith.truncf %161 : vector<16x128xf32> to vector<16x128xbf16>
    %c0_46 = arith.constant 0 : index
    %c0_47 = arith.constant 0 : index
    %164 = vector.load %arg4[%c0_46, %c0_47] : memref<128x512xbf16, #tpu.memory_space<vmem>>, vector<128x512xbf16>
    %cst_48 = arith.constant dense<0.000000e+00> : vector<16x512xf32>
    %165 = tpu.matmul %163, %164, %cst_48 {dimension_numbers = #tpu.dot_dimension_numbers<[1], [0], [0], [1], [0, 0, 1, 1], [], []>} : vector<16x128xbf16>, vector<128x512xbf16>, vector<16x512xf32> -> vector<16x512xf32>
    %166 = arith.addf %162, %165 : vector<16x512xf32>
    %167 = vector.extract_strided_slice %166 {offsets = [0, 0], sizes = [16, 384], strides = [1, 1]} : vector<16x512xf32> to vector<16x384xf32>
    %168 = arith.negf %167 : vector<16x384xf32>
    %169 = math.exp %168 : vector<16x384xf32>
    %cst_49 = arith.constant 1.000000e+00 : f32
    %170 = vector.broadcast %cst_49 : f32 to vector<16x384xf32>
    %171 = arith.addf %170, %169 : vector<16x384xf32>
    %172 = arith.divf %170, %171 : vector<16x384xf32>
    %173 = vector.extract_strided_slice %166 {offsets = [0, 384], sizes = [16, 128], strides = [1, 1]} : vector<16x512xf32> to vector<16x128xf32>
    %174 = math.tanh %173 : vector<16x128xf32>
    %175 = vector.extract_strided_slice %172 {offsets = [0, 128], sizes = [16, 128], strides = [1, 1]} : vector<16x384xf32> to vector<16x128xf32>
    %176 = arith.mulf %175, %158 : vector<16x128xf32>
    %177 = vector.extract_strided_slice %172 {offsets = [0, 0], sizes = [16, 128], strides = [1, 1]} : vector<16x384xf32> to vector<16x128xf32>
    %178 = arith.mulf %177, %174 : vector<16x128xf32>
    %179 = arith.addf %176, %178 : vector<16x128xf32>
    %180 = vector.extract_strided_slice %172 {offsets = [0, 256], sizes = [16, 128], strides = [1, 1]} : vector<16x384xf32> to vector<16x128xf32>
    %181 = math.tanh %179 : vector<16x128xf32>
    %182 = arith.mulf %180, %181 : vector<16x128xf32>
    %c0_50 = arith.constant 0 : index
    %c0_51 = arith.constant 0 : index
    %183 = vector.load %arg1[%c0_50, %c0_51] : memref<16x128xbf16, #tpu.memory_space<vmem>>, vector<16x128xbf16>
    %c0_52 = arith.constant 0 : index
    %c0_53 = arith.constant 0 : index
    %184 = vector.load %arg6[%c0_52, %c0_53] : memref<128x512xbf16, #tpu.memory_space<vmem>>, vector<128x512xbf16>
    %cst_54 = arith.constant dense<0.000000e+00> : vector<16x512xf32>
    %185 = tpu.matmul %183, %184, %cst_54 {dimension_numbers = #tpu.dot_dimension_numbers<[1], [0], [0], [1], [0, 0, 1, 1], [], []>} : vector<16x128xbf16>, vector<128x512xbf16>, vector<16x512xf32> -> vector<16x512xf32>
    %c0_55 = arith.constant 0 : index
    %c0_56 = arith.constant 0 : index
    %186 = vector.load %arg2[%c0_55, %c0_56] : memref<16x128xbf16, #tpu.memory_space<vmem>>, vector<16x128xbf16>
    %c0_57 = arith.constant 0 : index
    %c0_58 = arith.constant 0 : index
    %187 = vector.load %arg7[%c0_57, %c0_58] : memref<128x512xbf16, #tpu.memory_space<vmem>>, vector<128x512xbf16>
    %cst_59 = arith.constant dense<0.000000e+00> : vector<16x512xf32>
    %188 = tpu.matmul %186, %187, %cst_59 {dimension_numbers = #tpu.dot_dimension_numbers<[1], [0], [0], [1], [0, 0, 1, 1], [], []>} : vector<16x128xbf16>, vector<128x512xbf16>, vector<16x512xf32> -> vector<16x512xf32>
    %189 = arith.addf %185, %188 : vector<16x512xf32>
    %190 = arith.truncf %182 : vector<16x128xf32> to vector<16x128xbf16>
    %c0_60 = arith.constant 0 : index
    %c0_61 = arith.constant 0 : index
    %191 = vector.load %arg8[%c0_60, %c0_61] : memref<128x512xbf16, #tpu.memory_space<vmem>>, vector<128x512xbf16>
    %cst_62 = arith.constant dense<0.000000e+00> : vector<16x512xf32>
    %192 = tpu.matmul %190, %191, %cst_62 {dimension_numbers = #tpu.dot_dimension_numbers<[1], [0], [0], [1], [0, 0, 1, 1], [], []>} : vector<16x128xbf16>, vector<128x512xbf16>, vector<16x512xf32> -> vector<16x512xf32>
    %193 = arith.addf %189, %192 : vector<16x512xf32>
    %c0_63 = arith.constant 0 : index
    %c0_64 = arith.constant 0 : index
    %194 = vector.load %arg9[%c0_63, %c0_64] : memref<1x512xf32, #tpu.memory_space<vmem>>, vector<1x512xf32>
    %195 = vector.broadcast %194 : vector<1x512xf32> to vector<16x512xf32>
    %196 = arith.addf %193, %195 : vector<16x512xf32>
    %cst_65 = arith.constant 0.000000e+00 : f32
    %197 = vector.broadcast %cst_65 : f32 to vector<16x512xf32>
    %198 = arith.maximumf %196, %197 : vector<16x512xf32>
    %199 = arith.truncf %198 : vector<16x512xf32> to vector<16x512xbf16>
    %c0_66 = arith.constant 0 : index
    %c0_67 = arith.constant 0 : index
    %200 = vector.load %arg10[%c0_66, %c0_67] : memref<512x256xbf16, #tpu.memory_space<vmem>>, vector<512x256xbf16>
    %cst_68 = arith.constant dense<0.000000e+00> : vector<16x256xf32>
    %201 = tpu.matmul %199, %200, %cst_68 {dimension_numbers = #tpu.dot_dimension_numbers<[1], [0], [0], [1], [0, 0, 1, 1], [], []>} : vector<16x512xbf16>, vector<512x256xbf16>, vector<16x256xf32> -> vector<16x256xf32>
    %c0_69 = arith.constant 0 : index
    %c0_70 = arith.constant 0 : index
    %202 = vector.load %arg11[%c0_69, %c0_70] : memref<1x256xf32, #tpu.memory_space<vmem>>, vector<1x256xf32>
    %203 = vector.broadcast %202 : vector<1x256xf32> to vector<16x256xf32>
    %204 = arith.addf %201, %203 : vector<16x256xf32>
    %cst_71 = arith.constant 0.000000e+00 : f32
    %205 = vector.broadcast %cst_71 : f32 to vector<16x256xf32>
    %206 = arith.maximumf %204, %205 : vector<16x256xf32>
    %207 = arith.truncf %206 : vector<16x256xf32> to vector<16x256xbf16>
    %c0_72 = arith.constant 0 : index
    %c0_73 = arith.constant 0 : index
    %208 = vector.load %arg12[%c0_72, %c0_73] : memref<256x128xbf16, #tpu.memory_space<vmem>>, vector<256x128xbf16>
    %cst_74 = arith.constant dense<0.000000e+00> : vector<16x128xf32>
    %209 = tpu.matmul %207, %208, %cst_74 {dimension_numbers = #tpu.dot_dimension_numbers<[1], [0], [0], [1], [0, 0, 1, 1], [], []>} : vector<16x256xbf16>, vector<256x128xbf16>, vector<16x128xf32> -> vector<16x128xf32>
    %c0_75 = arith.constant 0 : index
    %c0_76 = arith.constant 0 : index
    %210 = vector.load %arg13[%c0_75, %c0_76] : memref<1x128xf32, #tpu.memory_space<vmem>>, vector<1x128xf32>
    %211 = vector.broadcast %210 : vector<1x128xf32> to vector<16x128xf32>
    %212 = arith.addf %209, %211 : vector<16x128xf32>
    %cst_77 = arith.constant 0.000000e+00 : f32
    %213 = vector.broadcast %cst_77 : f32 to vector<16x128xf32>
    %214 = arith.maximumf %212, %213 : vector<16x128xf32>
    %215 = arith.truncf %214 : vector<16x128xf32> to vector<16x128xbf16>
    %c0_78 = arith.constant 0 : index
    %c0_79 = arith.constant 0 : index
    %216 = vector.load %arg14[%c0_78, %c0_79] : memref<128x128xbf16, #tpu.memory_space<vmem>>, vector<128x128xbf16>
    %cst_80 = arith.constant dense<0.000000e+00> : vector<16x128xf32>
    %217 = tpu.matmul %215, %216, %cst_80 {dimension_numbers = #tpu.dot_dimension_numbers<[1], [0], [0], [1], [0, 0, 1, 1], [], []>} : vector<16x128xbf16>, vector<128x128xbf16>, vector<16x128xf32> -> vector<16x128xf32>
    %c0_81 = arith.constant 0 : index
    %c0_82 = arith.constant 0 : index
    %218 = vector.load %arg15[%c0_81, %c0_82] : memref<1x128xf32, #tpu.memory_space<vmem>>, vector<1x128xf32>
    %219 = vector.broadcast %218 : vector<1x128xf32> to vector<16x128xf32>
    %220 = arith.addf %217, %219 : vector<16x128xf32>
    %c0_83 = arith.constant 0 : index
    %c0_84 = arith.constant 0 : index
    %221 = vector.load %arg16[%c0_83, %c0_84] : memref<16x128xf32, #tpu.memory_space<vmem>>, vector<16x128xf32>
    tpu.vector_store %arg16[%c0_83, %c0_84], %220 {strides = array<i32>} : memref<16x128xf32, #tpu.memory_space<vmem>>, vector<16x128xf32>,
    return
  }
}

</mosaic_0001>

<bundles_post_ra>
// kernel: text_model_forward.1
= control target key start
LH: loop header
LB: loop body
LE: loop exit
PB: predicated region body
PF: predicated region fallthrough
CT: control target
= control target key end

     0   :  { %s5890_s0 = inlined_call_operand.vmem [shape: s32[128,1], index: 0, kind: input, shape index: {}]   ;;  %s5891_s1 = inlined_call_operand.vmem [shape: bf16[16,128], index: 1, kind: input, shape index: {}]   ;;  %s5892_s2 = inlined_call_operand.vmem [shape: bf16[16,128], index: 2, kind: input, shape index: {}]   ;;  %s5893_s3 = inlined_call_operand.vmem [shape: bf16[16,512], index: 3, kind: input, shape index: {}]   ;;  %s5894_s4 = inlined_call_operand.hbm [shape: bf16[128,512], index: 4, kind: input, shape index: {}]   ;;  %s5895_s5 = inlined_call_operand.vmem [shape: f32[1,512], index: 5, kind: input, shape index: {}]   ;;  %s5896_s6 = inlined_call_operand.hbm [shape: bf16[128,512], index: 6, kind: input, shape index: {}]   ;;  %s5897_s7 = inlined_call_operand.hbm [shape: bf16[128,512], index: 7, kind: input, shape index: {}]   ;;  %s5898_s8 = inlined_call_operand.hbm [shape: bf16[128,512], index: 8, kind: input, shape index: {}]   ;;  %s5899_s9 = inlined_call_operand.vmem [shape: f32[1,512], index: 9, kind: input, shape index: {}]   ;;  %s5900_s10 = inlined_call_operand.hbm [shape: bf16[512,256], index: 10, kind: input, shape index: {}]   ;;  %s5901_s11 = inlined_call_operand.vmem [shape: f32[1,256], index: 11, kind: input, shape index: {}]   ;;  %s5902_s12 = inlined_call_operand.vmem [shape: bf16[256,128], index: 12, kind: input, shape index: {}]   ;;  %s5903_s13 = inlined_call_operand.vmem [shape: f32[1,128], index: 13, kind: input, shape index: {}]   ;;  %s5904_s14 = inlined_call_operand.vmem [shape: bf16[128,128], index: 14, kind: input, shape index: {}]   ;;  %s5905_s15 = inlined_call_operand.vmem [shape: f32[1,128], index: 15, kind: input, shape index: {}]   ;;  %s5906_s16 = inlined_call_operand.vmem [shape: f32[16,128], index: 16, kind: output, shape index: {}]  }
   0x1   :  { %5920 = sst [smem:[#allocation66_spill]] %s5890_s0 }
   0x2   :  { %21 = vsyncpa [#allocation4], 0 }
   0x3   :  { %22 = vsyncpa [#allocation6], 0 }
   0x4   :  { %23 = vsyncpa [#allocation9], 0  ;;  %s4776_s21 = smov [#allocation5]   ;;  %s4777_s23 = smov [#allocation8]  }
   0x5   :  { %s51_s22 = sshll.u32 %s4776_s21, 4  ;;  %s75_s24 = sshll.u32 %s4777_s23, 4  ;;  %s52_s22 = int_to_ptr.vmem [resolvable:$true] %s51_s22  ;;  %s76_s24 = int_to_ptr.vmem [resolvable:$true] %s75_s24 }
   0x6   :  { %s4678_s25 = scalar_lea.vmem %s52_s22, 4096  ;;  %p4683_p1 = scmp.lt.s32.totalorder %s52_s22, %s52_s22 }
   0x7   :  { %p4679_p0 = scmp.ne.s32.totalorder %s52_s22, %s4678_s25  ;;  %p4684_p2 = scmp.lt.s32.totalorder %s4678_s25, %s4678_s25 }
   0x9   :  { %p4685_p3 = por %p4684_p2, %p4683_p1 }
   0xb   :  { %p4686_p4 = pnand %p4685_p3, %p4679_p0 }
   0xd   :  { %4689 = shalt.err (!%p4686_p4)
}
   0xe   :  { %s4778_s26 = smov 256   ;;  %s4779_s27 = smov 16  }
   0xf   :  { %57 = dma.hbm_to_vmem [thread:$0]  %s5896_s6, 4096, %s52_s22, [#allocation6], %s4778_s26, %s4778_s26, %s4779_s27  }
  0x10   :  { %s4698_s30 = scalar_lea.vmem %s76_s24, 4096  ;;  %p4703_p6 = scmp.lt.s32.totalorder %s76_s24, %s76_s24 }
  0x11   :  { %p4699_p5 = scmp.ne.s32.totalorder %s76_s24, %s4698_s30  ;;  %p4704_p7 = scmp.lt.s32.totalorder %s4698_s30, %s4698_s30 }
  0x13   :  { %p4705_p8 = por %p4704_p7, %p4703_p6 }
  0x15   :  { %p4706_p9 = pnand %p4705_p8, %p4699_p5 }
  0x17   :  { %4709 = shalt.err (!%p4706_p9)
}
  0x18   :  { %81 = dma.hbm_to_vmem [thread:$0]  %s5898_s8, 4096, %s76_s24, [#allocation9], %s4778_s26, %s4778_s26, %s4779_s27  }
  0x19   :  { %s4780_s18 = smov [#allocation3]   ;;  %s4781_s20 = smov [#allocation7]  }
  0x1a   :  { %s37_s19 = sshll.u32 %s4780_s18, 4  ;;  %s63_s21 = sshll.u32 %s4781_s20, 4  ;;  %s38_s19 = int_to_ptr.vmem [resolvable:$true] %s37_s19  ;;  %s64_s21 = int_to_ptr.vmem [resolvable:$true] %s63_s21 }
  0x1b   :  { %s4718_s6 = scalar_lea.vmem %s38_s19, 4096  ;;  %p4723_p11 = scmp.lt.s32.totalorder %s38_s19, %s38_s19 }
  0x1c   :  { %p4719_p10 = scmp.ne.s32.totalorder %s38_s19, %s4718_s6  ;;  %p4724_p12 = scmp.lt.s32.totalorder %s4718_s6, %s4718_s6 }
  0x1e   :  { %p4725_p13 = por %p4724_p12, %p4723_p11 }
  0x20   :  { %p4726_p0 = pnand %p4725_p13, %p4719_p10 }
  0x22   :  { %4729 = shalt.err (!%p4726_p0)
}
  0x23   :  { %43 = dma.hbm_to_vmem [thread:$0]  %s5894_s4, 4096, %s38_s19, [#allocation4], %s4778_s26, %s4778_s26, %s4779_s27  }
  0x24   :  { %s4738_s8 = scalar_lea.vmem %s64_s21, 4096  ;;  %p4743_p2 = scmp.lt.s32.totalorder %s64_s21, %s64_s21 }
  0x25   :  { %p4739_p1 = scmp.ne.s32.totalorder %s64_s21, %s4738_s8  ;;  %p4744_p3 = scmp.lt.s32.totalorder %s4738_s8, %s4738_s8 }
  0x27   :  { %p4745_p4 = por %p4744_p3, %p4743_p2 }
  0x29   :  { %p4746_p5 = pnand %p4745_p4, %p4739_p1 }
  0x2b   :  { %4749 = shalt.err (!%p4746_p5)
}
  0x2c   :  { %69 = dma.hbm_to_vmem [thread:$0]  %s5897_s7, 4096, %s64_s21, [#allocation6], %s4778_s26, %s4778_s26, %s4779_s27  }
  0x2d   :  { %s4782_s28 = smov [#allocation10]  }
  0x2e   :  { %s89_s29 = sshll.u32 %s4782_s28, 4  ;;  %s90_s29 = int_to_ptr.vmem [resolvable:$true] %s89_s29 }
  0x2f   :  { %s4758_s30 = scalar_lea.vmem %s90_s29, 8192  ;;  %p4763_p7 = scmp.lt.s32.totalorder %s90_s29, %s90_s29 }
  0x30   :  { %p4759_p6 = scmp.ne.s32.totalorder %s90_s29, %s4758_s30  ;;  %p4764_p8 = scmp.lt.s32.totalorder %s4758_s30, %s4758_s30 }
  0x32   :  { %p4765_p9 = por %p4764_p8, %p4763_p7 }
  0x34   :  { %p4766_p10 = pnand %p4765_p9, %p4759_p6 }
  0x36   :  { %4769 = shalt.err (!%p4766_p10)
}
  0x37   :  { %s4783_s4 = smov 128   ;;  %s4784_s0 = smov 8  }
  0x38   :  { %95 = dma.hbm_to_vmem [thread:$0]  %s5900_s10, 8192, %s90_s29, [#allocation9], %s4783_s4, %s4783_s4, %s4784_s0  }
  0x39   :  { %4770 = dma.done.wait [#allocation4], 4096  }
  0x3a   :  { %4771 = vsyncadd [#allocation4], 4294963200 }
  0x3b   :  { %4772 = dma.done.wait [#allocation6], 8192  }
  0x3c   :  { %4773 = vsyncadd [#allocation6], 4294959104 }
  0x3d   :  { %4774 = dma.done.wait [#allocation9], 12288  }
  0x3e   :  { %4775 = vsyncadd [#allocation9], 4294955008  ;;  %v5912_v0 = vmov 0   ;;  %s5921_s27 = sld [smem:[#allocation66_spill]]  ;;  %v4062_v7 = vld [vmem:[%s5893_s3 + $0x4] ss:$16 sps:$4 sm:$0xff]   ;;  %v138_v23 = vlaneseq }
  0x3f   :  { %4061 = vset.pattern.permute.xlu1 %v5912_v0  ;;  %4060 = vset.pattern.permute.xlu0 %v5912_v0  ;;  %v4064_v8 = vld [vmem:[%s5893_s3] ss:$16 sps:$4 sm:$0xff]   ;;  %v4065_v9 = vld [vmem:[%s5893_s3 + $0xc] ss:$16 sps:$4 sm:$0xff]   ;;  %v4067_v10 = vld [vmem:[%s5893_s3 + $0x8] ss:$16 sps:$4 sm:$0xff]  }
  0x40   :  { %347 = vmatprep.mubr.bf16.mxu0 %v5912_v0  ;;  %460 = vmatprep.mubr.bf16.mxu1 %v5912_v0  ;;  %v4937_v12 = vld [vmem:[#allocation3 + $0xe4] ss:$16 sps:$4 sm:$0xff]   ;;  %v4961_v20 = vld [vmem:[#allocation3 + $0xec] ss:$16 sps:$4 sm:$0xff]   ;;  %v4971_v24 = vand.u32 127, %v138_v23  ;;  %v5910_v28 = vmov 0.0  }
  0x41   :  { %329 = vmatprep.subr.bf16.mxu0 %v4062_v7  ;;  %442 = vmatprep.subr.bf16.mxu1 %v4065_v9  ;;  %vm290_vm2 = vcmask 130048   ;;  %v4977_v31 = vld [vmem:[#allocation3 + $0xe0] ss:$16 sps:$4 sm:$0xff]   ;;  %v4979_v33 = vld [vmem:[#allocation3 + $0xc4] ss:$16 sps:$4 sm:$0xff]  }
  0x42   :  { %330 = vmatpush1.bf16.msra.mxu0 %v4064_v8  ;;  %443 = vmatpush1.bf16.msra.mxu1 %v4067_v10  ;;  %v4981_v35 = vld [vmem:[#allocation3 + $0xe8] ss:$16 sps:$4 sm:$0xff]   ;;  %v4987_v36 = vld [vmem:[#allocation3 + $0xcc] ss:$16 sps:$4 sm:$0xff]   ;;  %v4991_v37 = vld [vmem:[#allocation3 + $0xc0] ss:$16 sps:$4 sm:$0xff]  }
  0x43   :  { %805 = vmatprep.subr.bf16.mxu0 %v4937_v12  ;;  %848 = vmatprep.subr.bf16.mxu1 %v4961_v20  ;;  %v4995_v38 = vld [vmem:[#allocation3 + $0xa4] ss:$16 sps:$4 sm:$0xff]   ;;  %v5000_v41 = vld [vmem:[#allocation3 + $0xc8] ss:$16 sps:$4 sm:$0xff]   ;;  %v5005_v45 = vld [vmem:[#allocation3 + $0xa0] ss:$16 sps:$4 sm:$0xff]  }
  0x44   :  { %v124_v1 = vld [vmem:[%s5921_s27 + $0x10] sm:$0xff]  ;;  %v122_v2 = vld [vmem:[%s5921_s27] sm:$0xff]  ;;  %v125_v3 = vld [vmem:[%s5921_s27 + $0x18] sm:$0xff] }
  0x45   :  { %147 = vperm.xlu1 %4061, %v124_v1   ;;  %141 = vperm.xlu0 %4060, %v122_v2   ;;  %v123_v4 = vld [vmem:[%s5921_s27 + $0x8] sm:$0xff]  ;;  %v126_v6 = vld [vmem:[%s5921_s27 + $0x20] sm:$0xff]  ;;  %v129_v11 = vld [vmem:[%s5921_s27 + $0x38] sm:$0xff] }
  0x46   :  { %v127_v5 = vld [vmem:[%s5921_s27 + $0x28] sm:$0xff]  ;;  %v128_v13 = vld [vmem:[%s5921_s27 + $0x30] sm:$0xff]  ;;  %v130_v15 = vld [vmem:[%s5921_s27 + $0x40] sm:$0xff] }
  0x47   :  { %v131_v14 = vld [vmem:[%s5921_s27 + $0x48] sm:$0xff]  ;;  %v133_v16 = vld [vmem:[%s5921_s27 + $0x58] sm:$0xff]  ;;  %v132_v17 = vld [vmem:[%s5921_s27 + $0x50] sm:$0xff] }
  0x48   :  { %v135_v18 = vld [vmem:[%s5921_s27 + $0x68] sm:$0xff]  ;;  %v134_v19 = vld [vmem:[%s5921_s27 + $0x60] sm:$0xff]  ;;  %v137_v21 = vld [vmem:[%s5921_s27 + $0x78] sm:$0xff] }
  0x49   :  { %150 = vperm.xlu1 %4061, %v125_v3   ;;  %144 = vperm.xlu0 %4060, %v123_v4   ;;  %v136_v22 = vld [vmem:[%s5921_s27 + $0x70] sm:$0xff]  ;;  %v5007_v46 = vld [vmem:[#allocation3 + $0xac] ss:$16 sps:$4 sm:$0xff]   ;;  %v5012_v48 = vld [vmem:[#allocation3 + $0xa8] ss:$16 sps:$4 sm:$0xff]  }
  0x4a   :  { %v5009_v47 = vld [vmem:[#allocation3 + $0x84] ss:$16 sps:$4 sm:$0xff]   ;;  %v5018_v49 = vld [vmem:[#allocation3 + $0x8c] ss:$16 sps:$4 sm:$0xff]   ;;  %v5023_v50 = vld [vmem:[#allocation3 + $0x80] ss:$16 sps:$4 sm:$0xff]  }
  0x4b   :  { %v5029_v53 = vld [vmem:[#allocation3 + $0x64] ss:$16 sps:$4 sm:$0xff]   ;;  %v5032_v54 = vld [vmem:[#allocation3 + $0x88] ss:$16 sps:$4 sm:$0xff]   ;;  %v5036_v58 = vld [vmem:[#allocation3 + $0x60] ss:$16 sps:$4 sm:$0xff]  }
  0x4c   :  { %v5038_v59 = vld [vmem:[#allocation3 + $0x6c] ss:$16 sps:$4 sm:$0xff]   ;;  %v5041_v60 = vld [vmem:[#allocation3 + $0x44] ss:$16 sps:$4 sm:$0xff]   ;;  %v5044_v61 = vld [vmem:[#allocation3 + $0x68] ss:$16 sps:$4 sm:$0xff]  }
  0x4d   :  { %156 = vperm.xlu1 %4061, %v127_v5   ;;  %153 = vperm.xlu0 %4060, %v126_v6   ;;  %v5050_v62 = vld [vmem:[#allocation3 + $0x4c] ss:$16 sps:$4 sm:$0xff]   ;;  %v5055_v63 = vld [vmem:[#allocation3 + $0x40] ss:$16 sps:$4 sm:$0xff]   ;;  %v5061_v3 = vld [vmem:[#allocation3 + $0x24] ss:$16 sps:$4 sm:$0xff]  }
  0x4e   :  { %v5064_v4 = vld [vmem:[#allocation3 + $0x48] ss:$16 sps:$4 sm:$0xff]   ;;  %v5068_v8 = vld [vmem:[#allocation3 + $0x20] ss:$16 sps:$4 sm:$0xff]   ;;  %v5070_v9 = vld [vmem:[#allocation3 + $0x2c] ss:$16 sps:$4 sm:$0xff]  }
  0x4f   :  { %v5074_v10 = vld [vmem:[#allocation3 + $0x4] ss:$16 sps:$4 sm:$0xff]  }
  0x51   :  { %162 = vperm.xlu1 %4061, %v129_v11   ;;  %159 = vperm.xlu0 %4060, %v128_v13   ;;  %v5076_v11 = vld [vmem:[#allocation3 + $0x28] ss:$16 sps:$4 sm:$0xff]   ;;  %v5082_v13 = vld [vmem:[#allocation3 + $0xc] ss:$16 sps:$4 sm:$0xff]  }
  0x55   :  { %168 = vperm.xlu1 %4061, %v131_v14   ;;  %165 = vperm.xlu0 %4060, %v130_v15   ;;  %v5087_v14 = vld [vmem:[#allocation3] ss:$16 sps:$4 sm:$0xff]  }
  0x59   :  { %174 = vperm.xlu1 %4061, %v133_v16   ;;  %171 = vperm.xlu0 %4060, %v132_v17   ;;  %v5094_v17 = vld [vmem:[#allocation3 + $0x8] ss:$16 sps:$4 sm:$0xff]  }
  0x5d   :  { %180 = vperm.xlu1 %4061, %v135_v18   ;;  %177 = vperm.xlu0 %4060, %v134_v19  }
  0x61   :  { %186 = vperm.xlu1 %4061, %v137_v21   ;;  %183 = vperm.xlu0 %4060, %v136_v22  }
  0xc0   :  { %v142_v25 = vpop.permute.xlu0 %141  ;;  %v148_v26 = vpop.permute.xlu1 %147 }
  0xc1   :  { %vm188_vm0 = vcmp.eq.s32.totalorder %v4971_v24, %v142_v25  ;;  %vm190_vm3 = vcmp.eq.s32.totalorder %v4971_v24, %v148_v26 }
  0xc2   :  { %v3693_v29 = vsel %vm188_vm0, 1.0, %v5910_v28  ;;  %v3695_v39 = vsel %vm190_vm3, 1.0, %v5910_v28 }
  0xc4   :  { %v145_v27 = vpop.permute.xlu0 %144  ;;  %v151_v34 = vpop.permute.xlu1 %150 }
  0xc5   :  { %vm189_vm1 = vcmp.eq.s32.totalorder %v4971_v24, %v145_v27  ;;  %vm191_vm4 = vcmp.eq.s32.totalorder %v4971_v24, %v151_v34 }
  0xc6   :  { %v3694_v30 = vsel %vm189_vm1, 1.0, %v5910_v28  ;;  %v3696_v40 = vsel %vm191_vm4, 1.0, %v5910_v28  ;;  %vm4787_vm1 = vmmov 0  }
  0xc7   :  { %v236_v32 = vpack.c.bf16 %v3694_v30, %v3693_v29  ;;  %v237_v44 = vpack.c.bf16 %v3696_v40, %v3695_v39 }
  0xc8   :  { %v157_v42 = vpop.permute.xlu1 %156  ;;  %v154_v43 = vpop.permute.xlu0 %153 }
  0xc9   :  { %3713 = vmatmul.mubr.msk.bf16.vlgmr.msra.gmra.mxu0 %vm290_vm2, %v236_v32  ;;  %3721 = vmatmul.mubr.msk.bf16.vlgmr.msra.gmra.mxu1 %vm290_vm2, %v236_v32  ;;  %vm193_vm5 = vcmp.eq.s32.totalorder %v4971_v24, %v157_v42  ;;  %vm192_vm6 = vcmp.eq.s32.totalorder %v4971_v24, %v154_v43 }
  0xca   :  { %806 = vmatpush1.bf16.msra.mxu0 %v4977_v31  ;;  %357 = vmatprep.mubr.bf16.mxu0 %v5912_v0  ;;  %v3698_v51 = vsel %vm193_vm5, 1.0, %v5910_v28  ;;  %v3697_v52 = vsel %vm192_vm6, 1.0, %v5910_v28 }
  0xcb   :  { %470 = vmatprep.mubr.bf16.mxu1 %v5912_v0  ;;  %807 = vmatprep.subr.bf16.mxu0 %v4979_v33  ;;  %v238_v57 = vpack.c.bf16 %v3698_v51, %v3697_v52 }
  0xcc   :  { %849 = vmatpush1.bf16.msra.mxu1 %v4981_v35  ;;  %v163_v55 = vpop.permute.xlu1 %162  ;;  %v160_v56 = vpop.permute.xlu0 %159 }
  0xcd   :  { %850 = vmatprep.subr.bf16.mxu1 %v4987_v36  ;;  %vm195_vm7 = vcmp.eq.s32.totalorder %v4971_v24, %v163_v55  ;;  %vm194_vm8 = vcmp.eq.s32.totalorder %v4971_v24, %v160_v56 }
  0xce   :  { %808 = vmatpush1.bf16.msra.mxu0 %v4991_v37  ;;  %v3700_v1 = vsel %vm195_vm7, 1.0, %v5910_v28  ;;  %v3699_v2 = vsel %vm194_vm8, 1.0, %v5910_v28 }
  0xcf   :  { %809 = vmatprep.subr.bf16.mxu0 %v4995_v38  ;;  %v239_v7 = vpack.c.bf16 %v3700_v1, %v3699_v2 }
  0xd0   :  { %851 = vmatpush1.bf16.msra.mxu1 %v5000_v41  ;;  %v169_v5 = vpop.permute.xlu1 %168  ;;  %v166_v6 = vpop.permute.xlu0 %165 }
  0xd1   :  { %3714 = vmatmul.mubr.msk.bf16.gmra.mxu0 %vm290_vm2, %v237_v44  ;;  %3722 = vmatmul.mubr.msk.bf16.gmra.mxu1 %vm290_vm2, %v237_v44  ;;  %vm197_vm9 = vcmp.eq.s32.totalorder %v4971_v24, %v169_v5  ;;  %vm196_vm10 = vcmp.eq.s32.totalorder %v4971_v24, %v166_v6 }
  0xd2   :  { %367 = vmatprep.mubr.bf16.mxu0 %v5912_v0  ;;  %480 = vmatprep.mubr.bf16.mxu1 %v5912_v0  ;;  %v3702_v15 = vsel %vm197_vm9, 1.0, %v5910_v28  ;;  %v3701_v16 = vsel %vm196_vm10, 1.0, %v5910_v28 }
  0xd3   :  { %810 = vmatpush1.bf16.msra.mxu0 %v5005_v45  ;;  %852 = vmatprep.subr.bf16.mxu1 %v5007_v46  ;;  %v240_v21 = vpack.c.bf16 %v3702_v15, %v3701_v16 }
  0xd4   :  { %811 = vmatprep.subr.bf16.mxu0 %v5009_v47  ;;  %853 = vmatpush1.bf16.msra.mxu1 %v5012_v48  ;;  %v175_v18 = vpop.permute.xlu1 %174  ;;  %v172_v19 = vpop.permute.xlu0 %171 }
  0xd5   :  { %854 = vmatprep.subr.bf16.mxu1 %v5018_v49  ;;  %vm199_vm11 = vcmp.eq.s32.totalorder %v4971_v24, %v175_v18  ;;  %vm198_vm12 = vcmp.eq.s32.totalorder %v4971_v24, %v172_v19 }
  0xd6   :  { %v3704_v22 = vsel %vm199_vm11, 1.0, %v5910_v28  ;;  %v3703_v25 = vsel %vm198_vm12, 1.0, %v5910_v28 }
  0xd7   :  { %812 = vmatpush1.bf16.msra.mxu0 %v5023_v50  ;;  %v241_v29 = vpack.c.bf16 %v3704_v22, %v3703_v25 }
  0xd8   :  { %813 = vmatprep.subr.bf16.mxu0 %v5029_v53  ;;  %855 = vmatpush1.bf16.msra.mxu1 %v5032_v54  ;;  %v181_v26 = vpop.permute.xlu1 %180  ;;  %v178_v27 = vpop.permute.xlu0 %177 }
  0xd9   :  { %3715 = vmatmul.mubr.msk.bf16.gmra.mxu0 %vm290_vm2, %v238_v57  ;;  %3723 = vmatmul.mubr.msk.bf16.gmra.mxu1 %vm290_vm2, %v238_v57  ;;  %vm201_vm13 = vcmp.eq.s32.totalorder %v4971_v24, %v181_v26  ;;  %vm200_vm14 = vcmp.eq.s32.totalorder %v4971_v24, %v178_v27 }
  0xda   :  { %377 = vmatprep.mubr.bf16.mxu0 %v5912_v0  ;;  %490 = vmatprep.mubr.bf16.mxu1 %v5912_v0  ;;  %v3706_v30 = vsel %vm201_vm13, 1.0, %v5910_v28  ;;  %v3705_v32 = vsel %vm200_vm14, 1.0, %v5910_v28 }
  0xdb   :  { %814 = vmatpush1.bf16.msra.mxu0 %v5036_v58  ;;  %856 = vmatprep.subr.bf16.mxu1 %v5038_v59  ;;  %v242_v40 = vpack.c.bf16 %v3706_v30, %v3705_v32 }
  0xdc   :  { %815 = vmatprep.subr.bf16.mxu0 %v5041_v60  ;;  %857 = vmatpush1.bf16.msra.mxu1 %v5044_v61  ;;  %v187_v34 = vpop.permute.xlu1 %186  ;;  %v184_v39 = vpop.permute.xlu0 %183 }
  0xdd   :  { %858 = vmatprep.subr.bf16.mxu1 %v5050_v62  ;;  %vm203_vm15 = vcmp.eq.s32.totalorder %v4971_v24, %v187_v34  ;;  %vm202_vm0 = vcmp.eq.s32.totalorder %v4971_v24, %v184_v39  ;;  %v5166_v24 = vshrl.u32 %v138_v23, 7 }
  0xde   :  { %v3708_v42 = vsel %vm203_vm15, 1.0, %v5910_v28  ;;  %v3707_v43 = vsel %vm202_vm0, 1.0, %v5910_v28 }
  0xdf   :  { %816 = vmatpush1.bf16.msra.mxu0 %v5055_v63  ;;  %v243_v44 = vpack.c.bf16 %v3708_v42, %v3707_v43  ;;  %5922 = vst [vmem:[#allocation14_spill] sm:$0xff] %v5166_v24  ;;  %v5177_v57 = vsub.s32 0, %v5166_v24  ;;  %v5908_v1 = vsub.s32 2, %v5166_v24  ;;  %v5188_v2 = vsub.s32 1, %v5166_v24 }
  0xe0   :  { %817 = vmatprep.subr.bf16.mxu0 %v5061_v3  ;;  %859 = vmatpush1.bf16.msra.mxu1 %v5064_v4  ;;  %v5909_v5 = vsub.s32 3, %v5166_v24 }
  0xe1   :  { %3716 = vmatmul.mubr.msk.bf16.gmra.mxu0 %vm290_vm2, %v239_v7  ;;  %3724 = vmatmul.mubr.msk.bf16.gmra.mxu1 %vm290_vm2, %v239_v7  ;;  %5923 = vst [vmem:[#allocation15_spill] sm:$0xff] %v5177_v57  ;;  %5924 = vst [vmem:[#allocation16_spill] sm:$0xff] %v5188_v2 }
  0xe2   :  { %387 = vmatprep.mubr.bf16.mxu0 %v5912_v0  ;;  %500 = vmatprep.mubr.bf16.mxu1 %v5912_v0 }
  0xe3   :  { %818 = vmatpush1.bf16.msra.mxu0 %v5068_v8  ;;  %860 = vmatprep.subr.bf16.mxu1 %v5070_v9 }
  0xe4   :  { %819 = vmatprep.subr.bf16.mxu0 %v5074_v10  ;;  %861 = vmatpush1.bf16.msra.mxu1 %v5076_v11 }
  0xe5   :  { %862 = vmatprep.subr.bf16.mxu1 %v5082_v13 }
  0xe7   :  { %820 = vmatpush1.bf16.msra.mxu0 %v5087_v14 }
  0xe8   :  { %863 = vmatpush1.bf16.msra.mxu1 %v5094_v17  ;;  %956 = vmatprep.subr.bf16.mxu0 %v4937_v12 }
  0xe9   :  { %3717 = vmatmul.mubr.msk.bf16.gmra.mxu0 %vm290_vm2, %v240_v21  ;;  %3725 = vmatmul.mubr.msk.bf16.gmra.mxu1 %vm290_vm2, %v240_v21 }
  0xea   :  { %397 = vmatprep.mubr.bf16.mxu0 %v5912_v0  ;;  %510 = vmatprep.mubr.bf16.mxu1 %v5912_v0 }
  0xeb   :  { %999 = vmatprep.subr.bf16.mxu1 %v4961_v20 }
  0xf1   :  { %3718 = vmatmul.mubr.msk.bf16.gmra.mxu0 %vm290_vm2, %v241_v29  ;;  %3726 = vmatmul.mubr.msk.bf16.gmra.mxu1 %vm290_vm2, %v241_v29 }
  0xf2   :  { %407 = vmatprep.mubr.bf16.mxu0 %v5912_v0  ;;  %520 = vmatprep.mubr.bf16.mxu1 %v5912_v0 }
  0xf9   :  { %3719 = vmatmul.mubr.msk.bf16.gmra.mxu0 %vm290_vm2, %v242_v40  ;;  %3727 = vmatmul.mubr.msk.bf16.gmra.mxu1 %vm290_vm2, %v242_v40 }
  0xfa   :  { %417 = vmatprep.mubr.bf16.mxu0 %v5912_v0  ;;  %530 = vmatprep.mubr.bf16.mxu1 %v5912_v0 }
 0x101   :  { %3720 = vmatmul.mubr.msk.bf16.gmra.mxu0 %vm290_vm2, %v243_v44  ;;  %3728 = vmatmul.mubr.msk.bf16.gmra.mxu1 %vm290_vm2, %v243_v44 }
 0x102   :  { %837 = vmatprep.mubr.bf16.mxu0 %v5912_v0  ;;  %880 = vmatprep.mubr.bf16.mxu1 %v5912_v0 }
 0x109   :  { %838 = vmatmul.mubr.bf16.vlgmr.msra.gmra.mxu0 %v5912_v0  ;;  %881 = vmatmul.mubr.bf16.vlgmr.msra.gmra.mxu1 %v5912_v0 }
 0x10a   :  { %957 = vmatpush1.bf16.msra.mxu0 %v4977_v31  ;;  %1000 = vmatpush1.bf16.msra.mxu1 %v4981_v35 }
 0x10b   :  { %958 = vmatprep.subr.bf16.mxu0 %v4979_v33  ;;  %1001 = vmatprep.subr.bf16.mxu1 %v4987_v36 }
 0x10c   :  { %988 = vmatprep.mubr.bf16.mxu0 %v5912_v0  ;;  %1031 = vmatprep.mubr.bf16.mxu1 %v5912_v0 }
 0x10e   :  { %959 = vmatpush1.bf16.msra.mxu0 %v4991_v37  ;;  %1002 = vmatpush1.bf16.msra.mxu1 %v5000_v41 }
 0x10f   :  { %960 = vmatprep.subr.bf16.mxu0 %v4995_v38  ;;  %1003 = vmatprep.subr.bf16.mxu1 %v5007_v46 }
 0x112   :  { %961 = vmatpush1.bf16.msra.mxu0 %v5005_v45  ;;  %1004 = vmatpush1.bf16.msra.mxu1 %v5012_v48 }
 0x113   :  { %962 = vmatprep.subr.bf16.mxu0 %v5009_v47  ;;  %1005 = vmatprep.subr.bf16.mxu1 %v5018_v49 }
 0x116   :  { %963 = vmatpush1.bf16.msra.mxu0 %v5023_v50  ;;  %1006 = vmatpush1.bf16.msra.mxu1 %v5032_v54 }
 0x117   :  { %964 = vmatprep.subr.bf16.mxu0 %v5029_v53  ;;  %1007 = vmatprep.subr.bf16.mxu1 %v5038_v59 }
 0x11a   :  { %965 = vmatpush1.bf16.msra.mxu0 %v5036_v58  ;;  %1008 = vmatpush1.bf16.msra.mxu1 %v5044_v61 }
 0x11b   :  { %966 = vmatprep.subr.bf16.mxu0 %v5041_v60  ;;  %1009 = vmatprep.subr.bf16.mxu1 %v5050_v62 }
 0x11e   :  { %967 = vmatpush1.bf16.msra.mxu0 %v5055_v63  ;;  %1010 = vmatpush1.bf16.msra.mxu1 %v5064_v4 }
 0x11f   :  { %968 = vmatprep.subr.bf16.mxu0 %v5061_v3  ;;  %1011 = vmatprep.subr.bf16.mxu1 %v5070_v9 }
 0x122   :  { %969 = vmatpush1.bf16.msra.mxu0 %v5068_v8  ;;  %1012 = vmatpush1.bf16.msra.mxu1 %v5076_v11 }
 0x123   :  { %970 = vmatprep.subr.bf16.mxu0 %v5074_v10  ;;  %1013 = vmatprep.subr.bf16.mxu1 %v5082_v13 }
 0x126   :  { %971 = vmatpush1.bf16.msra.mxu0 %v5087_v14  ;;  %1014 = vmatpush1.bf16.msra.mxu1 %v5094_v17 }
 0x127   :  { %1107 = vmatprep.subr.bf16.mxu0 %v4937_v12  ;;  %1150 = vmatprep.subr.bf16.mxu1 %v4961_v20  ;;  %v248_v12 = vld [vmem:[%s5895_s5] sm:$0xf] }
 0x128   :  { %v5196_v15 = vrot.slane %v248_v12, %v5177_v57  ;;  %v5200_v16 = vrot.slane %v248_v12, %v5908_v1  ;;  %v5203_v21 = vrot.slane %v248_v12, %v5188_v2  ;;  %v5207_v22 = vrot.slane %v248_v12, %v5909_v5 }
 0x189   :  { %v5168_v51 = vpop.f32.mrf.mxu0  ;;  %v5170_v52 = vpop.f32.mrf.mxu1 }
 0x18b   :  { %v5172_v55 = vpop.f32.mrf.mxu0  ;;  %v5174_v56 = vpop.f32.mrf.mxu1 }
 0x18d   :  { %v5183_v20 = vpop.f32.mrf.mxu0  ;;  %v5185_v23 = vpop.f32.mrf.mxu1 }
 0x18f   :  { %v5191_v6 = vpop.f32.mrf.mxu0  ;;  %v5193_v7 = vpop.f32.mrf.mxu1 }
 0x191   :  { %v359_v18 = vpop.f32.mrf.mxu0  ;;  %v472_v19 = vpop.f32.mrf.mxu1 }
 0x192   :  { %v5210_v25 = vadd.f32 %v359_v18, %v5196_v15  ;;  %v5213_v26 = vadd.f32 %v472_v19, %v5200_v16 }
 0x193   :  { %v361_v27 = vpop.f32.mrf.mxu0  ;;  %v474_v29 = vpop.f32.mrf.mxu1 }
 0x194   :  { %v5216_v30 = vadd.f32 %v361_v27, %v5203_v21  ;;  %v5219_v32 = vadd.f32 %v474_v29, %v5207_v22 }
 0x195   :  { %v363_v34 = vpop.f32.mrf.mxu0  ;;  %v476_v39 = vpop.f32.mrf.mxu1 }
 0x196   :  { %v5222_v40 = vadd.f32 %v363_v34, %v5196_v15  ;;  %v5225_v42 = vadd.f32 %v476_v39, %v5200_v16 }
 0x197   :  { %v365_v43 = vpop.f32.mrf.mxu0  ;;  %v478_v44 = vpop.f32.mrf.mxu1 }
 0x198   :  { %v5228_v12 = vadd.f32 %v365_v43, %v5203_v21  ;;  %v5231_v18 = vadd.f32 %v478_v44, %v5207_v22 }
 0x199   :  { %v369_v19 = vpop.f32.mrf.mxu0  ;;  %v482_v27 = vpop.f32.mrf.mxu1 }
 0x19a   :  { %5925 = vst [vmem:[#allocation17_spill] sm:$0xff] %v5231_v18  ;;  %v5234_v29 = vadd.f32 %v369_v19, %v5196_v15  ;;  %v5237_v1 = vadd.f32 %v482_v27, %v5200_v16 }
 0x19b   :  { %v371_v34 = vpop.f32.mrf.mxu0  ;;  %v484_v5 = vpop.f32.mrf.mxu1 }
 0x19c   :  { %5926 = vst [vmem:[#allocation18_spill] sm:$0xff] %v5234_v29  ;;  %5927 = vst [vmem:[#allocation19_spill] sm:$0xff] %v5237_v1  ;;  %v5240_v39 = vadd.f32 %v371_v34, %v5203_v21  ;;  %v5243_v28 = vadd.f32 %v484_v5, %v5207_v22 }
 0x19d   :  { %v373_v43 = vpop.f32.mrf.mxu0  ;;  %v486_v0 = vpop.f32.mrf.mxu1 }
 0x19e   :  { %5928 = vst [vmem:[#allocation20_spill] sm:$0xff] %v5240_v39  ;;  %5929 = vst [vmem:[#allocation21_spill] sm:$0xff] %v5243_v28  ;;  %v5246_v44 = vadd.f32 %v373_v43, %v5196_v15  ;;  %v5249_v57 = vadd.f32 %v486_v0, %v5200_v16 }
 0x19f   :  { %v375_v19 = vpop.f32.mrf.mxu0  ;;  %v488_v24 = vpop.f32.mrf.mxu1 }
 0x1a0   :  { %5930 = vst [vmem:[#allocation22_spill] sm:$0xff] %v5246_v44  ;;  %5931 = vst [vmem:[#allocation23_spill] sm:$0xff] %v5249_v57  ;;  %v5252_v27 = vadd.f32 %v375_v19, %v5203_v21  ;;  %v5255_v2 = vadd.f32 %v488_v24, %v5207_v22 }
 0x1a1   :  { %v379_v34 = vpop.f32.mrf.mxu0  ;;  %v492_v1 = vpop.f32.mrf.mxu1 }
 0x1a2   :  { %5932 = vst [vmem:[#allocation24_spill] sm:$0xff] %v5252_v27  ;;  %5933 = vst [vmem:[#allocation25_spill] sm:$0xff] %v5255_v2  ;;  %v5258_v5 = vadd.f32 %v379_v34, %v5196_v15  ;;  %v5261_v28 = vadd.f32 %v492_v1, %v5200_v16 }
 0x1a3   :  { %v381_v43 = vpop.f32.mrf.mxu0  ;;  %v494_v44 = vpop.f32.mrf.mxu1 }
 0x1a4   :  { %5934 = vst [vmem:[#allocation26_spill] sm:$0xff] %v5258_v5  ;;  %5935 = vst [vmem:[#allocation27_spill] sm:$0xff] %v5261_v28  ;;  %v5264_v0 = vadd.f32 %v381_v43, %v5203_v21  ;;  %v5267_v57 = vadd.f32 %v494_v44, %v5207_v22 }
 0x1a5   :  { %v383_v19 = vpop.f32.mrf.mxu0  ;;  %v496_v27 = vpop.f32.mrf.mxu1 }
 0x1a6   :  { %5936 = vst [vmem:[#allocation28_spill] sm:$0xff] %v5264_v0  ;;  %5937 = vst [vmem:[#allocation29_spill] sm:$0xff] %v5267_v57  ;;  %v5270_v24 = vadd.f32 %v383_v19, %v5196_v15  ;;  %v5273_v2 = vadd.f32 %v496_v27, %v5200_v16 }
 0x1a7   :  { %v385_v34 = vpop.f32.mrf.mxu0  ;;  %v498_v5 = vpop.f32.mrf.mxu1 }
 0x1a8   :  { %5938 = vst [vmem:[#allocation30_spill] sm:$0xff] %v5270_v24  ;;  %5939 = vst [vmem:[#allocation31_spill] sm:$0xff] %v5273_v2  ;;  %v5276_v1 = vadd.f32 %v385_v34, %v5203_v21  ;;  %v5279_v28 = vadd.f32 %v498_v5, %v5207_v22 }
 0x1a9   :  { %v389_v43 = vpop.f32.mrf.mxu0  ;;  %v502_v0 = vpop.f32.mrf.mxu1 }
 0x1aa   :  { %5940 = vst [vmem:[#allocation32_spill] sm:$0xff] %v5276_v1  ;;  %5941 = vst [vmem:[#allocation33_spill] sm:$0xff] %v5279_v28  ;;  %v5282_v44 = vadd.f32 %v389_v43, %v5196_v15  ;;  %v5285_v57 = vadd.f32 %v502_v0, %v5200_v16 }
 0x1ab   :  { %v391_v19 = vpop.f32.mrf.mxu0  ;;  %v504_v24 = vpop.f32.mrf.mxu1 }
 0x1ac   :  { %5942 = vst [vmem:[#allocation34_spill] sm:$0xff] %v5282_v44  ;;  %5943 = vst [vmem:[#allocation35_spill] sm:$0xff] %v5285_v57  ;;  %v5288_v27 = vadd.f32 %v391_v19, %v5203_v21  ;;  %v5291_v2 = vadd.f32 %v504_v24, %v5207_v22 }
 0x1ad   :  { %v393_v34 = vpop.f32.mrf.mxu0  ;;  %v506_v1 = vpop.f32.mrf.mxu1 }
 0x1ae   :  { %5944 = vst [vmem:[#allocation36_spill] sm:$0xff] %v5288_v27  ;;  %5945 = vst [vmem:[#allocation37_spill] sm:$0xff] %v5291_v2  ;;  %v5294_v5 = vadd.f32 %v393_v34, %v5196_v15  ;;  %v5297_v28 = vadd.f32 %v506_v1, %v5200_v16 }
 0x1af   :  { %v395_v43 = vpop.f32.mrf.mxu0  ;;  %v508_v44 = vpop.f32.mrf.mxu1 }
 0x1b0   :  { %5946 = vst [vmem:[#allocation38_spill] sm:$0xff] %v5294_v5  ;;  %5947 = vst [vmem:[#allocation39_spill] sm:$0xff] %v5297_v28  ;;  %v5300_v0 = vadd.f32 %v395_v43, %v5203_v21  ;;  %v5303_v57 = vadd.f32 %v508_v44, %v5207_v22 }
 0x1b1   :  { %v399_v19 = vpop.f32.mrf.mxu0  ;;  %v512_v27 = vpop.f32.mrf.mxu1 }
 0x1b2   :  { %5948 = vst [vmem:[#allocation40_spill] sm:$0xff] %v5300_v0  ;;  %5949 = vst [vmem:[#allocation41_spill] sm:$0xff] %v5303_v57  ;;  %v5306_v24 = vadd.f32 %v399_v19, %v5196_v15  ;;  %v5309_v2 = vadd.f32 %v512_v27, %v5200_v16 }
 0x1b3   :  { %v401_v34 = vpop.f32.mrf.mxu0  ;;  %v514_v5 = vpop.f32.mrf.mxu1 }
 0x1b4   :  { %5950 = vst [vmem:[#allocation42_spill] sm:$0xff] %v5306_v24  ;;  %5951 = vst [vmem:[#allocation43_spill] sm:$0xff] %v5309_v2  ;;  %v5312_v1 = vadd.f32 %v401_v34, %v5203_v21  ;;  %v5315_v28 = vadd.f32 %v514_v5, %v5207_v22 }
 0x1b5   :  { %v403_v43 = vpop.f32.mrf.mxu0  ;;  %v516_v0 = vpop.f32.mrf.mxu1 }
 0x1b6   :  { %5952 = vst [vmem:[#allocation44_spill] sm:$0xff] %v5312_v1  ;;  %5953 = vst [vmem:[#allocation45_spill] sm:$0xff] %v5315_v28  ;;  %v5318_v44 = vadd.f32 %v403_v43, %v5196_v15  ;;  %v5321_v57 = vadd.f32 %v516_v0, %v5200_v16 }
 0x1b7   :  { %v405_v19 = vpop.f32.mrf.mxu0  ;;  %v518_v24 = vpop.f32.mrf.mxu1 }
 0x1b8   :  { %5954 = vst [vmem:[#allocation46_spill] sm:$0xff] %v5318_v44  ;;  %5955 = vst [vmem:[#allocation47_spill] sm:$0xff] %v5321_v57  ;;  %v5324_v27 = vadd.f32 %v405_v19, %v5203_v21  ;;  %v5327_v2 = vadd.f32 %v518_v24, %v5207_v22 }
 0x1b9   :  { %v409_v34 = vpop.f32.mrf.mxu0  ;;  %v522_v1 = vpop.f32.mrf.mxu1 }
 0x1ba   :  { %5956 = vst [vmem:[#allocation48_spill] sm:$0xff] %v5324_v27  ;;  %5957 = vst [vmem:[#allocation49_spill] sm:$0xff] %v5327_v2  ;;  %v5330_v5 = vadd.f32 %v409_v34, %v5196_v15  ;;  %v5333_v28 = vadd.f32 %v522_v1, %v5200_v16 }
 0x1bb   :  { %v411_v43 = vpop.f32.mrf.mxu0  ;;  %v524_v44 = vpop.f32.mrf.mxu1 }
 0x1bc   :  { %5958 = vst [vmem:[#allocation50_spill] sm:$0xff] %v5330_v5  ;;  %5959 = vst [vmem:[#allocation51_spill] sm:$0xff] %v5333_v28  ;;  %v5336_v0 = vadd.f32 %v411_v43, %v5203_v21  ;;  %v5339_v57 = vadd.f32 %v524_v44, %v5207_v22 }
 0x1bd   :  { %v413_v19 = vpop.f32.mrf.mxu0  ;;  %v526_v27 = vpop.f32.mrf.mxu1 }
 0x1be   :  { %5960 = vst [vmem:[#allocation52_spill] sm:$0xff] %v5336_v0  ;;  %5961 = vst [vmem:[#allocation53_spill] sm:$0xff] %v5339_v57  ;;  %v5342_v24 = vadd.f32 %v413_v19, %v5196_v15  ;;  %v5345_v2 = vadd.f32 %v526_v27, %v5200_v16 }
 0x1bf   :  { %v415_v34 = vpop.f32.mrf.mxu0  ;;  %v528_v5 = vpop.f32.mrf.mxu1 }
 0x1c0   :  { %5962 = vst [vmem:[#allocation54_spill] sm:$0xff] %v5342_v24  ;;  %5963 = vst [vmem:[#allocation55_spill] sm:$0xff] %v5345_v2  ;;  %v5348_v1 = vadd.f32 %v415_v34, %v5203_v21  ;;  %v5351_v28 = vadd.f32 %v528_v5, %v5207_v22 }
 0x1c1   :  { %v419_v43 = vpop.f32.mrf.mxu0  ;;  %v532_v0 = vpop.f32.mrf.mxu1 }
 0x1c2   :  { %5964 = vst [vmem:[#allocation56_spill] sm:$0xff] %v5348_v1  ;;  %5965 = vst [vmem:[#allocation57_spill] sm:$0xff] %v5351_v28  ;;  %v5354_v44 = vadd.f32 %v419_v43, %v5196_v15  ;;  %v5357_v57 = vadd.f32 %v532_v0, %v5200_v16  ;;  %v350_v0 = vadd.f32 %v5168_v51, %v5196_v15 }
 0x1c3   :  { %v421_v19 = vpop.f32.mrf.mxu0  ;;  %v534_v24 = vpop.f32.mrf.mxu1  ;;  %v356_v51 = vadd.f32 %v5191_v6, %v5203_v21 }
 0x1c4   :  { %5966 = vst [vmem:[#allocation58_spill] sm:$0xff] %v5354_v44  ;;  %5967 = vst [vmem:[#allocation59_spill] sm:$0xff] %v5357_v57  ;;  %v5360_v27 = vadd.f32 %v421_v19, %v5203_v21  ;;  %v5363_v2 = vadd.f32 %v534_v24, %v5207_v22 }
 0x1c5   :  { %v423_v34 = vpop.f32.mrf.mxu0  ;;  %v536_v1 = vpop.f32.mrf.mxu1 }
 0x1c6   :  { %5968 = vst [vmem:[#allocation60_spill] sm:$0xff] %v5360_v27  ;;  %5969 = vst [vmem:[#allocation61_spill] sm:$0xff] %v5363_v2  ;;  %v5366_v5 = vadd.f32 %v423_v34, %v5196_v15  ;;  %v5369_v28 = vadd.f32 %v536_v1, %v5200_v16  ;;  %v352_v2 = vadd.f32 %v5172_v55, %v5203_v21 }
 0x1c7   :  { %v425_v43 = vpop.f32.mrf.mxu0  ;;  %v538_v44 = vpop.f32.mrf.mxu1  ;;  %v354_v1 = vadd.f32 %v5183_v20, %v5196_v15  ;;  %v463_v20 = vadd.f32 %v5170_v52, %v5200_v16  ;;  %v465_v15 = vadd.f32 %v5174_v56, %v5207_v22 }
 0x1c8   :  { %5970 = vst [vmem:[#allocation62_spill] sm:$0xff] %v5366_v5  ;;  %5971 = vst [vmem:[#allocation63_spill] sm:$0xff] %v5369_v28  ;;  %v5374_v57 = vadd.f32 %v425_v43, %v5203_v21  ;;  %v5377_v19 = vadd.f32 %v538_v44, %v5207_v22 }
 0x1c9   :  { %v839_v24 = vpop.f32.mrf.mxu0  ;;  %v882_v43 = vpop.f32.mrf.mxu1 }
 0x1ca   :  { %5972 = vst [vmem:[#allocation64_spill] sm:$0xff] %v5374_v57  ;;  %5973 = vst [vmem:[#allocation65_spill] sm:$0xff] %v5377_v19  ;;  %v891_v34 = vadd.f32 %v839_v24, %v350_v0  ;;  %v893_v6 = vadd.f32 %v882_v43, %v463_v20 }
 0x1cb   :  { %v841_v5 = vpop.f32.mrf.mxu0  ;;  %v884_v55 = vpop.f32.mrf.mxu1 }
 0x1cc   :  { %v3761_v28 = vmul.f32 -1.442695, %v891_v34  ;;  %v892_v27 = vadd.f32 %v841_v5, %v352_v2  ;;  %v894_v21 = vadd.f32 %v884_v55, %v465_v15 }
 0x1cd   :  { %v843_v39 = vpop.f32.mrf.mxu0  ;;  %v886_v2 = vpop.f32.mrf.mxu1 }
 0x1ce   :  { %4382 = vpow2.f32 %v3761_v28  ;;  %v3762_v57 = vmul.f32 -1.442695, %v892_v27  ;;  %v895_v44 = vadd.f32 %v843_v39, %v354_v1  ;;  %v467_v28 = vadd.f32 %v5185_v23, %v5200_v16 }
 0x1cf   :  { %v845_v19 = vpop.f32.mrf.mxu0  ;;  %v3763_v27 = vmul.f32 -1.442695, %v893_v6 }
 0x1d0   :  { %4384 = vpow2.f32 %v3762_v57  ;;  %v3764_v29 = vmul.f32 -1.442695, %v895_v44  ;;  %v896_v18 = vadd.f32 %v845_v19, %v356_v51  ;;  %v897_v39 = vadd.f32 %v886_v2, %v467_v28  ;;  %v888_v19 = vpop.f32.mrf.mxu1 }
 0x1d2   :  { %4386 = vpow2.f32 %v3764_v29  ;;  %v3765_v0 = vmul.f32 -1.442695, %v896_v18  ;;  %v469_v18 = vadd.f32 %v5193_v7, %v5207_v22  ;;  %v3766_v52 = vmul.f32 -1.442695, %v897_v39 }
 0x1d4   :  { %4388 = vpow2.f32 %v3765_v0  ;;  %v898_v56 = vadd.f32 %v888_v19, %v469_v18 }
 0x1d5   :  { %4390 = vtanh.f32 %v894_v21 }
 0x1db   :  { %v4383_v57 = vpop.eup %4382 }
 0x1dc   :  { %v917_v5 = vadd.f32 1.0, %v4383_v57 }
 0x1dd   :  { %v4385_v29 = vpop.eup %4384 }
 0x1de   :  { %4392 = vrcp.f32 %v917_v5  ;;  %v918_v24 = vadd.f32 1.0, %v4385_v29 }
 0x1df   :  { %v4387_v34 = vpop.eup %4386  ;;  %4394 = vpow2.f32 %v3763_v27 }
 0x1e0   :  { %4396 = vrcp.f32 %v918_v24  ;;  %v920_v23 = vadd.f32 1.0, %v4387_v34 }
 0x1e1   :  { %v4389_v16 = vpop.eup %4388  ;;  %4398 = vpow2.f32 %v3766_v52 }
 0x1e2   :  { %4400 = vrcp.f32 %v920_v23  ;;  %v921_v1 = vadd.f32 1.0, %v4389_v16  ;;  %v4391_v51 = vpop.eup %4390  ;;  %v5431_v23 = vld [vmem:[#allocation3 + $0xe4] ss:$16 sps:$4 sm:$0xff]   ;;  %v5434_v16 = vld [vmem:[#allocation3 + $0xec] ss:$16 sps:$4 sm:$0xff]  }
 0x1e3   :  { %4402 = vtanh.f32 %v898_v56  ;;  %v5974_v56 = vmov 0  }
 0x1e4   :  { %4404 = vrcp.f32 %v921_v1 }
 0x1eb   :  { %v4393_v43 = vpop.eup %4392 }
 0x1ec   :  { %v4395_v44 = vpop.eup %4394  ;;  %v939_v55 = vmul.f32 %v4393_v43, %v4391_v51 }
 0x1ed   :  { %v4397_v7 = vpop.eup %4396  ;;  %v919_v2 = vadd.f32 1.0, %v4395_v44 }
 0x1ee   :  { %v4399_v22 = vpop.eup %4398  ;;  %v937_v0 = vmul.f32 0.0, %v4397_v7 }
 0x1ef   :  { %v4401_v20 = vpop.eup %4400  ;;  %v922_v21 = vadd.f32 1.0, %v4399_v22  ;;  %4406 = vrcp.f32 %v919_v2 }
 0x1f0   :  { %v4403_v15 = vpop.eup %4402  ;;  %v5393_v28 = vadd.f32 %v939_v55, %v937_v0 }
 0x1f1   :  { %v4405_v6 = vpop.eup %4404  ;;  %v940_v57 = vmul.f32 %v4403_v15, %v4401_v20 }
 0x1f2   :  { %v938_v39 = vmul.f32 0.0, %v4405_v6  ;;  %4408 = vtanh.f32 %v5393_v28 }
 0x1f3   :  { %4410 = vrcp.f32 %v922_v21 }
 0x1f4   :  { %v5396_v27 = vadd.f32 %v940_v57, %v938_v39 }
 0x1f6   :  { %4412 = vtanh.f32 %v5396_v27 }
 0x1fc   :  { %v4407_v5 = vpop.eup %4406 }
 0x1ff   :  { %v4409_v19 = vpop.eup %4408 }
 0x200   :  { %v4411_v29 = vpop.eup %4410  ;;  %v945_v52 = vmul.f32 %v4409_v19, %v4407_v5 }
 0x203   :  { %v4413_v18 = vpop.eup %4412 }
 0x204   :  { %v946_v24 = vmul.f32 %v4413_v18, %v4411_v29 }
 0x206   :  { %v955_v34 = vpack.c.bf16 %v946_v24, %v945_v52 }
 0x208   :  { %989 = vmatmul.mubr.bf16.vlgmr.msra.gmra.mxu0 %v955_v34  ;;  %1032 = vmatmul.mubr.bf16.vlgmr.msra.gmra.mxu1 %v955_v34  ;;  %v5975_v34 = vld [vmem:[#allocation17_spill] sm:$0xff] }
 0x209   :  { %1108 = vmatpush1.bf16.msra.mxu0 %v4977_v31  ;;  %1151 = vmatpush1.bf16.msra.mxu1 %v4981_v35 }
 0x20a   :  { %1109 = vmatprep.subr.bf16.mxu0 %v4979_v33  ;;  %1152 = vmatprep.subr.bf16.mxu1 %v4987_v36 }
 0x20b   :  { %1139 = vmatprep.mubr.bf16.mxu0 %v5974_v56  ;;  %1182 = vmatprep.mubr.bf16.mxu1 %v5974_v56 }
 0x20d   :  { %1110 = vmatpush1.bf16.msra.mxu0 %v4991_v37  ;;  %1153 = vmatpush1.bf16.msra.mxu1 %v5000_v41 }
 0x20e   :  { %1111 = vmatprep.subr.bf16.mxu0 %v4995_v38  ;;  %1154 = vmatprep.subr.bf16.mxu1 %v5007_v46 }
 0x211   :  { %1112 = vmatpush1.bf16.msra.mxu0 %v5005_v45  ;;  %1155 = vmatpush1.bf16.msra.mxu1 %v5012_v48 }
 0x212   :  { %1113 = vmatprep.subr.bf16.mxu0 %v5009_v47  ;;  %1156 = vmatprep.subr.bf16.mxu1 %v5018_v49 }
 0x215   :  { %1114 = vmatpush1.bf16.msra.mxu0 %v5023_v50  ;;  %1157 = vmatpush1.bf16.msra.mxu1 %v5032_v54 }
 0x216   :  { %1115 = vmatprep.subr.bf16.mxu0 %v5029_v53  ;;  %1158 = vmatprep.subr.bf16.mxu1 %v5038_v59 }
 0x219   :  { %1116 = vmatpush1.bf16.msra.mxu0 %v5036_v58  ;;  %1159 = vmatpush1.bf16.msra.mxu1 %v5044_v61 }
 0x21a   :  { %1117 = vmatprep.subr.bf16.mxu0 %v5041_v60  ;;  %1160 = vmatprep.subr.bf16.mxu1 %v5050_v62 }
 0x21d   :  { %1118 = vmatpush1.bf16.msra.mxu0 %v5055_v63  ;;  %1161 = vmatpush1.bf16.msra.mxu1 %v5064_v4 }
 0x21e   :  { %1119 = vmatprep.subr.bf16.mxu0 %v5061_v3  ;;  %1162 = vmatprep.subr.bf16.mxu1 %v5070_v9 }
 0x221   :  { %1120 = vmatpush1.bf16.msra.mxu0 %v5068_v8  ;;  %1163 = vmatpush1.bf16.msra.mxu1 %v5076_v11 }
 0x222   :  { %1121 = vmatprep.subr.bf16.mxu0 %v5074_v10  ;;  %1164 = vmatprep.subr.bf16.mxu1 %v5082_v13 }
 0x225   :  { %1122 = vmatpush1.bf16.msra.mxu0 %v5087_v14  ;;  %1165 = vmatpush1.bf16.msra.mxu1 %v5094_v17 }
 0x226   :  { %1258 = vmatprep.subr.bf16.mxu0 %v5431_v23  ;;  %1301 = vmatprep.subr.bf16.mxu1 %v5434_v16 }
 0x2c8   :  { %v990_v1 = vpop.f32.mrf.mxu0  ;;  %v1033_v55 = vpop.f32.mrf.mxu1 }
 0x2c9   :  { %v1042_v51 = vadd.f32 %v990_v1, %v5210_v25  ;;  %v1044_v25 = vadd.f32 %v1033_v55, %v5213_v26 }
 0x2ca   :  { %v992_v43 = vpop.f32.mrf.mxu0  ;;  %v1035_v15 = vpop.f32.mrf.mxu1 }
 0x2cb   :  { %v3767_v44 = vmul.f32 -1.442695, %v1042_v51  ;;  %v1043_v7 = vadd.f32 %v992_v43, %v5216_v30  ;;  %v3769_v30 = vmul.f32 -1.442695, %v1044_v25  ;;  %v1045_v19 = vadd.f32 %v1035_v15, %v5219_v32 }
 0x2cc   :  { %v994_v22 = vpop.f32.mrf.mxu0  ;;  %v1037_v57 = vpop.f32.mrf.mxu1 }
 0x2cd   :  { %4414 = vpow2.f32 %v3767_v44  ;;  %v3768_v0 = vmul.f32 -1.442695, %v1043_v7  ;;  %v1046_v20 = vadd.f32 %v994_v22, %v5222_v40  ;;  %v1048_v5 = vadd.f32 %v1037_v57, %v5225_v42 }
 0x2ce   :  { %v996_v2 = vpop.f32.mrf.mxu0  ;;  %v1039_v29 = vpop.f32.mrf.mxu1 }
 0x2cf   :  { %4416 = vpow2.f32 %v3768_v0  ;;  %v3770_v6 = vmul.f32 -1.442695, %v1046_v20  ;;  %v1047_v21 = vadd.f32 %v996_v2, %v5228_v12  ;;  %v3772_v40 = vmul.f32 -1.442695, %v1048_v5 }
 0x2d0   :  { %v1049_v12 = vadd.f32 %v1039_v29, %v5975_v34  ;;  %v5983_v34 = vld [vmem:[#allocation25_spill] sm:$0xff] }
 0x2d1   :  { %4418 = vpow2.f32 %v3770_v6  ;;  %v3771_v39 = vmul.f32 -1.442695, %v1047_v21 }
 0x2d3   :  { %4420 = vpow2.f32 %v3771_v39 }
 0x2d4   :  { %4422 = vpow2.f32 %v3769_v30 }
 0x2d5   :  { %4424 = vtanh.f32 %v1045_v19 }
 0x2da   :  { %v4415_v18 = vpop.eup %4414 }
 0x2db   :  { %v1068_v52 = vadd.f32 1.0, %v4415_v18 }
 0x2dc   :  { %v4417_v24 = vpop.eup %4416 }
 0x2dd   :  { %4426 = vrcp.f32 %v1068_v52  ;;  %v1069_v1 = vadd.f32 1.0, %v4417_v24 }
 0x2de   :  { %v4419_v51 = vpop.eup %4418  ;;  %4428 = vpow2.f32 %v3772_v40 }
 0x2df   :  { %4430 = vrcp.f32 %v1069_v1  ;;  %v1071_v26 = vadd.f32 1.0, %v4419_v51 }
 0x2e0   :  { %v4421_v43 = vpop.eup %4420  ;;  %4432 = vtanh.f32 %v1049_v12 }
 0x2e1   :  { %4434 = vrcp.f32 %v1071_v26  ;;  %v1072_v42 = vadd.f32 1.0, %v4421_v43  ;;  %v4423_v32 = vpop.eup %4422 }
 0x2e2   :  { %v4425_v44 = vpop.eup %4424  ;;  %v1070_v6 = vadd.f32 1.0, %v4423_v32 }
 0x2e3   :  { %4436 = vrcp.f32 %v1072_v42 }
 0x2e4   :  { %4438 = vrcp.f32 %v1070_v6 }
 0x2ea   :  { %v4427_v55 = vpop.eup %4426 }
 0x2eb   :  { %v4429_v7 = vpop.eup %4428  ;;  %v1090_v22 = vmul.f32 %v4427_v55, %v4425_v44 }
 0x2ec   :  { %v4431_v0 = vpop.eup %4430  ;;  %v1073_v57 = vadd.f32 1.0, %v4429_v7 }
 0x2ed   :  { %v4433_v20 = vpop.eup %4432  ;;  %v1088_v2 = vmul.f32 %v4431_v0, %v5393_v28 }
 0x2ee   :  { %v4435_v15 = vpop.eup %4434 }
 0x2ef   :  { %v5446_v21 = vadd.f32 %v1090_v22, %v1088_v2  ;;  %v1091_v39 = vmul.f32 %v4435_v15, %v4433_v20 }
 0x2f0   :  { %v4437_v25 = vpop.eup %4436 }
 0x2f1   :  { %v1089_v5 = vmul.f32 %v4437_v25, %v5396_v27  ;;  %4440 = vtanh.f32 %v5446_v21  ;;  %v4439_v19 = vpop.eup %4438 }
 0x2f2   :  { %4442 = vrcp.f32 %v1073_v57 }
 0x2f3   :  { %v5450_v30 = vadd.f32 %v1091_v39, %v1089_v5 }
 0x2f5   :  { %4444 = vtanh.f32 %v5450_v30 }
 0x2fe   :  { %v4441_v29 = vpop.eup %4440 }
 0x2ff   :  { %v4443_v28 = vpop.eup %4442  ;;  %v1096_v40 = vmul.f32 %v4441_v29, %v4439_v19 }
 0x302   :  { %v4445_v18 = vpop.eup %4444 }
 0x303   :  { %v1097_v52 = vmul.f32 %v4445_v18, %v4443_v28 }
 0x305   :  { %v1106_v24 = vpack.c.bf16 %v1097_v52, %v1096_v40 }
 0x307   :  { %1140 = vmatmul.mubr.bf16.vlgmr.msra.gmra.mxu0 %v1106_v24  ;;  %1183 = vmatmul.mubr.bf16.vlgmr.msra.gmra.mxu1 %v1106_v24 }
 0x308   :  { %1259 = vmatpush1.bf16.msra.mxu0 %v4977_v31  ;;  %1302 = vmatpush1.bf16.msra.mxu1 %v4981_v35 }
 0x309   :  { %1260 = vmatprep.subr.bf16.mxu0 %v4979_v33  ;;  %1303 = vmatprep.subr.bf16.mxu1 %v4987_v36  ;;  %v5976_v33 = vld [vmem:[#allocation18_spill] sm:$0xff] }
 0x30a   :  { %1290 = vmatprep.mubr.bf16.mxu0 %v5974_v56  ;;  %1333 = vmatprep.mubr.bf16.mxu1 %v5974_v56 }
 0x30c   :  { %1261 = vmatpush1.bf16.msra.mxu0 %v4991_v37  ;;  %1304 = vmatpush1.bf16.msra.mxu1 %v5000_v41  ;;  %v5977_v41 = vld [vmem:[#allocation20_spill] sm:$0xff] }
 0x30d   :  { %1262 = vmatprep.subr.bf16.mxu0 %v4995_v38  ;;  %1305 = vmatprep.subr.bf16.mxu1 %v5007_v46 }
 0x310   :  { %1263 = vmatpush1.bf16.msra.mxu0 %v5005_v45  ;;  %1306 = vmatpush1.bf16.msra.mxu1 %v5012_v48  ;;  %v5978_v48 = vld [vmem:[#allocation22_spill] sm:$0xff] }
 0x311   :  { %1264 = vmatprep.subr.bf16.mxu0 %v5009_v47  ;;  %1307 = vmatprep.subr.bf16.mxu1 %v5018_v49 }
 0x314   :  { %1265 = vmatpush1.bf16.msra.mxu0 %v5023_v50  ;;  %1308 = vmatpush1.bf16.msra.mxu1 %v5032_v54 }
 0x315   :  { %1266 = vmatprep.subr.bf16.mxu0 %v5029_v53  ;;  %1309 = vmatprep.subr.bf16.mxu1 %v5038_v59 }
 0x318   :  { %1267 = vmatpush1.bf16.msra.mxu0 %v5036_v58  ;;  %1310 = vmatpush1.bf16.msra.mxu1 %v5044_v61  ;;  %v5979_v58 = vld [vmem:[#allocation24_spill] sm:$0xff]  ;;  %v5980_v61 = vld [vmem:[#allocation19_spill] sm:$0xff] }
 0x319   :  { %1268 = vmatprep.subr.bf16.mxu0 %v5041_v60  ;;  %1311 = vmatprep.subr.bf16.mxu1 %v5050_v62 }
 0x31c   :  { %1269 = vmatpush1.bf16.msra.mxu0 %v5055_v63  ;;  %1312 = vmatpush1.bf16.msra.mxu1 %v5064_v4 }
 0x31d   :  { %1270 = vmatprep.subr.bf16.mxu0 %v5061_v3  ;;  %1313 = vmatprep.subr.bf16.mxu1 %v5070_v9  ;;  %v5981_v3 = vld [vmem:[#allocation23_spill] sm:$0xff]  ;;  %v5982_v9 = vld [vmem:[#allocation21_spill] sm:$0xff] }
 0x320   :  { %1271 = vmatpush1.bf16.msra.mxu0 %v5068_v8  ;;  %1314 = vmatpush1.bf16.msra.mxu1 %v5076_v11 }
 0x321   :  { %1272 = vmatprep.subr.bf16.mxu0 %v5074_v10  ;;  %1315 = vmatprep.subr.bf16.mxu1 %v5082_v13 }
 0x324   :  { %1273 = vmatpush1.bf16.msra.mxu0 %v5087_v14  ;;  %1316 = vmatpush1.bf16.msra.mxu1 %v5094_v17 }
 0x325   :  { %1409 = vmatprep.subr.bf16.mxu0 %v5431_v23  ;;  %1452 = vmatprep.subr.bf16.mxu1 %v5434_v16 }
 0x3c7   :  { %v1141_v31 = vpop.f32.mrf.mxu0  ;;  %v1184_v38 = vpop.f32.mrf.mxu1 }
 0x3c8   :  { %v1193_v35 = vadd.f32 %v1141_v31, %v5976_v33  ;;  %v1195_v62 = vadd.f32 %v1184_v38, %v5980_v61  ;;  %v5503_v33 = vld [vmem:[#allocation3 + $0xe0] ss:$16 sps:$4 sm:$0xff]   ;;  %v5520_v38 = vld [vmem:[#allocation3 + $0xc8] ss:$16 sps:$4 sm:$0xff]   ;;  %v5559_v61 = vld [vmem:[#allocation3 + $0x44] ss:$16 sps:$4 sm:$0xff]  }
 0x3c9   :  { %v1143_v36 = vpop.f32.mrf.mxu0  ;;  %v1186_v53 = vpop.f32.mrf.mxu1 }
 0x3ca   :  { %v3773_v37 = vmul.f32 -1.442695, %v1193_v35  ;;  %v1194_v45 = vadd.f32 %v1143_v36, %v5977_v41  ;;  %v3775_v8 = vmul.f32 -1.442695, %v1195_v62  ;;  %v1196_v10 = vadd.f32 %v1186_v53, %v5982_v9  ;;  %v5509_v35 = vld [vmem:[#allocation3 + $0xc4] ss:$16 sps:$4 sm:$0xff]  }
 0x3cb   :  { %v1145_v46 = vpop.f32.mrf.mxu0  ;;  %v1188_v63 = vpop.f32.mrf.mxu1  ;;  %v5512_v36 = vld [vmem:[#allocation3 + $0xcc] ss:$16 sps:$4 sm:$0xff]   ;;  %v5523_v41 = vld [vmem:[#allocation3 + $0xa4] ss:$16 sps:$4 sm:$0xff]   ;;  %v5544_v53 = vld [vmem:[#allocation3 + $0x88] ss:$16 sps:$4 sm:$0xff]  }
 0x3cc   :  { %4446 = vpow2.f32 %v3773_v37  ;;  %v3774_v47 = vmul.f32 -1.442695, %v1194_v45  ;;  %v1197_v49 = vadd.f32 %v1145_v46, %v5978_v48  ;;  %v1199_v4 = vadd.f32 %v1188_v63, %v5981_v3  ;;  %v5517_v37 = vld [vmem:[#allocation3 + $0xc0] ss:$16 sps:$4 sm:$0xff]   ;;  %v5526_v45 = vld [vmem:[#allocation3 + $0xac] ss:$16 sps:$4 sm:$0xff]  }
 0x3cd   :  { %v1147_v50 = vpop.f32.mrf.mxu0  ;;  %v1190_v11 = vpop.f32.mrf.mxu1  ;;  %v5529_v46 = vld [vmem:[#allocation3 + $0xa0] ss:$16 sps:$4 sm:$0xff]   ;;  %v5535_v48 = vld [vmem:[#allocation3 + $0x84] ss:$16 sps:$4 sm:$0xff]   ;;  %v5562_v62 = vld [vmem:[#allocation3 + $0x4c] ss:$16 sps:$4 sm:$0xff]  }
 0x3ce   :  { %4448 = vpow2.f32 %v3774_v47  ;;  %v3776_v54 = vmul.f32 -1.442695, %v1197_v49  ;;  %v1198_v59 = vadd.f32 %v1147_v50, %v5979_v58  ;;  %v3778_v14 = vmul.f32 -1.442695, %v1199_v4  ;;  %v5532_v47 = vld [vmem:[#allocation3 + $0xa8] ss:$16 sps:$4 sm:$0xff]  }
 0x3cf   :  { %v1200_v12 = vadd.f32 %v1190_v11, %v5983_v34  ;;  %v5538_v49 = vld [vmem:[#allocation3 + $0x8c] ss:$16 sps:$4 sm:$0xff]   ;;  %v5541_v50 = vld [vmem:[#allocation3 + $0x80] ss:$16 sps:$4 sm:$0xff]   ;;  %v5568_v3 = vld [vmem:[#allocation3 + $0x48] ss:$16 sps:$4 sm:$0xff]  }
 0x3d0   :  { %4450 = vpow2.f32 %v3776_v54  ;;  %v3777_v60 = vmul.f32 -1.442695, %v1198_v59  ;;  %v5547_v54 = vld [vmem:[#allocation3 + $0x64] ss:$16 sps:$4 sm:$0xff]   ;;  %v5550_v58 = vld [vmem:[#allocation3 + $0x6c] ss:$16 sps:$4 sm:$0xff]  }
 0x3d1   :  { %v5553_v59 = vld [vmem:[#allocation3 + $0x60] ss:$16 sps:$4 sm:$0xff]   ;;  %v5571_v4 = vld [vmem:[#allocation3 + $0x24] ss:$16 sps:$4 sm:$0xff]  }
 0x3d2   :  { %4452 = vpow2.f32 %v3777_v60  ;;  %v5556_v60 = vld [vmem:[#allocation3 + $0x68] ss:$16 sps:$4 sm:$0xff]   ;;  %v5565_v63 = vld [vmem:[#allocation3 + $0x40] ss:$16 sps:$4 sm:$0xff]   ;;  %v5583_v11 = vld [vmem:[#allocation3 + $0x4] ss:$16 sps:$4 sm:$0xff]  }
 0x3d3   :  { %4454 = vpow2.f32 %v3775_v8  ;;  %v5574_v8 = vld [vmem:[#allocation3 + $0x2c] ss:$16 sps:$4 sm:$0xff]   ;;  %v5577_v9 = vld [vmem:[#allocation3 + $0x20] ss:$16 sps:$4 sm:$0xff]  }
 0x3d4   :  { %4456 = vtanh.f32 %v1196_v10  ;;  %v5580_v10 = vld [vmem:[#allocation3 + $0x28] ss:$16 sps:$4 sm:$0xff]   ;;  %v5984_v34 = vld [vmem:[#allocation26_spill] sm:$0xff] }
 0x3d9   :  { %v4447_v13 = vpop.eup %4446 }
 0x3da   :  { %v1219_v17 = vadd.f32 1.0, %v4447_v13  ;;  %v5586_v13 = vld [vmem:[#allocation3 + $0xc] ss:$16 sps:$4 sm:$0xff]  }
 0x3db   :  { %v4449_v27 = vpop.eup %4448 }
 0x3dc   :  { %4458 = vrcp.f32 %v1219_v17  ;;  %v1220_v1 = vadd.f32 1.0, %v4449_v27  ;;  %v5592_v17 = vld [vmem:[#allocation3 + $0x8] ss:$16 sps:$4 sm:$0xff]  }
 0x3dd   :  { %v4451_v51 = vpop.eup %4450  ;;  %4460 = vpow2.f32 %v3778_v14  ;;  %v5589_v14 = vld [vmem:[#allocation3] ss:$16 sps:$4 sm:$0xff]  }
 0x3de   :  { %4462 = vrcp.f32 %v1220_v1  ;;  %v1222_v26 = vadd.f32 1.0, %v4451_v51 }
 0x3df   :  { %v4453_v43 = vpop.eup %4452  ;;  %4464 = vtanh.f32 %v1200_v12 }
 0x3e0   :  { %4466 = vrcp.f32 %v1222_v26  ;;  %v1223_v42 = vadd.f32 1.0, %v4453_v43  ;;  %v4455_v32 = vpop.eup %4454  ;;  %v5985_v43 = vld [vmem:[#allocation28_spill] sm:$0xff] }
 0x3e1   :  { %v4457_v44 = vpop.eup %4456  ;;  %v1221_v6 = vadd.f32 1.0, %v4455_v32 }
 0x3e2   :  { %4468 = vrcp.f32 %v1223_v42 }
 0x3e3   :  { %4470 = vrcp.f32 %v1221_v6 }
 0x3e9   :  { %v4459_v55 = vpop.eup %4458 }
 0x3ea   :  { %v4461_v7 = vpop.eup %4460  ;;  %v1241_v22 = vmul.f32 %v4459_v55, %v4457_v44  ;;  %v5986_v55 = vld [vmem:[#allocation30_spill] sm:$0xff] }
 0x3eb   :  { %v4463_v0 = vpop.eup %4462  ;;  %v1224_v5 = vadd.f32 1.0, %v4461_v7 }
 0x3ec   :  { %v4465_v20 = vpop.eup %4464  ;;  %v1239_v2 = vmul.f32 %v4463_v0, %v5446_v21 }
 0x3ed   :  { %v4467_v15 = vpop.eup %4466 }
 0x3ee   :  { %v5496_v39 = vadd.f32 %v1241_v22, %v1239_v2  ;;  %v1242_v25 = vmul.f32 %v4467_v15, %v4465_v20  ;;  %v5987_v2 = vld [vmem:[#allocation32_spill] sm:$0xff] }
 0x3ef   :  { %v4469_v57 = vpop.eup %4468 }
 0x3f0   :  { %v1240_v19 = vmul.f32 %v4469_v57, %v5450_v30  ;;  %4472 = vtanh.f32 %v5496_v39  ;;  %v4471_v28 = vpop.eup %4470  ;;  %v5506_v30 = vld [vmem:[#allocation3 + $0xe8] ss:$16 sps:$4 sm:$0xff]  }
 0x3f1   :  { %4474 = vrcp.f32 %v1224_v5 }
 0x3f2   :  { %v5500_v29 = vadd.f32 %v1242_v25, %v1240_v19  ;;  %v5988_v25 = vld [vmem:[#allocation27_spill] sm:$0xff] }
 0x3f3   :  { %v5989_v19 = vld [vmem:[#allocation31_spill] sm:$0xff] }
 0x3f4   :  { %4476 = vtanh.f32 %v5500_v29 }
 0x3fd   :  { %v4473_v18 = vpop.eup %4472 }
 0x3fe   :  { %v4475_v21 = vpop.eup %4474  ;;  %v1247_v52 = vmul.f32 %v4473_v18, %v4471_v28 }
 0x401   :  { %v4477_v40 = vpop.eup %4476 }
 0x402   :  { %v1248_v24 = vmul.f32 %v4477_v40, %v4475_v21  ;;  %v5990_v21 = vld [vmem:[#allocation29_spill] sm:$0xff] }
 0x404   :  { %v1257_v31 = vpack.c.bf16 %v1248_v24, %v1247_v52 }
 0x406   :  { %1291 = vmatmul.mubr.bf16.vlgmr.msra.gmra.mxu0 %v1257_v31  ;;  %1334 = vmatmul.mubr.bf16.vlgmr.msra.gmra.mxu1 %v1257_v31 }
 0x407   :  { %1410 = vmatpush1.bf16.msra.mxu0 %v5503_v33  ;;  %1453 = vmatpush1.bf16.msra.mxu1 %v5506_v30 }
 0x408   :  { %1411 = vmatprep.subr.bf16.mxu0 %v5509_v35  ;;  %1454 = vmatprep.subr.bf16.mxu1 %v5512_v36 }
 0x409   :  { %1441 = vmatprep.mubr.bf16.mxu0 %v5974_v56  ;;  %1484 = vmatprep.mubr.bf16.mxu1 %v5974_v56 }
 0x40b   :  { %1412 = vmatpush1.bf16.msra.mxu0 %v5517_v37  ;;  %1455 = vmatpush1.bf16.msra.mxu1 %v5520_v38 }
 0x40c   :  { %1413 = vmatprep.subr.bf16.mxu0 %v5523_v41  ;;  %1456 = vmatprep.subr.bf16.mxu1 %v5526_v45 }
 0x40f   :  { %1414 = vmatpush1.bf16.msra.mxu0 %v5529_v46  ;;  %1457 = vmatpush1.bf16.msra.mxu1 %v5532_v47 }
 0x410   :  { %1415 = vmatprep.subr.bf16.mxu0 %v5535_v48  ;;  %1458 = vmatprep.subr.bf16.mxu1 %v5538_v49 }
 0x413   :  { %1416 = vmatpush1.bf16.msra.mxu0 %v5541_v50  ;;  %1459 = vmatpush1.bf16.msra.mxu1 %v5544_v53 }
 0x414   :  { %1417 = vmatprep.subr.bf16.mxu0 %v5547_v54  ;;  %1460 = vmatprep.subr.bf16.mxu1 %v5550_v58 }
 0x417   :  { %1418 = vmatpush1.bf16.msra.mxu0 %v5553_v59  ;;  %1461 = vmatpush1.bf16.msra.mxu1 %v5556_v60 }
 0x418   :  { %1419 = vmatprep.subr.bf16.mxu0 %v5559_v61  ;;  %1462 = vmatprep.subr.bf16.mxu1 %v5562_v62 }
 0x41b   :  { %1420 = vmatpush1.bf16.msra.mxu0 %v5565_v63  ;;  %1463 = vmatpush1.bf16.msra.mxu1 %v5568_v3 }
 0x41c   :  { %1421 = vmatprep.subr.bf16.mxu0 %v5571_v4  ;;  %1464 = vmatprep.subr.bf16.mxu1 %v5574_v8 }
 0x41f   :  { %1422 = vmatpush1.bf16.msra.mxu0 %v5577_v9  ;;  %1465 = vmatpush1.bf16.msra.mxu1 %v5580_v10 }
 0x420   :  { %1423 = vmatprep.subr.bf16.mxu0 %v5583_v11  ;;  %1466 = vmatprep.subr.bf16.mxu1 %v5586_v13 }
 0x423   :  { %1424 = vmatpush1.bf16.msra.mxu0 %v5589_v14  ;;  %1467 = vmatpush1.bf16.msra.mxu1 %v5592_v17 }
 0x424   :  { %1560 = vmatprep.subr.bf16.mxu0 %v5431_v23  ;;  %1603 = vmatprep.subr.bf16.mxu1 %v5434_v16 }
 0x4c6   :  { %v1292_v27 = vpop.f32.mrf.mxu0  ;;  %v1335_v26 = vpop.f32.mrf.mxu1 }
 0x4c7   :  { %v1344_v12 = vadd.f32 %v1292_v27, %v5984_v34  ;;  %v1346_v57 = vadd.f32 %v1335_v26, %v5988_v25 }
 0x4c8   :  { %v1294_v1 = vpop.f32.mrf.mxu0  ;;  %v1337_v0 = vpop.f32.mrf.mxu1 }
 0x4c9   :  { %v3779_v51 = vmul.f32 -1.442695, %v1344_v12  ;;  %v1345_v42 = vadd.f32 %v1294_v1, %v5985_v43  ;;  %v3781_v18 = vmul.f32 -1.442695, %v1346_v57  ;;  %v1347_v40 = vadd.f32 %v1337_v0, %v5990_v21  ;;  %v5991_v12 = vld [vmem:[#allocation33_spill] sm:$0xff] }
 0x4ca   :  { %v1296_v32 = vpop.f32.mrf.mxu0  ;;  %v1339_v5 = vpop.f32.mrf.mxu1 }
 0x4cb   :  { %4478 = vpow2.f32 %v3779_v51  ;;  %v3780_v44 = vmul.f32 -1.442695, %v1345_v42  ;;  %v1348_v7 = vadd.f32 %v1296_v32, %v5986_v55  ;;  %v1350_v28 = vadd.f32 %v1339_v5, %v5989_v19 }
 0x4cc   :  { %v1298_v22 = vpop.f32.mrf.mxu0  ;;  %v1341_v52 = vpop.f32.mrf.mxu1 }
 0x4cd   :  { %4480 = vpow2.f32 %v3780_v44  ;;  %v3782_v20 = vmul.f32 -1.442695, %v1348_v7  ;;  %v1349_v15 = vadd.f32 %v1298_v22, %v5987_v2  ;;  %v3784_v31 = vmul.f32 -1.442695, %v1350_v28 }
 0x4ce   :  { %v1351_v1 = vadd.f32 %v1341_v52, %v5991_v12  ;;  %v5992_v12 = vld [vmem:[#allocation34_spill] sm:$0xff] }
 0x4cf   :  { %4482 = vpow2.f32 %v3782_v20  ;;  %v3783_v6 = vmul.f32 -1.442695, %v1349_v15 }
 0x4d1   :  { %4484 = vpow2.f32 %v3783_v6 }
 0x4d2   :  { %4486 = vpow2.f32 %v3781_v18 }
 0x4d3   :  { %4488 = vtanh.f32 %v1347_v40 }
 0x4d8   :  { %v4479_v24 = vpop.eup %4478 }
 0x4d9   :  { %v1370_v27 = vadd.f32 1.0, %v4479_v24 }
 0x4da   :  { %v4481_v34 = vpop.eup %4480 }
 0x4db   :  { %4490 = vrcp.f32 %v1370_v27  ;;  %v1371_v51 = vadd.f32 1.0, %v4481_v34 }
 0x4dc   :  { %v4483_v43 = vpop.eup %4482  ;;  %4492 = vpow2.f32 %v3784_v31 }
 0x4dd   :  { %4494 = vrcp.f32 %v1371_v51  ;;  %v1373_v26 = vadd.f32 1.0, %v4483_v43 }
 0x4de   :  { %v4485_v42 = vpop.eup %4484  ;;  %4496 = vtanh.f32 %v1351_v1 }
 0x4df   :  { %4498 = vrcp.f32 %v1373_v26  ;;  %v1374_v32 = vadd.f32 1.0, %v4485_v42  ;;  %v4487_v44 = vpop.eup %4486  ;;  %v5993_v42 = vld [vmem:[#allocation36_spill] sm:$0xff] }
 0x4e0   :  { %v4489_v55 = vpop.eup %4488  ;;  %v1372_v25 = vadd.f32 1.0, %v4487_v44 }
 0x4e1   :  { %4500 = vrcp.f32 %v1374_v32 }
 0x4e2   :  { %4502 = vrcp.f32 %v1372_v25 }
 0x4e8   :  { %v4491_v7 = vpop.eup %4490 }
 0x4e9   :  { %v4493_v22 = vpop.eup %4492  ;;  %v1392_v0 = vmul.f32 %v4491_v7, %v4489_v55  ;;  %v5994_v7 = vld [vmem:[#allocation38_spill] sm:$0xff] }
 0x4ea   :  { %v4495_v20 = vpop.eup %4494  ;;  %v1375_v28 = vadd.f32 1.0, %v4493_v22 }
 0x4eb   :  { %v4497_v2 = vpop.eup %4496  ;;  %v1390_v15 = vmul.f32 %v4495_v20, %v5496_v39 }
 0x4ec   :  { %v4499_v6 = vpop.eup %4498 }
 0x4ed   :  { %v5606_v57 = vadd.f32 %v1392_v0, %v1390_v15  ;;  %v1393_v5 = vmul.f32 %v4499_v6, %v4497_v2  ;;  %v5995_v15 = vld [vmem:[#allocation40_spill] sm:$0xff] }
 0x4ee   :  { %v4501_v19 = vpop.eup %4500 }
 0x4ef   :  { %v1391_v18 = vmul.f32 %v4501_v19, %v5500_v29  ;;  %4504 = vtanh.f32 %v5606_v57  ;;  %v4503_v40 = vpop.eup %4502 }
 0x4f0   :  { %4506 = vrcp.f32 %v1375_v28 }
 0x4f1   :  { %v5610_v21 = vadd.f32 %v1393_v5, %v1391_v18  ;;  %v5996_v5 = vld [vmem:[#allocation35_spill] sm:$0xff] }
 0x4f2   :  { %v5997_v18 = vld [vmem:[#allocation39_spill] sm:$0xff] }
 0x4f3   :  { %4508 = vtanh.f32 %v5610_v21 }
 0x4fc   :  { %v4505_v52 = vpop.eup %4504 }
 0x4fd   :  { %v4507_v39 = vpop.eup %4506  ;;  %v1398_v31 = vmul.f32 %v4505_v52, %v4503_v40 }
 0x500   :  { %v4509_v24 = vpop.eup %4508 }
 0x501   :  { %v1399_v27 = vmul.f32 %v4509_v24, %v4507_v39  ;;  %v5998_v39 = vld [vmem:[#allocation37_spill] sm:$0xff] }
 0x503   :  { %v1408_v34 = vpack.c.bf16 %v1399_v27, %v1398_v31 }
 0x505   :  { %1442 = vmatmul.mubr.bf16.vlgmr.msra.gmra.mxu0 %v1408_v34  ;;  %1485 = vmatmul.mubr.bf16.vlgmr.msra.gmra.mxu1 %v1408_v34 }
 0x506   :  { %1561 = vmatpush1.bf16.msra.mxu0 %v5503_v33  ;;  %1604 = vmatpush1.bf16.msra.mxu1 %v5506_v30 }
 0x507   :  { %1562 = vmatprep.subr.bf16.mxu0 %v5509_v35  ;;  %1605 = vmatprep.subr.bf16.mxu1 %v5512_v36 }
 0x508   :  { %1592 = vmatprep.mubr.bf16.mxu0 %v5974_v56  ;;  %1635 = vmatprep.mubr.bf16.mxu1 %v5974_v56 }
 0x50a   :  { %1563 = vmatpush1.bf16.msra.mxu0 %v5517_v37  ;;  %1606 = vmatpush1.bf16.msra.mxu1 %v5520_v38 }
 0x50b   :  { %1564 = vmatprep.subr.bf16.mxu0 %v5523_v41  ;;  %1607 = vmatprep.subr.bf16.mxu1 %v5526_v45 }
 0x50e   :  { %1565 = vmatpush1.bf16.msra.mxu0 %v5529_v46  ;;  %1608 = vmatpush1.bf16.msra.mxu1 %v5532_v47 }
 0x50f   :  { %1566 = vmatprep.subr.bf16.mxu0 %v5535_v48  ;;  %1609 = vmatprep.subr.bf16.mxu1 %v5538_v49 }
 0x512   :  { %1567 = vmatpush1.bf16.msra.mxu0 %v5541_v50  ;;  %1610 = vmatpush1.bf16.msra.mxu1 %v5544_v53 }
 0x513   :  { %1568 = vmatprep.subr.bf16.mxu0 %v5547_v54  ;;  %1611 = vmatprep.subr.bf16.mxu1 %v5550_v58 }
 0x516   :  { %1569 = vmatpush1.bf16.msra.mxu0 %v5553_v59  ;;  %1612 = vmatpush1.bf16.msra.mxu1 %v5556_v60 }
 0x517   :  { %1570 = vmatprep.subr.bf16.mxu0 %v5559_v61  ;;  %1613 = vmatprep.subr.bf16.mxu1 %v5562_v62 }
 0x51a   :  { %1571 = vmatpush1.bf16.msra.mxu0 %v5565_v63  ;;  %1614 = vmatpush1.bf16.msra.mxu1 %v5568_v3 }
 0x51b   :  { %1572 = vmatprep.subr.bf16.mxu0 %v5571_v4  ;;  %1615 = vmatprep.subr.bf16.mxu1 %v5574_v8 }
 0x51e   :  { %1573 = vmatpush1.bf16.msra.mxu0 %v5577_v9  ;;  %1616 = vmatpush1.bf16.msra.mxu1 %v5580_v10 }
 0x51f   :  { %1574 = vmatprep.subr.bf16.mxu0 %v5583_v11  ;;  %1617 = vmatprep.subr.bf16.mxu1 %v5586_v13 }
 0x522   :  { %1575 = vmatpush1.bf16.msra.mxu0 %v5589_v14  ;;  %1618 = vmatpush1.bf16.msra.mxu1 %v5592_v17 }
 0x523   :  { %1711 = vmatprep.subr.bf16.mxu0 %v5431_v23  ;;  %1754 = vmatprep.subr.bf16.mxu1 %v5434_v16 }
 0x5c5   :  { %v1443_v29 = vpop.f32.mrf.mxu0  ;;  %v1486_v26 = vpop.f32.mrf.mxu1 }
 0x5c6   :  { %v1495_v1 = vadd.f32 %v1443_v29, %v5992_v12  ;;  %v1497_v19 = vadd.f32 %v1486_v26, %v5996_v5 }
 0x5c7   :  { %v1445_v51 = vpop.f32.mrf.mxu0  ;;  %v1488_v20 = vpop.f32.mrf.mxu1 }
 0x5c8   :  { %v3785_v43 = vmul.f32 -1.442695, %v1495_v1  ;;  %v1496_v32 = vadd.f32 %v1445_v51, %v5993_v42  ;;  %v3787_v52 = vmul.f32 -1.442695, %v1497_v19  ;;  %v1498_v24 = vadd.f32 %v1488_v20, %v5998_v39  ;;  %v5999_v1 = vld [vmem:[#allocation41_spill] sm:$0xff] }
 0x5c9   :  { %v1447_v44 = vpop.f32.mrf.mxu0  ;;  %v1490_v28 = vpop.f32.mrf.mxu1 }
 0x5ca   :  { %4510 = vpow2.f32 %v3785_v43  ;;  %v3786_v55 = vmul.f32 -1.442695, %v1496_v32  ;;  %v1499_v22 = vadd.f32 %v1447_v44, %v5994_v7  ;;  %v1501_v40 = vadd.f32 %v1490_v28, %v5997_v18 }
 0x5cb   :  { %v1449_v0 = vpop.f32.mrf.mxu0  ;;  %v1492_v31 = vpop.f32.mrf.mxu1 }
 0x5cc   :  { %4512 = vpow2.f32 %v3786_v55  ;;  %v3788_v2 = vmul.f32 -1.442695, %v1499_v22  ;;  %v1500_v6 = vadd.f32 %v1449_v0, %v5995_v15  ;;  %v3790_v34 = vmul.f32 -1.442695, %v1501_v40 }
 0x5cd   :  { %v1502_v51 = vadd.f32 %v1492_v31, %v5999_v1  ;;  %v6000_v1 = vld [vmem:[#allocation42_spill] sm:$0xff] }
 0x5ce   :  { %4514 = vpow2.f32 %v3788_v2  ;;  %v3789_v25 = vmul.f32 -1.442695, %v1500_v6 }
 0x5d0   :  { %4516 = vpow2.f32 %v3789_v25 }
 0x5d1   :  { %4518 = vpow2.f32 %v3787_v52 }
 0x5d2   :  { %4520 = vtanh.f32 %v1498_v24 }
 0x5d7   :  { %v4511_v27 = vpop.eup %4510 }
 0x5d8   :  { %v1521_v29 = vadd.f32 1.0, %v4511_v27 }
 0x5d9   :  { %v4513_v12 = vpop.eup %4512 }
 0x5da   :  { %4522 = vrcp.f32 %v1521_v29  ;;  %v1522_v43 = vadd.f32 1.0, %v4513_v12 }
 0x5db   :  { %v4515_v42 = vpop.eup %4514  ;;  %4524 = vpow2.f32 %v3790_v34 }
 0x5dc   :  { %4526 = vrcp.f32 %v1522_v43  ;;  %v1524_v26 = vadd.f32 1.0, %v4515_v42 }
 0x5dd   :  { %v4517_v32 = vpop.eup %4516  ;;  %4528 = vtanh.f32 %v1502_v51 }
 0x5de   :  { %4530 = vrcp.f32 %v1524_v26  ;;  %v1525_v44 = vadd.f32 1.0, %v4517_v32  ;;  %v4519_v55 = vpop.eup %4518  ;;  %v6001_v32 = vld [vmem:[#allocation44_spill] sm:$0xff] }
 0x5df   :  { %v4521_v7 = vpop.eup %4520  ;;  %v1523_v5 = vadd.f32 1.0, %v4519_v55 }
 0x5e0   :  { %4532 = vrcp.f32 %v1525_v44 }
 0x5e1   :  { %4534 = vrcp.f32 %v1523_v5 }
 0x5e7   :  { %v4523_v22 = vpop.eup %4522 }
 0x5e8   :  { %v4525_v0 = vpop.eup %4524  ;;  %v1543_v20 = vmul.f32 %v4523_v22, %v4521_v7  ;;  %v6002_v22 = vld [vmem:[#allocation46_spill] sm:$0xff] }
 0x5e9   :  { %v4527_v2 = vpop.eup %4526  ;;  %v1526_v40 = vadd.f32 1.0, %v4525_v0 }
 0x5ea   :  { %v4529_v15 = vpop.eup %4528  ;;  %v1541_v6 = vmul.f32 %v4527_v2, %v5606_v57 }
 0x5eb   :  { %v4531_v25 = vpop.eup %4530 }
 0x5ec   :  { %v5656_v19 = vadd.f32 %v1543_v20, %v1541_v6  ;;  %v1544_v28 = vmul.f32 %v4531_v25, %v4529_v15  ;;  %v6004_v25 = vld [vmem:[#allocation43_spill] sm:$0xff] }
 0x5ed   :  { %v4533_v18 = vpop.eup %4532 }
 0x5ee   :  { %v1542_v52 = vmul.f32 %v4533_v18, %v5610_v21  ;;  %4536 = vtanh.f32 %v5656_v19  ;;  %v4535_v24 = vpop.eup %4534  ;;  %v6005_v18 = vld [vmem:[#allocation47_spill] sm:$0xff] }
 0x5ef   :  { %4538 = vrcp.f32 %v1526_v40 }
 0x5f0   :  { %v5660_v39 = vadd.f32 %v1544_v28, %v1542_v52 }
 0x5f2   :  { %4540 = vtanh.f32 %v5660_v39 }
 0x5fb   :  { %v4537_v31 = vpop.eup %4536 }
 0x5fc   :  { %v4539_v57 = vpop.eup %4538  ;;  %v1549_v34 = vmul.f32 %v4537_v31, %v4535_v24  ;;  %v6006_v24 = vld [vmem:[#allocation45_spill] sm:$0xff] }
 0x5ff   :  { %v4541_v27 = vpop.eup %4540 }
 0x600   :  { %v1550_v29 = vmul.f32 %v4541_v27, %v4539_v57 }
 0x602   :  { %v1559_v12 = vpack.c.bf16 %v1550_v29, %v1549_v34 }
 0x604   :  { %1593 = vmatmul.mubr.bf16.vlgmr.msra.gmra.mxu0 %v1559_v12  ;;  %1636 = vmatmul.mubr.bf16.vlgmr.msra.gmra.mxu1 %v1559_v12 }
 0x605   :  { %1712 = vmatpush1.bf16.msra.mxu0 %v5503_v33  ;;  %1755 = vmatpush1.bf16.msra.mxu1 %v5506_v30 }
 0x606   :  { %1713 = vmatprep.subr.bf16.mxu0 %v5509_v35  ;;  %1756 = vmatprep.subr.bf16.mxu1 %v5512_v36 }
 0x607   :  { %1743 = vmatprep.mubr.bf16.mxu0 %v5974_v56  ;;  %1786 = vmatprep.mubr.bf16.mxu1 %v5974_v56 }
 0x609   :  { %1714 = vmatpush1.bf16.msra.mxu0 %v5517_v37  ;;  %1757 = vmatpush1.bf16.msra.mxu1 %v5520_v38 }
 0x60a   :  { %1715 = vmatprep.subr.bf16.mxu0 %v5523_v41  ;;  %1758 = vmatprep.subr.bf16.mxu1 %v5526_v45 }
 0x60d   :  { %1716 = vmatpush1.bf16.msra.mxu0 %v5529_v46  ;;  %1759 = vmatpush1.bf16.msra.mxu1 %v5532_v47 }
 0x60e   :  { %1717 = vmatprep.subr.bf16.mxu0 %v5535_v48  ;;  %1760 = vmatprep.subr.bf16.mxu1 %v5538_v49 }
 0x611   :  { %1718 = vmatpush1.bf16.msra.mxu0 %v5541_v50  ;;  %1761 = vmatpush1.bf16.msra.mxu1 %v5544_v53 }
 0x612   :  { %1719 = vmatprep.subr.bf16.mxu0 %v5547_v54  ;;  %1762 = vmatprep.subr.bf16.mxu1 %v5550_v58 }
 0x615   :  { %1720 = vmatpush1.bf16.msra.mxu0 %v5553_v59  ;;  %1763 = vmatpush1.bf16.msra.mxu1 %v5556_v60 }
 0x616   :  { %1721 = vmatprep.subr.bf16.mxu0 %v5559_v61  ;;  %1764 = vmatprep.subr.bf16.mxu1 %v5562_v62 }
 0x619   :  { %1722 = vmatpush1.bf16.msra.mxu0 %v5565_v63  ;;  %1765 = vmatpush1.bf16.msra.mxu1 %v5568_v3 }
 0x61a   :  { %1723 = vmatprep.subr.bf16.mxu0 %v5571_v4  ;;  %1766 = vmatprep.subr.bf16.mxu1 %v5574_v8 }
 0x61d   :  { %1724 = vmatpush1.bf16.msra.mxu0 %v5577_v9  ;;  %1767 = vmatpush1.bf16.msra.mxu1 %v5580_v10 }
 0x61e   :  { %1725 = vmatprep.subr.bf16.mxu0 %v5583_v11  ;;  %1768 = vmatprep.subr.bf16.mxu1 %v5586_v13 }
 0x621   :  { %1726 = vmatpush1.bf16.msra.mxu0 %v5589_v14  ;;  %1769 = vmatpush1.bf16.msra.mxu1 %v5592_v17 }
 0x622   :  { %1862 = vmatprep.subr.bf16.mxu0 %v5431_v23  ;;  %1905 = vmatprep.subr.bf16.mxu1 %v5434_v16  ;;  %v6003_v23 = vld [vmem:[#allocation48_spill] sm:$0xff] }
 0x6c4   :  { %v1594_v21 = vpop.f32.mrf.mxu0  ;;  %v1637_v26 = vpop.f32.mrf.mxu1 }
 0x6c5   :  { %v1646_v51 = vadd.f32 %v1594_v21, %v6000_v1  ;;  %v1648_v5 = vadd.f32 %v1637_v26, %v6004_v25  ;;  %v6007_v21 = vld [vmem:[#allocation49_spill] sm:$0xff] }
 0x6c6   :  { %v1596_v43 = vpop.f32.mrf.mxu0  ;;  %v1639_v2 = vpop.f32.mrf.mxu1 }
 0x6c7   :  { %v3791_v42 = vmul.f32 -1.442695, %v1646_v51  ;;  %v1647_v44 = vadd.f32 %v1596_v43, %v6001_v32  ;;  %v3793_v52 = vmul.f32 -1.442695, %v1648_v5  ;;  %v1649_v31 = vadd.f32 %v1639_v2, %v6006_v24 }
 0x6c8   :  { %v1598_v55 = vpop.f32.mrf.mxu0  ;;  %v1641_v28 = vpop.f32.mrf.mxu1 }
 0x6c9   :  { %4542 = vpow2.f32 %v3791_v42  ;;  %v3792_v7 = vmul.f32 -1.442695, %v1647_v44  ;;  %v1650_v0 = vadd.f32 %v1598_v55, %v6002_v22  ;;  %v1652_v40 = vadd.f32 %v1641_v28, %v6005_v18 }
 0x6ca   :  { %v1600_v20 = vpop.f32.mrf.mxu0  ;;  %v1643_v57 = vpop.f32.mrf.mxu1 }
 0x6cb   :  { %4544 = vpow2.f32 %v3792_v7  ;;  %v3794_v15 = vmul.f32 -1.442695, %v1650_v0  ;;  %v1651_v6 = vadd.f32 %v1600_v20, %v6003_v23  ;;  %v3796_v34 = vmul.f32 -1.442695, %v1652_v40 }
 0x6cc   :  { %v1653_v1 = vadd.f32 %v1643_v57, %v6007_v21  ;;  %v6015_v21 = vld [vmem:[#allocation57_spill] sm:$0xff] }
 0x6cd   :  { %4546 = vpow2.f32 %v3794_v15  ;;  %v3795_v16 = vmul.f32 -1.442695, %v1651_v6 }
 0x6cf   :  { %4548 = vpow2.f32 %v3795_v16 }
 0x6d0   :  { %4550 = vpow2.f32 %v3793_v52 }
 0x6d1   :  { %4552 = vtanh.f32 %v1649_v31 }
 0x6d6   :  { %v4543_v27 = vpop.eup %4542 }
 0x6d7   :  { %v1672_v29 = vadd.f32 1.0, %v4543_v27 }
 0x6d8   :  { %v4545_v12 = vpop.eup %4544 }
 0x6d9   :  { %4554 = vrcp.f32 %v1672_v29  ;;  %v1673_v51 = vadd.f32 1.0, %v4545_v12 }
 0x6da   :  { %v4547_v43 = vpop.eup %4546  ;;  %4556 = vpow2.f32 %v3796_v34 }
 0x6db   :  { %4558 = vrcp.f32 %v1673_v51  ;;  %v1675_v42 = vadd.f32 1.0, %v4547_v43 }
 0x6dc   :  { %v4549_v26 = vpop.eup %4548  ;;  %4560 = vtanh.f32 %v1653_v1 }
 0x6dd   :  { %4562 = vrcp.f32 %v1675_v42  ;;  %v1676_v32 = vadd.f32 1.0, %v4549_v26  ;;  %v4551_v44 = vpop.eup %4550 }
 0x6de   :  { %v4553_v55 = vpop.eup %4552  ;;  %v1674_v6 = vadd.f32 1.0, %v4551_v44 }
 0x6df   :  { %4564 = vrcp.f32 %v1676_v32 }
 0x6e0   :  { %4566 = vrcp.f32 %v1674_v6 }
 0x6e6   :  { %v4555_v7 = vpop.eup %4554 }
 0x6e7   :  { %v4557_v22 = vpop.eup %4556  ;;  %v1694_v0 = vmul.f32 %v4555_v7, %v4553_v55 }
 0x6e8   :  { %v4559_v20 = vpop.eup %4558  ;;  %v1677_v28 = vadd.f32 1.0, %v4557_v22 }
 0x6e9   :  { %v4561_v2 = vpop.eup %4560  ;;  %v1692_v15 = vmul.f32 %v4559_v20, %v5656_v19 }
 0x6ea   :  { %v4563_v23 = vpop.eup %4562 }
 0x6eb   :  { %v5706_v16 = vadd.f32 %v1694_v0, %v1692_v15  ;;  %v1695_v25 = vmul.f32 %v4563_v23, %v4561_v2 }
 0x6ec   :  { %v4565_v5 = vpop.eup %4564 }
 0x6ed   :  { %v1693_v18 = vmul.f32 %v4565_v5, %v5660_v39  ;;  %4568 = vtanh.f32 %v5706_v16  ;;  %v4567_v52 = vpop.eup %4566 }
 0x6ee   :  { %4570 = vrcp.f32 %v1677_v28 }
 0x6ef   :  { %v5710_v40 = vadd.f32 %v1695_v25, %v1693_v18 }
 0x6f1   :  { %4572 = vtanh.f32 %v5710_v40 }
 0x6fa   :  { %v4569_v24 = vpop.eup %4568 }
 0x6fb   :  { %v4571_v19 = vpop.eup %4570  ;;  %v1700_v57 = vmul.f32 %v4569_v24, %v4567_v52 }
 0x6fe   :  { %v4573_v31 = vpop.eup %4572 }
 0x6ff   :  { %v1701_v27 = vmul.f32 %v4573_v31, %v4571_v19 }
 0x701   :  { %v1710_v34 = vpack.c.bf16 %v1701_v27, %v1700_v57 }
 0x703   :  { %1744 = vmatmul.mubr.bf16.vlgmr.msra.gmra.mxu0 %v1710_v34  ;;  %1787 = vmatmul.mubr.bf16.vlgmr.msra.gmra.mxu1 %v1710_v34 }
 0x704   :  { %1863 = vmatpush1.bf16.msra.mxu0 %v5503_v33  ;;  %1906 = vmatpush1.bf16.msra.mxu1 %v5506_v30  ;;  %v4118_v33 = vld [vmem:[#allocation7 + $0xe4] ss:$16 sps:$4 sm:$0xff]   ;;  %v4121_v30 = vld [vmem:[#allocation7 + $0xec] ss:$16 sps:$4 sm:$0xff]  }
 0x705   :  { %1864 = vmatprep.subr.bf16.mxu0 %v5509_v35  ;;  %1907 = vmatprep.subr.bf16.mxu1 %v5512_v36  ;;  %v6008_v36 = vld [vmem:[#allocation50_spill] sm:$0xff] }
 0x706   :  { %1894 = vmatprep.mubr.bf16.mxu0 %v5974_v56  ;;  %1937 = vmatprep.mubr.bf16.mxu1 %v5974_v56 }
 0x708   :  { %1865 = vmatpush1.bf16.msra.mxu0 %v5517_v37  ;;  %1908 = vmatpush1.bf16.msra.mxu1 %v5520_v38 }
 0x709   :  { %1866 = vmatprep.subr.bf16.mxu0 %v5523_v41  ;;  %1909 = vmatprep.subr.bf16.mxu1 %v5526_v45 }
 0x70c   :  { %1867 = vmatpush1.bf16.msra.mxu0 %v5529_v46  ;;  %1910 = vmatpush1.bf16.msra.mxu1 %v5532_v47  ;;  %v6009_v46 = vld [vmem:[#allocation52_spill] sm:$0xff] }
 0x70d   :  { %1868 = vmatprep.subr.bf16.mxu0 %v5535_v48  ;;  %1911 = vmatprep.subr.bf16.mxu1 %v5538_v49 }
 0x710   :  { %1869 = vmatpush1.bf16.msra.mxu0 %v5541_v50  ;;  %1912 = vmatpush1.bf16.msra.mxu1 %v5544_v53  ;;  %v6010_v50 = vld [vmem:[#allocation54_spill] sm:$0xff] }
 0x711   :  { %1870 = vmatprep.subr.bf16.mxu0 %v5547_v54  ;;  %1913 = vmatprep.subr.bf16.mxu1 %v5550_v58 }
 0x714   :  { %1871 = vmatpush1.bf16.msra.mxu0 %v5553_v59  ;;  %1914 = vmatpush1.bf16.msra.mxu1 %v5556_v60  ;;  %v6011_v60 = vld [vmem:[#allocation56_spill] sm:$0xff] }
 0x715   :  { %1872 = vmatprep.subr.bf16.mxu0 %v5559_v61  ;;  %1915 = vmatprep.subr.bf16.mxu1 %v5562_v62 }
 0x718   :  { %1873 = vmatpush1.bf16.msra.mxu0 %v5565_v63  ;;  %1916 = vmatpush1.bf16.msra.mxu1 %v5568_v3  ;;  %v6012_v63 = vld [vmem:[#allocation51_spill] sm:$0xff] }
 0x719   :  { %1874 = vmatprep.subr.bf16.mxu0 %v5571_v4  ;;  %1917 = vmatprep.subr.bf16.mxu1 %v5574_v8  ;;  %v6013_v8 = vld [vmem:[#allocation55_spill] sm:$0xff] }
 0x71c   :  { %1875 = vmatpush1.bf16.msra.mxu0 %v5577_v9  ;;  %1918 = vmatpush1.bf16.msra.mxu1 %v5580_v10 }
 0x71d   :  { %1876 = vmatprep.subr.bf16.mxu0 %v5583_v11  ;;  %1919 = vmatprep.subr.bf16.mxu1 %v5586_v13  ;;  %v6014_v11 = vld [vmem:[#allocation53_spill] sm:$0xff] }
 0x720   :  { %1877 = vmatpush1.bf16.msra.mxu0 %v5589_v14  ;;  %1920 = vmatpush1.bf16.msra.mxu1 %v5592_v17 }
 0x721   :  { %2238 = vmatprep.subr.bf16.mxu0 %v4118_v33  ;;  %2281 = vmatprep.subr.bf16.mxu1 %v4121_v30  ;;  %v4116_v33 = vld [vmem:[#allocation7 + $0xe0] ss:$16 sps:$4 sm:$0xff]   ;;  %v4119_v30 = vld [vmem:[#allocation7 + $0xe8] ss:$16 sps:$4 sm:$0xff]  }
 0x7c3   :  { %v1745_v35 = vpop.f32.mrf.mxu0  ;;  %v1788_v45 = vpop.f32.mrf.mxu1 }
 0x7c4   :  { %v1797_v37 = vadd.f32 %v1745_v35, %v6008_v36  ;;  %v1799_v3 = vadd.f32 %v1788_v45, %v6012_v63  ;;  %v4124_v36 = vld [vmem:[#allocation7 + $0xc4] ss:$16 sps:$4 sm:$0xff]   ;;  %v4133_v45 = vld [vmem:[#allocation7 + $0xac] ss:$16 sps:$4 sm:$0xff]   ;;  %v4146_v63 = vld [vmem:[#allocation7 + $0x40] ss:$16 sps:$4 sm:$0xff]  }
 0x7c5   :  { %v1747_v38 = vpop.f32.mrf.mxu0  ;;  %v1790_v58 = vpop.f32.mrf.mxu1 }
 0x7c6   :  { %v3797_v41 = vmul.f32 -1.442695, %v1797_v37  ;;  %v1798_v47 = vadd.f32 %v1747_v38, %v6009_v46  ;;  %v3799_v10 = vmul.f32 -1.442695, %v1799_v3  ;;  %v1800_v13 = vadd.f32 %v1790_v58, %v6014_v11  ;;  %v4127_v37 = vld [vmem:[#allocation7 + $0xcc] ss:$16 sps:$4 sm:$0xff]  }
 0x7c7   :  { %v1749_v48 = vpop.f32.mrf.mxu0  ;;  %v1792_v4 = vpop.f32.mrf.mxu1  ;;  %v4125_v38 = vld [vmem:[#allocation7 + $0xc8] ss:$16 sps:$4 sm:$0xff]   ;;  %v4128_v46 = vld [vmem:[#allocation7 + $0xa0] ss:$16 sps:$4 sm:$0xff]   ;;  %v4145_v58 = vld [vmem:[#allocation7 + $0x6c] ss:$16 sps:$4 sm:$0xff]  }
 0x7c8   :  { %4574 = vpow2.f32 %v3797_v41  ;;  %v3798_v49 = vmul.f32 -1.442695, %v1798_v47  ;;  %v1801_v53 = vadd.f32 %v1749_v48, %v6010_v50  ;;  %v1803_v9 = vadd.f32 %v1792_v4, %v6013_v8  ;;  %v4130_v41 = vld [vmem:[#allocation7 + $0xa4] ss:$16 sps:$4 sm:$0xff]   ;;  %v4131_v47 = vld [vmem:[#allocation7 + $0xa8] ss:$16 sps:$4 sm:$0xff]  }
 0x7c9   :  { %v1751_v54 = vpop.f32.mrf.mxu0  ;;  %v1794_v14 = vpop.f32.mrf.mxu1  ;;  %v4136_v48 = vld [vmem:[#allocation7 + $0x84] ss:$16 sps:$4 sm:$0xff]   ;;  %v4134_v50 = vld [vmem:[#allocation7 + $0x80] ss:$16 sps:$4 sm:$0xff]   ;;  %v4149_v3 = vld [vmem:[#allocation7 + $0x48] ss:$16 sps:$4 sm:$0xff]  }
 0x7ca   :  { %4576 = vpow2.f32 %v3798_v49  ;;  %v3800_v59 = vmul.f32 -1.442695, %v1801_v53  ;;  %v1802_v61 = vadd.f32 %v1751_v54, %v6011_v60  ;;  %v3802_v39 = vmul.f32 -1.442695, %v1803_v9  ;;  %v4139_v49 = vld [vmem:[#allocation7 + $0x8c] ss:$16 sps:$4 sm:$0xff]  }
 0x7cb   :  { %v1804_v1 = vadd.f32 %v1794_v14, %v6015_v21  ;;  %v4137_v53 = vld [vmem:[#allocation7 + $0x88] ss:$16 sps:$4 sm:$0xff]   ;;  %v4142_v54 = vld [vmem:[#allocation7 + $0x64] ss:$16 sps:$4 sm:$0xff]   ;;  %v4157_v8 = vld [vmem:[#allocation7 + $0x2c] ss:$16 sps:$4 sm:$0xff]  }
 0x7cc   :  { %4578 = vpow2.f32 %v3800_v59  ;;  %v3801_v62 = vmul.f32 -1.442695, %v1802_v61  ;;  %v4140_v59 = vld [vmem:[#allocation7 + $0x60] ss:$16 sps:$4 sm:$0xff]   ;;  %v4143_v60 = vld [vmem:[#allocation7 + $0x68] ss:$16 sps:$4 sm:$0xff]  }
 0x7cd   :  { %v4148_v61 = vld [vmem:[#allocation7 + $0x44] ss:$16 sps:$4 sm:$0xff]   ;;  %v4152_v9 = vld [vmem:[#allocation7 + $0x20] ss:$16 sps:$4 sm:$0xff]  }
 0x7ce   :  { %4580 = vpow2.f32 %v3801_v62  ;;  %v4151_v62 = vld [vmem:[#allocation7 + $0x4c] ss:$16 sps:$4 sm:$0xff]   ;;  %v4154_v4 = vld [vmem:[#allocation7 + $0x24] ss:$16 sps:$4 sm:$0xff]   ;;  %v4158_v14 = vld [vmem:[#allocation7] ss:$16 sps:$4 sm:$0xff]  }
 0x7cf   :  { %4582 = vpow2.f32 %v3799_v10  ;;  %v4155_v10 = vld [vmem:[#allocation7 + $0x28] ss:$16 sps:$4 sm:$0xff]   ;;  %v4160_v11 = vld [vmem:[#allocation7 + $0x4] ss:$16 sps:$4 sm:$0xff]   ;;  %v4164_v21 = vld [vmem:[#allocation5 + $0xe0] ss:$16 sps:$4 sm:$0xff]  }
 0x7d0   :  { %4584 = vtanh.f32 %v1800_v13  ;;  %v4163_v13 = vld [vmem:[#allocation7 + $0xc] ss:$16 sps:$4 sm:$0xff]  }
 0x7d5   :  { %v4575_v17 = vpop.eup %4574 }
 0x7d6   :  { %v1823_v29 = vadd.f32 1.0, %v4575_v17  ;;  %v4161_v17 = vld [vmem:[#allocation7 + $0x8] ss:$16 sps:$4 sm:$0xff]  }
 0x7d7   :  { %v4577_v12 = vpop.eup %4576 }
 0x7d8   :  { %4586 = vrcp.f32 %v1823_v29  ;;  %v1824_v51 = vadd.f32 1.0, %v4577_v12  ;;  %v4170_v29 = vld [vmem:[#allocation5 + $0xec] ss:$16 sps:$4 sm:$0xff]   ;;  %v4167_v12 = vld [vmem:[%s5892_s2] sm:$0xff]  }
 0x7d9   :  { %v4579_v43 = vpop.eup %4578  ;;  %4588 = vpow2.f32 %v3802_v39  ;;  %v4166_v39 = vld [vmem:[#allocation5 + $0xe4] ss:$16 sps:$4 sm:$0xff]  }
 0x7da   :  { %4590 = vrcp.f32 %v1824_v51  ;;  %v1826_v42 = vadd.f32 1.0, %v4579_v43  ;;  %v4173_v51 = vld [vmem:[#allocation5 + $0xc4] ss:$16 sps:$4 sm:$0xff]   ;;  %v4176_v43 = vld [vmem:[#allocation5 + $0xcc] ss:$16 sps:$4 sm:$0xff]  }
 0x7db   :  { %v4581_v26 = vpop.eup %4580  ;;  %4592 = vtanh.f32 %v1804_v1  ;;  %v4168_v1 = vld [vmem:[#allocation5 + $0xe8] ss:$16 sps:$4 sm:$0xff]  }
 0x7dc   :  { %4594 = vrcp.f32 %v1826_v42  ;;  %v1827_v32 = vadd.f32 1.0, %v4581_v26  ;;  %v4583_v44 = vpop.eup %4582  ;;  %v4171_v42 = vld [vmem:[#allocation5 + $0xc0] ss:$16 sps:$4 sm:$0xff]   ;;  %v4174_v26 = vld [vmem:[#allocation5 + $0xc8] ss:$16 sps:$4 sm:$0xff]  }
 0x7dd   :  { %v4585_v55 = vpop.eup %4584  ;;  %v1825_v6 = vadd.f32 1.0, %v4583_v44  ;;  %v4182_v44 = vld [vmem:[#allocation5 + $0xac] ss:$16 sps:$4 sm:$0xff]  }
 0x7de   :  { %4596 = vrcp.f32 %v1827_v32  ;;  %v4179_v32 = vld [vmem:[#allocation5 + $0xa4] ss:$16 sps:$4 sm:$0xff]  }
 0x7df   :  { %4598 = vrcp.f32 %v1825_v6  ;;  %v4189_v6 = vld [vmem:[#allocation5 + $0x60] ss:$16 sps:$4 sm:$0xff]  }
 0x7e5   :  { %v4587_v7 = vpop.eup %4586 }
 0x7e6   :  { %v4589_v22 = vpop.eup %4588  ;;  %v1845_v0 = vmul.f32 %v4587_v7, %v4585_v55  ;;  %v4177_v55 = vld [vmem:[#allocation5 + $0xa0] ss:$16 sps:$4 sm:$0xff]   ;;  %v4180_v7 = vld [vmem:[#allocation5 + $0xa8] ss:$16 sps:$4 sm:$0xff]  }
 0x7e7   :  { %v4591_v20 = vpop.eup %4590  ;;  %v1828_v18 = vadd.f32 1.0, %v4589_v22  ;;  %v4185_v22 = vld [vmem:[#allocation5 + $0x84] ss:$16 sps:$4 sm:$0xff]  }
 0x7e8   :  { %v4593_v2 = vpop.eup %4592  ;;  %v1843_v15 = vmul.f32 %v4591_v20, %v5706_v16  ;;  %v4183_v20 = vld [vmem:[#allocation5 + $0x80] ss:$16 sps:$4 sm:$0xff]  }
 0x7e9   :  { %v4595_v23 = vpop.eup %4594 }
 0x7ea   :  { %v5754_v25 = vadd.f32 %v1845_v0, %v1843_v15  ;;  %v1846_v5 = vmul.f32 %v4595_v23, %v4593_v2  ;;  %v4188_v0 = vld [vmem:[#allocation5 + $0x8c] ss:$16 sps:$4 sm:$0xff]   ;;  %v4186_v2 = vld [vmem:[#allocation5 + $0x88] ss:$16 sps:$4 sm:$0xff]   ;;  %v4191_v15 = vld [vmem:[#allocation5 + $0x64] ss:$16 sps:$4 sm:$0xff]  }
 0x7eb   :  { %v4597_v28 = vpop.eup %4596  ;;  %v4194_v23 = vld [vmem:[#allocation5 + $0x6c] ss:$16 sps:$4 sm:$0xff]  }
 0x7ec   :  { %v1844_v52 = vmul.f32 %v4597_v28, %v5710_v40  ;;  %4600 = vtanh.f32 %v5754_v25  ;;  %v4599_v19 = vpop.eup %4598  ;;  %v4122_v40 = vld [vmem:[#allocation7 + $0xc0] ss:$16 sps:$4 sm:$0xff]   ;;  %v4197_v28 = vld [vmem:[#allocation5 + $0x44] ss:$16 sps:$4 sm:$0xff]  }
 0x7ed   :  { %4602 = vrcp.f32 %v1828_v18  ;;  %v4200_v18 = vld [vmem:[#allocation5 + $0x4c] ss:$16 sps:$4 sm:$0xff]  }
 0x7ee   :  { %v5758_v24 = vadd.f32 %v1846_v5, %v1844_v52  ;;  %v4192_v5 = vld [vmem:[#allocation5 + $0x68] ss:$16 sps:$4 sm:$0xff]   ;;  %v4195_v52 = vld [vmem:[#allocation5 + $0x40] ss:$16 sps:$4 sm:$0xff]  }
 0x7f0   :  { %4604 = vtanh.f32 %v5758_v24 }
 0x7f9   :  { %v4601_v31 = vpop.eup %4600 }
 0x7fa   :  { %v4603_v16 = vpop.eup %4602  ;;  %v1851_v27 = vmul.f32 %v4601_v31, %v4599_v19  ;;  %v4198_v19 = vld [vmem:[#allocation5 + $0x48] ss:$16 sps:$4 sm:$0xff]   ;;  %v4203_v31 = vld [vmem:[#allocation5 + $0x24] ss:$16 sps:$4 sm:$0xff]  }
 0x7fd   :  { %v4605_v57 = vpop.eup %4604 }
 0x7fe   :  { %v1852_v34 = vmul.f32 %v4605_v57, %v4603_v16  ;;  %v4206_v16 = vld [vmem:[#allocation5 + $0x2c] ss:$16 sps:$4 sm:$0xff]   ;;  %v4201_v57 = vld [vmem:[#allocation5 + $0x20] ss:$16 sps:$4 sm:$0xff]  }
 0x800   :  { %v1861_v35 = vpack.c.bf16 %v1852_v34, %v1851_v27  ;;  %v4204_v27 = vld [vmem:[#allocation5 + $0x28] ss:$16 sps:$4 sm:$0xff]   ;;  %v4209_v34 = vld [vmem:[#allocation5 + $0x4] ss:$16 sps:$4 sm:$0xff]  }
 0x802   :  { %1895 = vmatmul.mubr.bf16.vlgmr.msra.gmra.mxu0 %v1861_v35  ;;  %1938 = vmatmul.mubr.bf16.vlgmr.msra.gmra.mxu1 %v1861_v35  ;;  %v4210_v35 = vld [vmem:[#allocation5 + $0x8] ss:$16 sps:$4 sm:$0xff]  }
 0x803   :  { %2239 = vmatpush1.bf16.msra.mxu0 %v4116_v33  ;;  %2282 = vmatpush1.bf16.msra.mxu1 %v4119_v30  ;;  %v4212_v33 = vld [vmem:[#allocation5 + $0xc] ss:$16 sps:$4 sm:$0xff]   ;;  %v4207_v30 = vld [vmem:[#allocation5] ss:$16 sps:$4 sm:$0xff]  }
 0x804   :  { %2240 = vmatprep.subr.bf16.mxu0 %v4124_v36  ;;  %2283 = vmatprep.subr.bf16.mxu1 %v4127_v37  ;;  %v4213_v36 = vld [vmem:[%s5891_s1] sm:$0xff]  }
 0x805   :  { %2270 = vmatprep.mubr.bf16.mxu0 %v5974_v56  ;;  %2313 = vmatprep.mubr.bf16.mxu1 %v5974_v56  ;;  %v4216_v37 = vld [vmem:[#allocation8 + $0xe4] ss:$16 sps:$4 sm:$0xff]  }
 0x807   :  { %2241 = vmatpush1.bf16.msra.mxu0 %v4122_v40  ;;  %2284 = vmatpush1.bf16.msra.mxu1 %v4125_v38  ;;  %v4219_v40 = vld [vmem:[#allocation8 + $0xec] ss:$16 sps:$4 sm:$0xff]   ;;  %v4214_v38 = vld [vmem:[#allocation8 + $0xe0] ss:$16 sps:$4 sm:$0xff]  }
 0x808   :  { %2242 = vmatprep.subr.bf16.mxu0 %v4130_v41  ;;  %2285 = vmatprep.subr.bf16.mxu1 %v4133_v45  ;;  %v4217_v41 = vld [vmem:[#allocation8 + $0xe8] ss:$16 sps:$4 sm:$0xff]   ;;  %v4222_v45 = vld [vmem:[#allocation8 + $0xc4] ss:$16 sps:$4 sm:$0xff]  }
 0x80b   :  { %2243 = vmatpush1.bf16.msra.mxu0 %v4128_v46  ;;  %2286 = vmatpush1.bf16.msra.mxu1 %v4131_v47  ;;  %v4225_v46 = vld [vmem:[#allocation8 + $0xcc] ss:$16 sps:$4 sm:$0xff]   ;;  %v4220_v47 = vld [vmem:[#allocation8 + $0xc0] ss:$16 sps:$4 sm:$0xff]  }
 0x80c   :  { %2244 = vmatprep.subr.bf16.mxu0 %v4136_v48  ;;  %2287 = vmatprep.subr.bf16.mxu1 %v4139_v49  ;;  %v4223_v48 = vld [vmem:[#allocation8 + $0xc8] ss:$16 sps:$4 sm:$0xff]   ;;  %v4228_v49 = vld [vmem:[#allocation8 + $0xa4] ss:$16 sps:$4 sm:$0xff]  }
 0x80f   :  { %2245 = vmatpush1.bf16.msra.mxu0 %v4134_v50  ;;  %2288 = vmatpush1.bf16.msra.mxu1 %v4137_v53  ;;  %v4231_v50 = vld [vmem:[#allocation8 + $0xac] ss:$16 sps:$4 sm:$0xff]   ;;  %v4226_v53 = vld [vmem:[#allocation8 + $0xa0] ss:$16 sps:$4 sm:$0xff]  }
 0x810   :  { %2246 = vmatprep.subr.bf16.mxu0 %v4142_v54  ;;  %2289 = vmatprep.subr.bf16.mxu1 %v4145_v58  ;;  %v4234_v54 = vld [vmem:[#allocation8 + $0x84] ss:$16 sps:$4 sm:$0xff]   ;;  %v4237_v58 = vld [vmem:[#allocation8 + $0x8c] ss:$16 sps:$4 sm:$0xff]  }
 0x813   :  { %2247 = vmatpush1.bf16.msra.mxu0 %v4140_v59  ;;  %2290 = vmatpush1.bf16.msra.mxu1 %v4143_v60  ;;  %v4232_v59 = vld [vmem:[#allocation8 + $0x80] ss:$16 sps:$4 sm:$0xff]   ;;  %v4235_v60 = vld [vmem:[#allocation8 + $0x88] ss:$16 sps:$4 sm:$0xff]  }
 0x814   :  { %2248 = vmatprep.subr.bf16.mxu0 %v4148_v61  ;;  %2291 = vmatprep.subr.bf16.mxu1 %v4151_v62  ;;  %v4240_v61 = vld [vmem:[#allocation8 + $0x64] ss:$16 sps:$4 sm:$0xff]   ;;  %v4243_v62 = vld [vmem:[#allocation8 + $0x6c] ss:$16 sps:$4 sm:$0xff]  }
 0x817   :  { %2249 = vmatpush1.bf16.msra.mxu0 %v4146_v63  ;;  %2292 = vmatpush1.bf16.msra.mxu1 %v4149_v3  ;;  %v4238_v63 = vld [vmem:[#allocation8 + $0x60] ss:$16 sps:$4 sm:$0xff]   ;;  %v4241_v3 = vld [vmem:[#allocation8 + $0x68] ss:$16 sps:$4 sm:$0xff]  }
 0x818   :  { %2250 = vmatprep.subr.bf16.mxu0 %v4154_v4  ;;  %2293 = vmatprep.subr.bf16.mxu1 %v4157_v8  ;;  %v4246_v4 = vld [vmem:[#allocation8 + $0x44] ss:$16 sps:$4 sm:$0xff]   ;;  %v4249_v8 = vld [vmem:[#allocation8 + $0x4c] ss:$16 sps:$4 sm:$0xff]  }
 0x81b   :  { %2251 = vmatpush1.bf16.msra.mxu0 %v4152_v9  ;;  %2294 = vmatpush1.bf16.msra.mxu1 %v4155_v10  ;;  %v4244_v9 = vld [vmem:[#allocation8 + $0x40] ss:$16 sps:$4 sm:$0xff]   ;;  %v4247_v10 = vld [vmem:[#allocation8 + $0x48] ss:$16 sps:$4 sm:$0xff]  }
 0x81c   :  { %2252 = vmatprep.subr.bf16.mxu0 %v4160_v11  ;;  %2295 = vmatprep.subr.bf16.mxu1 %v4163_v13  ;;  %v4252_v11 = vld [vmem:[#allocation8 + $0x24] ss:$16 sps:$4 sm:$0xff]   ;;  %v4255_v13 = vld [vmem:[#allocation8 + $0x2c] ss:$16 sps:$4 sm:$0xff]  }
 0x81f   :  { %2253 = vmatpush1.bf16.msra.mxu0 %v4158_v14  ;;  %2296 = vmatpush1.bf16.msra.mxu1 %v4161_v17  ;;  %v4250_v14 = vld [vmem:[#allocation8 + $0x20] ss:$16 sps:$4 sm:$0xff]   ;;  %v4253_v17 = vld [vmem:[#allocation8 + $0x28] ss:$16 sps:$4 sm:$0xff]  }
 0x820   :  { %2490 = vmatprep.subr.bf16.mxu0 %v4166_v39  ;;  %2533 = vmatprep.subr.bf16.mxu1 %v4170_v29  ;;  %v4258_v39 = vld [vmem:[#allocation8 + $0x4] ss:$16 sps:$4 sm:$0xff]   ;;  %v4261_v29 = vld [vmem:[#allocation8 + $0xc] ss:$16 sps:$4 sm:$0xff]  }
 0x822   :  { %2271 = vmatmul.mubr.bf16.vlgmr.msra.gmra.mxu0 %v4167_v12  ;;  %2314 = vmatmul.mubr.bf16.vlgmr.msra.gmra.mxu1 %v4167_v12  ;;  %v4256_v12 = vld [vmem:[#allocation8] ss:$16 sps:$4 sm:$0xff]  }
 0x823   :  { %2491 = vmatpush1.bf16.msra.mxu0 %v4164_v21  ;;  %2534 = vmatpush1.bf16.msra.mxu1 %v4168_v1  ;;  %v4259_v21 = vld [vmem:[#allocation8 + $0x8] ss:$16 sps:$4 sm:$0xff]   ;;  %v4264_v1 = vld [vmem:[#allocation10 + $0x74] ss:$8 sps:$4 sm:$0xff]  }
 0x824   :  { %2492 = vmatprep.subr.bf16.mxu0 %v4173_v51  ;;  %2535 = vmatprep.subr.bf16.mxu1 %v4176_v43  ;;  %v4267_v51 = vld [vmem:[#allocation10 + $0x174] ss:$8 sps:$4 sm:$0xff]  }
 0x825   :  { %2522 = vmatprep.mubr.bf16.mxu0 %v5974_v56  ;;  %2565 = vmatprep.mubr.bf16.mxu1 %v5974_v56 }
 0x827   :  { %2493 = vmatpush1.bf16.msra.mxu0 %v4171_v42  ;;  %2536 = vmatpush1.bf16.msra.mxu1 %v4174_v26  ;;  %v6016_v42 = vld [vmem:[#allocation58_spill] sm:$0xff] }
 0x828   :  { %2494 = vmatprep.subr.bf16.mxu0 %v4179_v32  ;;  %2537 = vmatprep.subr.bf16.mxu1 %v4182_v44 }
 0x82b   :  { %2495 = vmatpush1.bf16.msra.mxu0 %v4177_v55  ;;  %2538 = vmatpush1.bf16.msra.mxu1 %v4180_v7  ;;  %v6017_v7 = vld [vmem:[#allocation60_spill] sm:$0xff] }
 0x82c   :  { %2496 = vmatprep.subr.bf16.mxu0 %v4185_v22  ;;  %2539 = vmatprep.subr.bf16.mxu1 %v4188_v0 }
 0x82f   :  { %2497 = vmatpush1.bf16.msra.mxu0 %v4183_v20  ;;  %2540 = vmatpush1.bf16.msra.mxu1 %v4186_v2  ;;  %v6018_v2 = vld [vmem:[#allocation62_spill] sm:$0xff] }
 0x830   :  { %2498 = vmatprep.subr.bf16.mxu0 %v4191_v15  ;;  %2541 = vmatprep.subr.bf16.mxu1 %v4194_v23 }
 0x833   :  { %2499 = vmatpush1.bf16.msra.mxu0 %v4189_v6  ;;  %2542 = vmatpush1.bf16.msra.mxu1 %v4192_v5 }
 0x834   :  { %2500 = vmatprep.subr.bf16.mxu0 %v4197_v28  ;;  %2543 = vmatprep.subr.bf16.mxu1 %v4200_v18  ;;  %v6019_v28 = vld [vmem:[#allocation64_spill] sm:$0xff] }
 0x837   :  { %2501 = vmatpush1.bf16.msra.mxu0 %v4195_v52  ;;  %2544 = vmatpush1.bf16.msra.mxu1 %v4198_v19  ;;  %v6020_v19 = vld [vmem:[#allocation59_spill] sm:$0xff] }
 0x838   :  { %2502 = vmatprep.subr.bf16.mxu0 %v4203_v31  ;;  %2545 = vmatprep.subr.bf16.mxu1 %v4206_v16 }
 0x83b   :  { %2503 = vmatpush1.bf16.msra.mxu0 %v4201_v57  ;;  %2546 = vmatpush1.bf16.msra.mxu1 %v4204_v27  ;;  %v6021_v57 = vld [vmem:[#allocation63_spill] sm:$0xff] }
 0x83c   :  { %2504 = vmatprep.subr.bf16.mxu0 %v4209_v34  ;;  %2547 = vmatprep.subr.bf16.mxu1 %v4212_v33  ;;  %v6022_v33 = vld [vmem:[#allocation61_spill] sm:$0xff] }
 0x83f   :  { %2505 = vmatpush1.bf16.msra.mxu0 %v4207_v30  ;;  %2548 = vmatpush1.bf16.msra.mxu1 %v4210_v35 }
 0x840   :  { %2769 = vmatprep.subr.bf16.mxu0 %v4216_v37  ;;  %2812 = vmatprep.subr.bf16.mxu1 %v4219_v40 }
 0x842   :  { %2523 = vmatmul.mubr.bf16.vlgmr.msra.gmra.mxu0 %v4213_v36  ;;  %2566 = vmatmul.mubr.bf16.vlgmr.msra.gmra.mxu1 %v4213_v36 }
 0x843   :  { %2801 = vmatprep.mubr.bf16.mxu0 %v5974_v56  ;;  %2844 = vmatprep.mubr.bf16.mxu1 %v5974_v56  ;;  %v4229_v56 = vld [vmem:[#allocation8 + $0xa8] ss:$16 sps:$4 sm:$0xff]  }
 0x844   :  { %2770 = vmatpush1.bf16.msra.mxu0 %v4214_v38  ;;  %2813 = vmatpush1.bf16.msra.mxu1 %v4217_v41  ;;  %v6023_v41 = vld [vmem:[#allocation65_spill] sm:$0xff] }
 0x845   :  { %2771 = vmatprep.subr.bf16.mxu0 %v4222_v45  ;;  %2814 = vmatprep.subr.bf16.mxu1 %v4225_v46 }
 0x848   :  { %2772 = vmatpush1.bf16.msra.mxu0 %v4220_v47  ;;  %2815 = vmatpush1.bf16.msra.mxu1 %v4223_v48 }
 0x849   :  { %2773 = vmatprep.subr.bf16.mxu0 %v4228_v49  ;;  %2816 = vmatprep.subr.bf16.mxu1 %v4231_v50 }
 0x84c   :  { %2774 = vmatpush1.bf16.msra.mxu0 %v4226_v53  ;;  %2817 = vmatpush1.bf16.msra.mxu1 %v4229_v56 }
 0x84d   :  { %2775 = vmatprep.subr.bf16.mxu0 %v4234_v54  ;;  %2818 = vmatprep.subr.bf16.mxu1 %v4237_v58 }
 0x850   :  { %2776 = vmatpush1.bf16.msra.mxu0 %v4232_v59  ;;  %2819 = vmatpush1.bf16.msra.mxu1 %v4235_v60 }
 0x851   :  { %2777 = vmatprep.subr.bf16.mxu0 %v4240_v61  ;;  %2820 = vmatprep.subr.bf16.mxu1 %v4243_v62 }
 0x854   :  { %2778 = vmatpush1.bf16.msra.mxu0 %v4238_v63  ;;  %2821 = vmatpush1.bf16.msra.mxu1 %v4241_v3 }
 0x855   :  { %2779 = vmatprep.subr.bf16.mxu0 %v4246_v4  ;;  %2822 = vmatprep.subr.bf16.mxu1 %v4249_v8 }
 0x858   :  { %2780 = vmatpush1.bf16.msra.mxu0 %v4244_v9  ;;  %2823 = vmatpush1.bf16.msra.mxu1 %v4247_v10 }
 0x859   :  { %2781 = vmatprep.subr.bf16.mxu0 %v4252_v11  ;;  %2824 = vmatprep.subr.bf16.mxu1 %v4255_v13 }
 0x85c   :  { %2782 = vmatpush1.bf16.msra.mxu0 %v4250_v14  ;;  %2825 = vmatpush1.bf16.msra.mxu1 %v4253_v17 }
 0x85d   :  { %2783 = vmatprep.subr.bf16.mxu0 %v4258_v39  ;;  %2826 = vmatprep.subr.bf16.mxu1 %v4261_v29 }
 0x860   :  { %2784 = vmatpush1.bf16.msra.mxu0 %v4256_v12  ;;  %2827 = vmatpush1.bf16.msra.mxu1 %v4259_v21 }
 0x861   :  { %3301 = vmatprep.subr.bf16.mxu0 %v4264_v1  ;;  %3344 = vmatprep.subr.bf16.mxu1 %v4267_v51  ;;  %v4262_v1 = vld [vmem:[#allocation10 + $0x70] ss:$8 sps:$4 sm:$0xff]  }
 0x8c2   :  { %v1896_v43 = vpop.f32.mrf.mxu0  ;;  %v1939_v55 = vpop.f32.mrf.mxu1 }
 0x8c3   :  { %v1948_v26 = vadd.f32 %v1896_v43, %v6016_v42  ;;  %v1950_v31 = vadd.f32 %v1939_v55, %v6020_v19  ;;  %v4270_v43 = vld [vmem:[#allocation10 + $0x64] ss:$8 sps:$4 sm:$0xff]   ;;  %v4274_v55 = vld [vmem:[#allocation10 + $0x50] ss:$8 sps:$4 sm:$0xff]   ;;  %v4295_v19 = vld [vmem:[#allocation10 + $0x120] ss:$8 sps:$4 sm:$0xff]  }
 0x8c4   :  { %v1898_v32 = vpop.f32.mrf.mxu0  ;;  %v1941_v6 = vpop.f32.mrf.mxu1  ;;  %v4273_v42 = vld [vmem:[#allocation10 + $0x164] ss:$8 sps:$4 sm:$0xff]  }
 0x8c5   :  { %v3803_v44 = vmul.f32 -1.442695, %v1948_v26  ;;  %v1949_v22 = vadd.f32 %v1898_v32, %v6017_v7  ;;  %v3805_v34 = vmul.f32 -1.442695, %v1950_v31  ;;  %v1951_v30 = vadd.f32 %v1941_v6, %v6022_v33  ;;  %v4268_v26 = vld [vmem:[#allocation10 + $0x60] ss:$8 sps:$4 sm:$0xff]  }
 0x8c6   :  { %v1900_v0 = vpop.f32.mrf.mxu0  ;;  %v1943_v16 = vpop.f32.mrf.mxu1  ;;  %v4276_v32 = vld [vmem:[#allocation10 + $0x54] ss:$8 sps:$4 sm:$0xff]   ;;  %v4277_v7 = vld [vmem:[#allocation10 + $0x150] ss:$8 sps:$4 sm:$0xff]   ;;  %v4309_v33 = vld [vmem:[#allocation10 + $0x104] ss:$8 sps:$4 sm:$0xff]  }
 0x8c7   :  { %4606 = vpow2.f32 %v3803_v44  ;;  %v3804_v20 = vmul.f32 -1.442695, %v1949_v22  ;;  %v1952_v15 = vadd.f32 %v1900_v0, %v6018_v2  ;;  %v1954_v27 = vadd.f32 %v1943_v16, %v6021_v57  ;;  %v4279_v44 = vld [vmem:[#allocation10 + $0x154] ss:$8 sps:$4 sm:$0xff]   ;;  %v4282_v22 = vld [vmem:[#allocation10 + $0x44] ss:$8 sps:$4 sm:$0xff]  }
 0x8c8   :  { %v1902_v23 = vpop.f32.mrf.mxu0  ;;  %v1945_v35 = vpop.f32.mrf.mxu1  ;;  %v4285_v0 = vld [vmem:[#allocation10 + $0x144] ss:$8 sps:$4 sm:$0xff]   ;;  %v4283_v2 = vld [vmem:[#allocation10 + $0x140] ss:$8 sps:$4 sm:$0xff]   ;;  %v4286_v6 = vld [vmem:[#allocation10 + $0x30] ss:$8 sps:$4 sm:$0xff]  }
 0x8c9   :  { %4608 = vpow2.f32 %v3804_v20  ;;  %v3806_v5 = vmul.f32 -1.442695, %v1952_v15  ;;  %v1953_v18 = vadd.f32 %v1902_v23, %v6019_v28  ;;  %v3808_v37 = vmul.f32 -1.442695, %v1954_v27  ;;  %v4280_v20 = vld [vmem:[#allocation10 + $0x40] ss:$8 sps:$4 sm:$0xff]  }
 0x8ca   :  { %v1955_v45 = vadd.f32 %v1945_v35, %v6023_v41  ;;  %v4288_v15 = vld [vmem:[#allocation10 + $0x34] ss:$8 sps:$4 sm:$0xff]   ;;  %v4294_v28 = vld [vmem:[#allocation10 + $0x24] ss:$8 sps:$4 sm:$0xff]   ;;  %v4298_v57 = vld [vmem:[#allocation10 + $0x10] ss:$8 sps:$4 sm:$0xff]  }
 0x8cb   :  { %4610 = vpow2.f32 %v3806_v5  ;;  %v3807_v52 = vmul.f32 -1.442695, %v1953_v18  ;;  %v4291_v23 = vld [vmem:[#allocation10 + $0x134] ss:$8 sps:$4 sm:$0xff]   ;;  %v4289_v5 = vld [vmem:[#allocation10 + $0x130] ss:$8 sps:$4 sm:$0xff]  }
 0x8cc   :  { %v4297_v18 = vld [vmem:[#allocation10 + $0x124] ss:$8 sps:$4 sm:$0xff]   ;;  %v4300_v31 = vld [vmem:[#allocation10 + $0x14] ss:$8 sps:$4 sm:$0xff]   ;;  %v4301_v27 = vld [vmem:[#allocation10 + $0x110] ss:$8 sps:$4 sm:$0xff]  }
 0x8cd   :  { %4612 = vpow2.f32 %v3807_v52  ;;  %v4292_v52 = vld [vmem:[#allocation10 + $0x20] ss:$8 sps:$4 sm:$0xff]   ;;  %v4303_v16 = vld [vmem:[#allocation10 + $0x114] ss:$8 sps:$4 sm:$0xff]   ;;  %v4318_v41 = vld [vmem:[#allocation10 + $0xe4] ss:$8 sps:$4 sm:$0xff]  }
 0x8ce   :  { %4614 = vpow2.f32 %v3805_v34  ;;  %v4306_v34 = vld [vmem:[#allocation10 + $0x4] ss:$8 sps:$4 sm:$0xff]   ;;  %v4307_v35 = vld [vmem:[#allocation10 + $0x100] ss:$8 sps:$4 sm:$0xff]  }
 0x8cf   :  { %4616 = vtanh.f32 %v1951_v30  ;;  %v4304_v30 = vld [vmem:[#allocation10] ss:$8 sps:$4 sm:$0xff]  }
 0x8d4   :  { %v4607_v36 = vpop.eup %4606 }
 0x8d5   :  { %v1974_v40 = vadd.f32 1.0, %v4607_v36  ;;  %v4312_v36 = vld [vmem:[#allocation10 + $0xf4] ss:$8 sps:$4 sm:$0xff]  }
 0x8d6   :  { %v4609_v38 = vpop.eup %4608 }
 0x8d7   :  { %4618 = vrcp.f32 %v1974_v40  ;;  %v1975_v46 = vadd.f32 1.0, %v4609_v38  ;;  %v4310_v40 = vld [vmem:[#allocation10 + $0xf0] ss:$8 sps:$4 sm:$0xff]  }
 0x8d8   :  { %v4611_v47 = vpop.eup %4610  ;;  %4620 = vpow2.f32 %v3808_v37  ;;  %v4315_v37 = vld [vmem:[#allocation10 + $0x1f4] ss:$8 sps:$4 sm:$0xff]   ;;  %v4313_v38 = vld [vmem:[#allocation10 + $0x1f0] ss:$8 sps:$4 sm:$0xff]  }
 0x8d9   :  { %4622 = vrcp.f32 %v1975_v46  ;;  %v1977_v48 = vadd.f32 1.0, %v4611_v47  ;;  %v4316_v46 = vld [vmem:[#allocation10 + $0xe0] ss:$8 sps:$4 sm:$0xff]  }
 0x8da   :  { %v4613_v49 = vpop.eup %4612  ;;  %4624 = vtanh.f32 %v1955_v45  ;;  %v4321_v45 = vld [vmem:[#allocation10 + $0x1e4] ss:$8 sps:$4 sm:$0xff]   ;;  %v4319_v47 = vld [vmem:[#allocation10 + $0x1e0] ss:$8 sps:$4 sm:$0xff]  }
 0x8db   :  { %4626 = vrcp.f32 %v1977_v48  ;;  %v1978_v50 = vadd.f32 1.0, %v4613_v49  ;;  %v4615_v53 = vpop.eup %4614  ;;  %v4324_v48 = vld [vmem:[#allocation10 + $0xd4] ss:$8 sps:$4 sm:$0xff]  }
 0x8dc   :  { %v4617_v56 = vpop.eup %4616  ;;  %v1976_v61 = vadd.f32 1.0, %v4615_v53  ;;  %v4327_v49 = vld [vmem:[#allocation10 + $0x1d4] ss:$8 sps:$4 sm:$0xff]   ;;  %v4325_v53 = vld [vmem:[#allocation10 + $0x1d0] ss:$8 sps:$4 sm:$0xff]  }
 0x8dd   :  { %4628 = vrcp.f32 %v1978_v50  ;;  %v4322_v50 = vld [vmem:[#allocation10 + $0xd0] ss:$8 sps:$4 sm:$0xff]  }
 0x8de   :  { %4630 = vrcp.f32 %v1976_v61  ;;  %v4339_v61 = vld [vmem:[#allocation10 + $0x1b4] ss:$8 sps:$4 sm:$0xff]  }
 0x8e4   :  { %v4619_v54 = vpop.eup %4618 }
 0x8e5   :  { %v4621_v58 = vpop.eup %4620  ;;  %v1996_v59 = vmul.f32 %v4619_v54, %v4617_v56  ;;  %v4330_v56 = vld [vmem:[#allocation10 + $0xc4] ss:$8 sps:$4 sm:$0xff]  }
 0x8e6   :  { %v4623_v60 = vpop.eup %4622  ;;  %v1979_v10 = vadd.f32 1.0, %v4621_v58  ;;  %v4333_v54 = vld [vmem:[#allocation10 + $0x1c4] ss:$8 sps:$4 sm:$0xff]   ;;  %v4328_v58 = vld [vmem:[#allocation10 + $0xc0] ss:$8 sps:$4 sm:$0xff]  }
 0x8e7   :  { %v4625_v62 = vpop.eup %4624  ;;  %v1994_v63 = vmul.f32 %v4623_v60, %v5754_v25  ;;  %v4265_v25 = vld [vmem:[#allocation10 + $0x170] ss:$8 sps:$4 sm:$0xff]   ;;  %v4336_v60 = vld [vmem:[#allocation10 + $0xb4] ss:$8 sps:$4 sm:$0xff]  }
 0x8e8   :  { %v4627_v3 = vpop.eup %4626 }
 0x8e9   :  { %v1998_v4 = vadd.f32 %v1996_v59, %v1994_v63  ;;  %v1997_v8 = vmul.f32 %v4627_v3, %v4625_v62  ;;  %v4331_v59 = vld [vmem:[#allocation10 + $0x1c0] ss:$8 sps:$4 sm:$0xff]   ;;  %v4334_v62 = vld [vmem:[#allocation10 + $0xb0] ss:$8 sps:$4 sm:$0xff]   ;;  %v4342_v3 = vld [vmem:[#allocation10 + $0xa4] ss:$8 sps:$4 sm:$0xff]  }
 0x8ea   :  { %v4629_v9 = vpop.eup %4628  ;;  %v4337_v63 = vld [vmem:[#allocation10 + $0x1b0] ss:$8 sps:$4 sm:$0xff]  }
 0x8eb   :  { %4632 = vtanh.f32 %v1998_v4  ;;  %v1995_v11 = vmul.f32 %v4629_v9, %v5758_v24  ;;  %v4631_v14 = vpop.eup %4630  ;;  %v4271_v24 = vld [vmem:[#allocation10 + $0x160] ss:$8 sps:$4 sm:$0xff]   ;;  %v4345_v4 = vld [vmem:[#allocation10 + $0x1a4] ss:$8 sps:$4 sm:$0xff]  }
 0x8ec   :  { %4634 = vrcp.f32 %v1979_v10  ;;  %v4343_v9 = vld [vmem:[#allocation10 + $0x1a0] ss:$8 sps:$4 sm:$0xff]   ;;  %v4348_v10 = vld [vmem:[#allocation10 + $0x94] ss:$8 sps:$4 sm:$0xff]  }
 0x8ed   :  { %v1999_v13 = vadd.f32 %v1997_v8, %v1995_v11  ;;  %v4340_v8 = vld [vmem:[#allocation10 + $0xa0] ss:$8 sps:$4 sm:$0xff]   ;;  %v4351_v11 = vld [vmem:[#allocation10 + $0x194] ss:$8 sps:$4 sm:$0xff]  }
 0x8ef   :  { %4636 = vtanh.f32 %v1999_v13  ;;  %v4346_v13 = vld [vmem:[#allocation10 + $0x90] ss:$8 sps:$4 sm:$0xff]  }
 0x8f8   :  { %v4633_v17 = vpop.eup %4632 }
 0x8f9   :  { %v2002_v39 = vmul.f32 %v4633_v17, %v4631_v14  ;;  %v4635_v29 = vpop.eup %4634  ;;  %v4349_v14 = vld [vmem:[#allocation10 + $0x190] ss:$8 sps:$4 sm:$0xff]   ;;  %v4352_v17 = vld [vmem:[#allocation10 + $0x80] ss:$8 sps:$4 sm:$0xff]  }
 0x8fc   :  { %v4637_v12 = vpop.eup %4636 }
 0x8fd   :  { %v2003_v21 = vmul.f32 %v4637_v12, %v4635_v29  ;;  %v4355_v29 = vld [vmem:[#allocation10 + $0x180] ss:$8 sps:$4 sm:$0xff]   ;;  %v4357_v12 = vld [vmem:[#allocation10 + $0x184] ss:$8 sps:$4 sm:$0xff]  }
 0x8ff   :  { %v2576_v51 = vpack.c.bf16 %v2003_v21, %v2002_v39  ;;  %v4354_v39 = vld [vmem:[#allocation10 + $0x84] ss:$8 sps:$4 sm:$0xff]   ;;  %v4358_v21 = vld [vmem:[%s5902_s12 + $0x78] sm:$0xff]  }
 0x901   :  { %2802 = vmatmul.mubr.bf16.vlgmr.msra.gmra.mxu0 %v2576_v51  ;;  %2845 = vmatmul.mubr.bf16.vlgmr.msra.gmra.mxu1 %v2576_v51  ;;  %v2315_v51 = vpop.f32.mrf.mxu1 }
 0x902   :  { %3302 = vmatpush1.bf16.msra.mxu0 %v4262_v1  ;;  %3345 = vmatpush1.bf16.msra.mxu1 %v4265_v25  ;;  %v6024_v1 = vmov 0.0   ;;  %v2272_v25 = vpop.f32.mrf.mxu0 }
 0x903   :  { %3303 = vmatprep.subr.bf16.mxu0 %v4270_v43  ;;  %3346 = vmatprep.subr.bf16.mxu1 %v4273_v42  ;;  %v2317_v42 = vpop.f32.mrf.mxu1 }
 0x904   :  { %v2274_v43 = vpop.f32.mrf.mxu0 }
 0x906   :  { %3304 = vmatpush1.bf16.msra.mxu0 %v4268_v26  ;;  %3347 = vmatpush1.bf16.msra.mxu1 %v4271_v24  ;;  %v2276_v26 = vpop.f32.mrf.mxu0  ;;  %v2319_v24 = vpop.f32.mrf.mxu1 }
 0x907   :  { %3305 = vmatprep.subr.bf16.mxu0 %v4276_v32  ;;  %3348 = vmatprep.subr.bf16.mxu1 %v4279_v44 }
 0x908   :  { %v2278_v32 = vpop.f32.mrf.mxu0  ;;  %v2321_v44 = vpop.f32.mrf.mxu1 }
 0x90a   :  { %3306 = vmatpush1.bf16.msra.mxu0 %v4274_v55  ;;  %3349 = vmatpush1.bf16.msra.mxu1 %v4277_v7  ;;  %v2524_v55 = vpop.f32.mrf.mxu0  ;;  %v2567_v7 = vpop.f32.mrf.mxu1 }
 0x90b   :  { %3307 = vmatprep.subr.bf16.mxu0 %v4282_v22  ;;  %3350 = vmatprep.subr.bf16.mxu1 %v4285_v0 }
 0x90c   :  { %v2526_v22 = vpop.f32.mrf.mxu0  ;;  %v2569_v0 = vpop.f32.mrf.mxu1 }
 0x90e   :  { %3308 = vmatpush1.bf16.msra.mxu0 %v4280_v20  ;;  %3351 = vmatpush1.bf16.msra.mxu1 %v4283_v2  ;;  %v2528_v20 = vpop.f32.mrf.mxu0  ;;  %v2571_v2 = vpop.f32.mrf.mxu1 }
 0x90f   :  { %3309 = vmatprep.subr.bf16.mxu0 %v4288_v15  ;;  %3352 = vmatprep.subr.bf16.mxu1 %v4291_v23 }
 0x910   :  { %v2530_v15 = vpop.f32.mrf.mxu0  ;;  %v2573_v23 = vpop.f32.mrf.mxu1 }
 0x912   :  { %3310 = vmatpush1.bf16.msra.mxu0 %v4286_v6  ;;  %3353 = vmatpush1.bf16.msra.mxu1 %v4289_v5 }
 0x913   :  { %3311 = vmatprep.subr.bf16.mxu0 %v4294_v28  ;;  %3354 = vmatprep.subr.bf16.mxu1 %v4297_v18  ;;  %v2527_v28 = vadd.f32 %v2526_v22, %v2274_v43  ;;  %v2570_v18 = vadd.f32 %v2569_v0, %v2317_v42  ;;  %v4362_v22 = vld [vmem:[%s5902_s12 + $0x68] sm:$0xff]  }
 0x914   :  { %v4363_v0 = vld [vmem:[%s5902_s12 + $0x28] sm:$0xff]  }
 0x916   :  { %3312 = vmatpush1.bf16.msra.mxu0 %v4292_v52  ;;  %3355 = vmatpush1.bf16.msra.mxu1 %v4295_v19  ;;  %v2863_v52 = vld [vmem:[%s5899_s9] sm:$0xf]  ;;  %v2525_v19 = vadd.f32 %v2524_v55, %v2272_v25  ;;  %v4360_v55 = vld [vmem:[%s5902_s12 + $0x70] sm:$0xff]  }
 0x917   :  { %3313 = vmatprep.subr.bf16.mxu0 %v4300_v31  ;;  %3356 = vmatprep.subr.bf16.mxu1 %v4303_v16  ;;  %v2568_v31 = vadd.f32 %v2567_v7, %v2315_v51  ;;  %v2529_v16 = vadd.f32 %v2528_v20, %v2276_v26  ;;  %v4361_v7 = vld [vmem:[%s5902_s12 + $0x30] sm:$0xff]   ;;  %v4364_v20 = vld [vmem:[%s5902_s12 + $0x60] sm:$0xff]  }
 0x91a   :  { %3314 = vmatpush1.bf16.msra.mxu0 %v4298_v57  ;;  %3357 = vmatpush1.bf16.msra.mxu1 %v4301_v27  ;;  %v2572_v57 = vadd.f32 %v2571_v2, %v2319_v24  ;;  %v4359_v24 = vld [vmem:[%s5902_s12 + $0x38] sm:$0xff]   ;;  %v4365_v2 = vld [vmem:[%s5902_s12 + $0x20] sm:$0xff]  }
 0x91b   :  { %3315 = vmatprep.subr.bf16.mxu0 %v4306_v34  ;;  %3358 = vmatprep.subr.bf16.mxu1 %v4309_v33 }
 0x91e   :  { %3316 = vmatpush1.bf16.msra.mxu0 %v4304_v30  ;;  %3359 = vmatpush1.bf16.msra.mxu1 %v4307_v35  ;;  %v6025_v30 = vld [vmem:[#allocation16_spill] sm:$0xff] }
 0x91f   :  { %3317 = vmatprep.subr.bf16.mxu0 %v4312_v36  ;;  %3360 = vmatprep.subr.bf16.mxu1 %v4315_v37  ;;  %v2872_v35 = vrot.slane %v2863_v52, %v6025_v30  ;;  %v6026_v37 = vld [vmem:[#allocation14_spill] sm:$0xff] }
 0x922   :  { %3318 = vmatpush2.bf16.msra.mxu0 %v4310_v40  ;;  %3361 = vmatpush2.bf16.msra.mxu1 %v4313_v38  ;;  %v6027_v40 = vsub.s32 3, %v6026_v37 }
 0x923   :  { %3319 = vmatprep.subr.bf16.mxu0 %v4318_v41  ;;  %3362 = vmatprep.subr.bf16.mxu1 %v4321_v45  ;;  %v6028_v45 = vld [vmem:[#allocation15_spill] sm:$0xff] }
 0x924   :  { %v2880_v38 = vrot.slane %v2863_v52, %v6027_v40 }
 0x926   :  { %3320 = vmatpush2.bf16.msra.mxu0 %v4316_v46  ;;  %3363 = vmatpush2.bf16.msra.mxu1 %v4319_v47  ;;  %v2868_v46 = vrot.slane %v2863_v52, %v6028_v45 }
 0x927   :  { %3321 = vmatprep.subr.bf16.mxu0 %v4324_v48  ;;  %3364 = vmatprep.subr.bf16.mxu1 %v4327_v49  ;;  %v6029_v48 = vsub.s32 2, %v6026_v37 }
 0x929   :  { %v2876_v49 = vrot.slane %v2863_v52, %v6029_v48  ;;  %v4372_v52 = vld [vmem:[%s5902_s12 + $0x40] sm:$0xff]  }
 0x92a   :  { %3322 = vmatpush2.bf16.msra.mxu0 %v4322_v50  ;;  %3365 = vmatpush2.bf16.msra.mxu1 %v4325_v53 }
 0x92b   :  { %3323 = vmatprep.subr.bf16.mxu0 %v4330_v56  ;;  %3366 = vmatprep.subr.bf16.mxu1 %v4333_v54  ;;  %v2531_v56 = vadd.f32 %v2530_v15, %v2278_v32  ;;  %v2574_v54 = vadd.f32 %v2573_v23, %v2321_v44  ;;  %v4366_v15 = vld [vmem:[%s5902_s12 + $0x58] sm:$0xff]  }
 0x92c   :  { %v4367_v23 = vld [vmem:[%s5902_s12 + $0x18] sm:$0xff]  }
 0x92e   :  { %3324 = vmatpush2.bf16.msra.mxu0 %v4328_v58  ;;  %3367 = vmatpush2.bf16.msra.mxu1 %v4331_v59 }
 0x92f   :  { %3325 = vmatprep.subr.bf16.mxu0 %v4336_v60  ;;  %3368 = vmatprep.subr.bf16.mxu1 %v4339_v61 }
 0x932   :  { %3326 = vmatpush2.bf16.msra.mxu0 %v4334_v62  ;;  %3369 = vmatpush2.bf16.msra.mxu1 %v4337_v63 }
 0x933   :  { %3327 = vmatprep.subr.bf16.mxu0 %v4342_v3  ;;  %3370 = vmatprep.subr.bf16.mxu1 %v4345_v4 }
 0x936   :  { %3328 = vmatpush2.bf16.msra.mxu0 %v4340_v8  ;;  %3371 = vmatpush2.bf16.msra.mxu1 %v4343_v9 }
 0x937   :  { %3329 = vmatprep.subr.bf16.mxu0 %v4348_v10  ;;  %3372 = vmatprep.subr.bf16.mxu1 %v4351_v11 }
 0x93a   :  { %3330 = vmatpush2.bf16.msra.mxu0 %v4346_v13  ;;  %3373 = vmatpush2.bf16.msra.mxu1 %v4349_v14 }
 0x93b   :  { %3331 = vmatprep.subr.bf16.mxu0 %v4354_v39  ;;  %3374 = vmatprep.subr.bf16.mxu1 %v4357_v12 }
 0x93e   :  { %3332 = vmatpush2.bf16.msra.mxu0 %v4352_v17  ;;  %3375 = vmatpush2.bf16.msra.mxu1 %v4355_v29 }
 0x93f   :  { %4028 = vmatprep.subr.bf16.mxu1 %v6024_v1  ;;  %3997 = vmatprep.subr.bf16.mxu0 %v4358_v21 }
 0x9c1   :  { %v2803_v6 = vpop.f32.mrf.mxu0  ;;  %v2846_v5 = vpop.f32.mrf.mxu1 }
 0x9c2   :  { %v2855_v41 = vadd.f32 %v2803_v6, %v2525_v19  ;;  %v2857_v47 = vadd.f32 %v2846_v5, %v2568_v31  ;;  %v4368_v6 = vld [vmem:[%s5902_s12 + $0x50] sm:$0xff]   ;;  %v4373_v19 = vld [vmem:[%s5902_s12] sm:$0xff]   ;;  %v4374_v31 = vld [vmem:[%s5904_s14 + $0x38] sm:$0xff]  }
 0x9c3   :  { %v2805_v27 = vpop.f32.mrf.mxu0  ;;  %v2848_v34 = vpop.f32.mrf.mxu1  ;;  %v4369_v5 = vld [vmem:[%s5902_s12 + $0x10] sm:$0xff]  }
 0x9c4   :  { %v2856_v33 = vadd.f32 %v2805_v27, %v2527_v28  ;;  %v2858_v36 = vadd.f32 %v2848_v34, %v2570_v18  ;;  %v2885_v8 = vadd.f32 %v2868_v46, %v2855_v41  ;;  %v2887_v9 = vadd.f32 %v2876_v49, %v2857_v47  ;;  %v4370_v28 = vld [vmem:[%s5902_s12 + $0x48] sm:$0xff]   ;;  %v4377_v27 = vld [vmem:[%s5904_s14 + $0x20] sm:$0xff]  }
 0x9c5   :  { %v2807_v50 = vpop.f32.mrf.mxu0  ;;  %v2850_v53 = vpop.f32.mrf.mxu1  ;;  %v4371_v18 = vld [vmem:[%s5902_s12 + $0x8] sm:$0xff]   ;;  %v2969_v34 = vld [vmem:[%s5901_s11] sm:$0x3] }
 0x9c6   :  { %v2859_v58 = vadd.f32 %v2807_v50, %v2529_v16  ;;  %v2861_v59 = vadd.f32 %v2850_v53, %v2572_v57  ;;  %v2886_v62 = vadd.f32 %v2872_v35, %v2856_v33  ;;  %v2888_v63 = vadd.f32 %v2880_v38, %v2858_v36  ;;  %v4375_v16 = vld [vmem:[%s5904_s14 + $0x30] sm:$0xff]   ;;  %v4376_v57 = vld [vmem:[%s5904_s14 + $0x28] sm:$0xff]  }
 0x9c7   :  { %v2809_v60 = vpop.f32.mrf.mxu0  ;;  %v2852_v61 = vpop.f32.mrf.mxu1  ;;  %v2893_v51 = vmax.f32 %v2885_v8, 0.0  ;;  %v2895_v43 = vmax.f32 %v2887_v9, 0.0  ;;  %v2978_v33 = vrot.slane %v2969_v34, %v6025_v30  ;;  %v4379_v8 = vld [vmem:[%s5904_s14 + $0x10] sm:$0xff]   ;;  %v4380_v9 = vld [vmem:[%s5904_s14 + $0x8] sm:$0xff]  }
 0x9c8   :  { %v2860_v3 = vadd.f32 %v2809_v60, %v2531_v56  ;;  %v2862_v4 = vadd.f32 %v2852_v61, %v2574_v54  ;;  %v2889_v10 = vadd.f32 %v2868_v46, %v2859_v58  ;;  %v2891_v11 = vadd.f32 %v2876_v49, %v2861_v59 }
 0x9c9   :  { %v2894_v29 = vmax.f32 %v2886_v62, 0.0  ;;  %v2896_v12 = vmax.f32 %v2888_v63, 0.0 }
 0x9ca   :  { %v2890_v13 = vadd.f32 %v2872_v35, %v2860_v3  ;;  %v2892_v14 = vadd.f32 %v2880_v38, %v2862_v4  ;;  %v2897_v17 = vmax.f32 %v2889_v10, 0.0  ;;  %v2899_v39 = vmax.f32 %v2891_v11, 0.0  ;;  %v4378_v4 = vld [vmem:[%s5904_s14 + $0x18] sm:$0xff]   ;;  %v4381_v10 = vld [vmem:[%s5904_s14] sm:$0xff]  }
 0x9cb   :  { %v2974_v35 = vrot.slane %v2969_v34, %v6028_v45 }
 0x9cc   :  { %v2898_v21 = vmax.f32 %v2890_v13, 0.0  ;;  %v2900_v25 = vmax.f32 %v2892_v14, 0.0  ;;  %v2901_v32 = vpack.c.bf16 %v2897_v17, %v2893_v51  ;;  %v2903_v44 = vpack.c.bf16 %v2899_v39, %v2895_v43  ;;  %v3971_v17 = vld [vmem:[%s5903_s13] ss:$0 sm:$0xff] }
 0x9ce   :  { %v2902_v42 = vpack.c.bf16 %v2898_v21, %v2894_v29  ;;  %v2904_v26 = vpack.c.bf16 %v2900_v25, %v2896_v12 }
 0x9d0   :  { %3333 = vmatprep.mubr.bf16.mxu0 %v2902_v42  ;;  %3376 = vmatprep.mubr.bf16.mxu1 %v2904_v26 }
 0x9d1   :  { %3334 = vmatmul.mubr.bf16.vlgmr.msra.gmra.mxu0 %v2901_v32  ;;  %3377 = vmatmul.mubr.bf16.vlgmr.msra.gmra.mxu1 %v2903_v44 }
 0x9d2   :  { %3998 = vmatpush3.bf16.msra.mxu0 %v4359_v24  ;;  %4029 = vmatpush3.bf16.msra.mxu1 %v4374_v31 }
 0x9d3   :  { %3999 = vmatprep.subr.bf16.mxu0 %v4360_v55  ;;  %4030 = vmatprep.subr.bf16.mxu1 %v6024_v1 }
 0x9d4   :  { %4044 = vmatprep.mubr.msk.bf16.mxu1 %vm4787_vm1, %v6024_v1 }
 0x9d6   :  { %4000 = vmatpush3.bf16.msra.mxu0 %v4361_v7  ;;  %4031 = vmatpush3.bf16.msra.mxu1 %v4375_v16 }
 0x9d7   :  { %4001 = vmatprep.subr.bf16.mxu0 %v4362_v22  ;;  %4032 = vmatprep.subr.bf16.mxu1 %v6024_v1 }
 0x9da   :  { %4002 = vmatpush3.bf16.msra.mxu0 %v4363_v0  ;;  %4033 = vmatpush3.bf16.msra.mxu1 %v4376_v57 }
 0x9db   :  { %4003 = vmatprep.subr.bf16.mxu0 %v4364_v20  ;;  %4034 = vmatprep.subr.bf16.mxu1 %v6024_v1 }
 0x9de   :  { %4004 = vmatpush3.bf16.msra.mxu0 %v4365_v2  ;;  %4035 = vmatpush3.bf16.msra.mxu1 %v4377_v27 }
 0x9df   :  { %4005 = vmatprep.subr.bf16.mxu0 %v4366_v15  ;;  %4036 = vmatprep.subr.bf16.mxu1 %v6024_v1 }
 0x9e2   :  { %4006 = vmatpush3.bf16.msra.mxu0 %v4367_v23  ;;  %4037 = vmatpush3.bf16.msra.mxu1 %v4378_v4 }
 0x9e3   :  { %4007 = vmatprep.subr.bf16.mxu0 %v4368_v6  ;;  %4038 = vmatprep.subr.bf16.mxu1 %v6024_v1 }
 0x9e6   :  { %4008 = vmatpush3.bf16.msra.mxu0 %v4369_v5  ;;  %4039 = vmatpush3.bf16.msra.mxu1 %v4379_v8 }
 0x9e7   :  { %4009 = vmatprep.subr.bf16.mxu0 %v4370_v28  ;;  %4040 = vmatprep.subr.bf16.mxu1 %v6024_v1 }
 0x9ea   :  { %4010 = vmatpush3.bf16.msra.mxu0 %v4371_v18  ;;  %4041 = vmatpush3.bf16.msra.mxu1 %v4380_v9 }
 0x9eb   :  { %4011 = vmatprep.subr.bf16.mxu0 %v4372_v52  ;;  %4042 = vmatprep.subr.bf16.mxu1 %v6024_v1  ;;  %v3988_v1 = vld [vmem:[%s5905_s15] ss:$0 sm:$0xff] }
 0x9ee   :  { %4012 = vmatpush3.bf16.msra.mxu0 %v4373_v19  ;;  %4043 = vmatpush3.bf16.msra.mxu1 %v4381_v10 }
 0xa91   :  { %v3335_v36 = vpop.f32.mrf.mxu0  ;;  %v3378_v37 = vpop.f32.mrf.mxu1 }
 0xa92   :  { %v3336_v46 = vadd.f32 %v3335_v36, %v2974_v35 }
 0xa93   :  { %v3337_v40 = vpop.f32.mrf.mxu0  ;;  %v3380_v38 = vpop.f32.mrf.mxu1 }
 0xa94   :  { %v3338_v41 = vadd.f32 %v3337_v40, %v2978_v33  ;;  %v3379_v58 = vadd.f32 %v3378_v37, %v3336_v46 }
 0xa95   :  { %v3339_v47 = vpop.f32.mrf.mxu0  ;;  %v3382_v48 = vpop.f32.mrf.mxu1 }
 0xa96   :  { %v3340_v49 = vadd.f32 %v3339_v47, %v2974_v35  ;;  %v3381_v53 = vadd.f32 %v3380_v38, %v3338_v41  ;;  %v3387_v45 = vmax.f32 %v3379_v58, 0.0 }
 0xa97   :  { %v3341_v50 = vpop.f32.mrf.mxu0  ;;  %v3384_v59 = vpop.f32.mrf.mxu1 }
 0xa98   :  { %v3383_v56 = vadd.f32 %v3382_v48, %v3340_v49  ;;  %v3342_v54 = vadd.f32 %v3341_v50, %v2978_v33  ;;  %v3388_v30 = vmax.f32 %v3381_v53, 0.0 }
 0xa9a   :  { %v3385_v60 = vadd.f32 %v3384_v59, %v3342_v54  ;;  %v3389_v61 = vmax.f32 %v3383_v56, 0.0 }
 0xa9c   :  { %v3390_v62 = vmax.f32 %v3385_v60, 0.0  ;;  %v3391_v3 = vpack.c.bf16 %v3389_v61, %v3387_v45 }
 0xa9e   :  { %v3392_v63 = vpack.c.bf16 %v3390_v62, %v3388_v30 }
 0xaa0   :  { %3560 = vmatprep.mubr.bf16.mxu0 %v3392_v63 }
 0xaa1   :  { %3561 = vmatmul.mubr.bf16.vlgmr.msra.gmra.mxu0 %v3391_v3 }
 0xb61   :  { %v4013_v11 = vpop.f32.mrf.mxu0 }
 0xb63   :  { %v4014_v13 = vpop.f32.mrf.mxu0 }
 0xb64   :  { %v4015_v14 = vadd.f32 %v4014_v13, %v4013_v11 }
 0xb65   :  { %v4016_v39 = vpop.f32.mrf.mxu0 }
 0xb66   :  { %v3563_v12 = vadd.f32 %v4015_v14, %v3971_v17 }
 0xb67   :  { %v4017_v29 = vpop.f32.mrf.mxu0 }
 0xb68   :  { %v4018_v21 = vadd.f32 %v4017_v29, %v4016_v39  ;;  %v3569_v51 = vmax.f32 %v3563_v12, 0.0 }
 0xb6a   :  { %v3566_v25 = vadd.f32 %v4018_v21, %v3971_v17 }
 0xb6c   :  { %v3570_v43 = vmax.f32 %v3566_v25, 0.0 }
 0xb6e   :  { %v3571_v42 = vpack.c.bf16 %v3570_v43, %v3569_v51 }
 0xb70   :  { %4045 = vmatmul.mubr.bf16.vlgmr.msra.gmra.mxu1 %v3571_v42 }
 0xc30   :  { %v3677_v26 = vpop.f32.mrf.mxu1 }
 0xc31   :  { %v3678_v24 = vadd.f32 %v3988_v1, %v3677_v26 }
 0xc32   :  { %v4046_v32 = vpop.f32.mrf.mxu1 }
 0xc33   :  { %3684 = vst [vmem:[%s5906_s16] sm:$0xff] %v3678_v24 }
 0xc34   :  { %v3680_v44 = vpop.f32.mrf.mxu1 }
 0xc35   :  { %v3681_v55 = vadd.f32 %v3988_v1, %v3680_v44 }
 0xc36   :  { %v4047_v7 = vpop.f32.mrf.mxu1 }
 0xc37   :  { %3685 = vst [vmem:[%s5906_s16 + $0x8] sm:$0xff] %v3681_v55 }
 0xc38   :  { %3690 = vsyncpa [#allocation4], 1 }
 0xc39   :  { %3691 = vsyncpa [#allocation6], 1 }
 0xc3a   :  { %3692 = vsyncpa [#allocation9], 1 }

</bundles_post_ra>
